<compile_context>
chip_gen: v7x
topology: tpu7x:2x2x1
jax: 0.10.0
libtpu: 0.0.40
codegen_flags: <defaults>
</compile_context>

<pallas_src>
import functools
import numpy as np
import jax
import jax.numpy as jnp
from jax.experimental import pallas as pl
from jax.experimental.pallas import tpu as pltpu


# ----------------------------- Pallas kernel -------------------------------- #

def fused_forward_kernel(*refs, num_blocks, k_size, h, block_w):
    """One batch element per grid step; all activations stay in VMEM.

    refs = (x_slab0,                     # (1, H*W0, K)  bf16 im2col of block-0 input
            w0, shift0,                  # (K, F) bf16 (BN folded), (1, F) f32
            [w_b, shift_b]*,             # (K*F, F) bf16 (BN folded), (1, F) f32
            w_lin, b_lin,                # (F, ncls) f32, (1, ncls) f32
            o_ref)                       # (1, 1, ncls) f32
    """
    x_ref = refs[0]
    o_ref = refs[-1]
    b_lin = refs[-2][...]
    w_lin = refs[-3][...]
    blk = refs[1:-3]

    # ---- Block 0: single clean 2-D MXU dot over the prebuilt im2col slab ----
    y = jnp.dot(x_ref[0], blk[0][...], preferred_element_type=jnp.float32)  # (H*W0, F)
    y = y + blk[1][...]                              # fused conv-bias + BN shift (f32)
    y = jnp.where(y >= 0.0, y, 0.1 * y)              # LeakyReLU(0.1)

    # ---- Blocks 1..n-1: one contraction-(K*F) matmul per block ----
    f = y.shape[-1]
    for b in range(1, num_blocks):
        w = blk[2 * b][...]                          # (K*F, F) bf16, BN folded
        shift = blk[2 * b + 1][...]                  # (1, F) f32
        w_in, w_out = block_w[b - 1], block_w[b]
        y3 = y.reshape(h, w_in, f)                   # leading-dim split: free
        slab = jnp.concatenate(                      # (h, w_out, K*F) im2col slab
            [y3[:, k:k + w_out, :] for k in range(k_size)], axis=-1)
        slab = slab.reshape(h * w_out, k_size * f).astype(jnp.bfloat16)
        y = jnp.dot(slab, w, preferred_element_type=jnp.float32)   # (h*w_out, F)
        y = y + shift
        y = jnp.where(y >= 0.0, y, 0.1 * y)
    # TODO(synk): Dropout2d is identity in eval mode; training-mode channel dropout
    # (pltpu.prng_random_bits) is intentionally omitted.

    # ---- Global average pool over (H, time) + Linear head, all in-VMEM ----
    feat = jnp.mean(y, axis=0, keepdims=True)        # (1, F)
    out = jnp.dot(feat, w_lin, preferred_element_type=jnp.float32) + b_lin
    o_ref[...] = out[None]                           # (1, 1, ncls)


# ------------------------------ JAX wrapper --------------------------------- #

@jax.jit
def model_forward(x_nchw, params):
    N, _, H, W = x_nchw.shape                        # NCHW, C == 1 for this model
    blocks = params["blocks"]
    num_blocks = len(blocks)
    K, F = blocks[0]["w_kernel"].shape               # block-0 kernel is (K, F)
    ncls = params["w_out"].shape[1]

    block_w = []
    w_cur = W
    for _ in range(num_blocks):
        w_cur = w_cur - K + 1
        block_w.append(w_cur)
    w0_out = block_w[0]

    # im2col slab for block 0 (Cin == 1): (N, H*W0, K), cast to bf16 for the MXU
    # and to halve the HBM->VMEM bytes of the 26x-expanded slab.
    x3 = x_nchw.reshape(N, H, W)
    xcols = jnp.stack([x3[:, :, k:k + w0_out] for k in range(K)], axis=-1)
    xcols = xcols.reshape(N, H * w0_out, K).astype(jnp.bfloat16)

    inputs = [xcols]
    in_specs = [pl.BlockSpec((1, H * w0_out, K), lambda n: (n, 0, 0))]
    for blk in blocks:
        inputs += [blk["w_kernel"], blk["shift"]]
        in_specs += [pl.BlockSpec(blk["w_kernel"].shape, lambda n: (0, 0)),
                     pl.BlockSpec(blk["shift"].shape, lambda n: (0, 0))]
    inputs += [params["w_out"], params["b_out"]]
    in_specs += [pl.BlockSpec(params["w_out"].shape, lambda n: (0, 0)),
                 pl.BlockSpec(params["b_out"].shape, lambda n: (0, 0))]

    kern = functools.partial(fused_forward_kernel, num_blocks=num_blocks,
                             k_size=K, h=H, block_w=tuple(block_w))
    out = pl.pallas_call(
        kern,
        out_shape=jax.ShapeDtypeStruct((N, 1, ncls), jnp.float32),
        grid=(N,),
        in_specs=in_specs,
        out_specs=pl.BlockSpec((1, 1, ncls), lambda n: (n, 0, 0)),
        compiler_params=pltpu.CompilerParams(
            dimension_semantics=("parallel",),      # megacore batch split on v7x
            vmem_limit_bytes=32 * 1024 * 1024),     # safe on v5e/v6e/v7x; working set << this
    )(*inputs)
    return out.reshape(N, ncls)


# Pure-JAX f32 reference (same eval-mode semantics, straight from NCHW, using the
# UNfused conv weights / BN scale+shift) for checking.
def reference_forward(x_nchw, params):
    x = x_nchw
    for blk in params["blocks"]:
        w_oihw = jnp.transpose(blk["w_raw"], (2, 1, 0))[:, :, None, :]   # (Cout, Cin, 1, K)
        x = jax.lax.conv_general_dilated(
            x, w_oihw, window_strides=(1, 1), padding="VALID",
            dimension_numbers=("NCHW", "OIHW", "NCHW"))
        s = blk["scale"][0][None, :, None, None]
        t = blk["shift"][0][None, :, None, None]
        y = x * s + t
        x = jnp.where(y >= 0.0, y, 0.1 * y)
    feat = jnp.mean(x, axis=(2, 3))
    return feat @ params["w_out"] + params["b_out"]


# ------------------------------ param init ---------------------------------- #

def init_params(key, num_blocks, feat_out, k_size, num_classes):
    blocks = []
    bn_eps = 0.001
    for i in range(num_blocks):
        cin = 1 if i == 0 else feat_out
        key, kw, kb, kg, kbe, km, kv = jax.random.split(key, 7)
        w = 0.1 * jax.random.normal(kw, (k_size, cin, feat_out), jnp.float32)
        conv_b = 0.1 * jax.random.normal(kb, (feat_out,), jnp.float32)
        gamma = 0.5 + jax.random.uniform(kg, (feat_out,), jnp.float32)
        beta = 0.1 * jax.random.normal(kbe, (feat_out,), jnp.float32)
        run_mean = 0.1 * jax.random.normal(km, (feat_out,), jnp.float32)
        run_var = 0.5 + jax.random.uniform(kv, (feat_out,), jnp.float32)
        scale = gamma / jnp.sqrt(run_var + bn_eps)
        shift = (conv_b - run_mean) * scale + beta
        w_fused = w * scale[None, None, :]          # fold BN scale into conv weight
        if i == 0:
            w_kernel = w_fused[:, 0, :]                      # (K, F)
        else:
            w_kernel = w_fused.reshape(k_size * cin, feat_out)  # (K*F, F): slab-ready
        blocks.append({
            "w_kernel": w_kernel.astype(jnp.bfloat16),       # kernel-ready (folded, bf16)
            "shift": shift[None, :].astype(jnp.float32),
            "w_raw": w,                                      # for the reference only
            "scale": scale[None, :].astype(jnp.float32),
        })
    key, kwo, kbo = jax.random.split(key, 3)
    w_out = 0.1 * jax.random.normal(kwo, (feat_out, num_classes), jnp.float32)
    b_out = 0.1 * jax.random.normal(kbo, (1, num_classes), jnp.float32)
    return {"blocks": blocks, "w_out": w_out, "b_out": b_out}


# ---------------------------------- main ------------------------------------ #

if __name__ == "__main__":
    # Small, module-consistent shapes: batch=2, 1 input feature map,
    # 4 electrode rows (H), 80 time samples (W), filter (1, 26), 2 blocks,
    # 32 features per block, 8 classes.
    N, H, W = 2, 4, 80
    NUM_BLOCKS, FEAT, K, NUM_CLASSES = 2, 32, 26, 8

    key = jax.random.PRNGKey(0)
    key, kx = jax.random.split(key)
    x = jax.random.normal(kx, (N, 1, H, W), jnp.float32)     # NCHW, like PyTorch

    params = init_params(key, NUM_BLOCKS, FEAT, K, NUM_CLASSES)

    out = jax.block_until_ready(model_forward(x, params))
    ref = jax.block_until_ready(reference_forward(x, params))

    assert out.shape == (N, NUM_CLASSES)
    # bf16 MXU inputs with f32 accumulation vs. pure-f32 reference -> loose tolerance.
    np.testing.assert_allclose(np.asarray(out), np.asarray(ref), rtol=2e-2, atol=2e-2)
    print("KERNEL_OK")
</pallas_src>

<mosaic_0001>
module attributes {stable_mosaic.version = 11 : i64} {
  func.func @fused_forward_kernel(%arg0: i32, %arg1: memref<1x220x26xbf16, #tpu.memory_space<vmem>>, %arg2: memref<26x32xbf16, #tpu.memory_space<vmem>>, %arg3: memref<1x32xf32, #tpu.memory_space<vmem>>, %arg4: memref<832x32xbf16, #tpu.memory_space<vmem>>, %arg5: memref<1x32xf32, #tpu.memory_space<vmem>>, %arg6: memref<32x8xf32, #tpu.memory_space<vmem>>, %arg7: memref<1x8xf32, #tpu.memory_space<vmem>>, %arg8: memref<1x1x8xf32, #tpu.memory_space<vmem>>) attributes {dimension_semantics = [#tpu.dimension_semantics<parallel>], iteration_bounds = array<i64: 2>, scalar_prefetch = 0 : i64, scratch_operands = 0 : i64, tpu.core_type = #tpu.core_type<tc>, window_params = [{transform_indices = @transform_0, window_bounds = array<i64: 1, 220, 26>}, {pipeline_mode = #tpu.pipeline_mode<synchronous>, transform_indices = @transform_1, window_bounds = array<i64: 26, 32>}, {pipeline_mode = #tpu.pipeline_mode<synchronous>, transform_indices = @transform_2, window_bounds = array<i64: 1, 32>}, {pipeline_mode = #tpu.pipeline_mode<synchronous>, transform_indices = @transform_3, window_bounds = array<i64: 832, 32>}, {pipeline_mode = #tpu.pipeline_mode<synchronous>, transform_indices = @transform_4, window_bounds = array<i64: 1, 32>}, {pipeline_mode = #tpu.pipeline_mode<synchronous>, transform_indices = @transform_5, window_bounds = array<i64: 32, 8>}, {pipeline_mode = #tpu.pipeline_mode<synchronous>, transform_indices = @transform_6, window_bounds = array<i64: 1, 8>}, {transform_indices = @transform_7, window_bounds = array<i64: 1, 1, 8>}]} {
    %c0 = arith.constant 0 : index
    %c0_0 = arith.constant 0 : index
    %0 = vector.load %arg7[%c0, %c0_0] : memref<1x8xf32, #tpu.memory_space<vmem>>, vector<1x8xf32>
    %c0_1 = arith.constant 0 : index
    %c0_2 = arith.constant 0 : index
    %1 = vector.load %arg6[%c0_1, %c0_2] : memref<32x8xf32, #tpu.memory_space<vmem>>, vector<32x8xf32>
    %c0_3 = arith.constant 0 : index
    %c0_4 = arith.constant 0 : index
    %c0_5 = arith.constant 0 : index
    %2 = vector.load %arg1[%c0_3, %c0_4, %c0_5] : memref<1x220x26xbf16, #tpu.memory_space<vmem>>, vector<1x220x26xbf16>
    %3 = vector.shape_cast %2 : vector<1x220x26xbf16> to vector<220x26xbf16>
    %c0_6 = arith.constant 0 : index
    %c0_7 = arith.constant 0 : index
    %4 = vector.load %arg2[%c0_6, %c0_7] : memref<26x32xbf16, #tpu.memory_space<vmem>>, vector<26x32xbf16>
    %cst = arith.constant dense<0.000000e+00> : vector<220x32xf32>
    %5 = tpu.matmul %3, %4, %cst {dimension_numbers = #tpu.dot_dimension_numbers<[1], [0], [0], [1], [0, 0, 1, 1], [], []>} : vector<220x26xbf16>, vector<26x32xbf16>, vector<220x32xf32> -> vector<220x32xf32>
    %c0_8 = arith.constant 0 : index
    %c0_9 = arith.constant 0 : index
    %6 = vector.load %arg3[%c0_8, %c0_9] : memref<1x32xf32, #tpu.memory_space<vmem>>, vector<1x32xf32>
    %7 = vector.broadcast %6 : vector<1x32xf32> to vector<220x32xf32>
    %8 = arith.addf %5, %7 : vector<220x32xf32>
    %cst_10 = arith.constant 0.000000e+00 : f32
    %9 = vector.broadcast %cst_10 : f32 to vector<220x32xf32>
    %10 = arith.cmpf oge, %8, %9 : vector<220x32xf32>
    %cst_11 = arith.constant 1.000000e-01 : f32
    %11 = vector.broadcast %cst_11 : f32 to vector<220x32xf32>
    %12 = arith.mulf %11, %8 : vector<220x32xf32>
    %13 = arith.select %10, %8, %12 : vector<220x32xi1>, vector<220x32xf32>
    %c0_12 = arith.constant 0 : index
    %c0_13 = arith.constant 0 : index
    %14 = vector.load %arg4[%c0_12, %c0_13] : memref<832x32xbf16, #tpu.memory_space<vmem>>, vector<832x32xbf16>
    %c0_14 = arith.constant 0 : index
    %c0_15 = arith.constant 0 : index
    %15 = vector.load %arg5[%c0_14, %c0_15] : memref<1x32xf32, #tpu.memory_space<vmem>>, vector<1x32xf32>
    %16 = vector.shape_cast %13 : vector<220x32xf32> to vector<4x55x32xf32>
    %17 = vector.extract_strided_slice %16 {offsets = [0, 0, 0], sizes = [4, 30, 32], strides = [1, 1, 1]} : vector<4x55x32xf32> to vector<4x30x32xf32>
    %18 = vector.extract_strided_slice %16 {offsets = [0, 1, 0], sizes = [4, 30, 32], strides = [1, 1, 1]} : vector<4x55x32xf32> to vector<4x30x32xf32>
    %19 = vector.extract_strided_slice %16 {offsets = [0, 2, 0], sizes = [4, 30, 32], strides = [1, 1, 1]} : vector<4x55x32xf32> to vector<4x30x32xf32>
    %20 = vector.extract_strided_slice %16 {offsets = [0, 3, 0], sizes = [4, 30, 32], strides = [1, 1, 1]} : vector<4x55x32xf32> to vector<4x30x32xf32>
    %21 = vector.extract_strided_slice %16 {offsets = [0, 4, 0], sizes = [4, 30, 32], strides = [1, 1, 1]} : vector<4x55x32xf32> to vector<4x30x32xf32>
    %22 = vector.extract_strided_slice %16 {offsets = [0, 5, 0], sizes = [4, 30, 32], strides = [1, 1, 1]} : vector<4x55x32xf32> to vector<4x30x32xf32>
    %23 = vector.extract_strided_slice %16 {offsets = [0, 6, 0], sizes = [4, 30, 32], strides = [1, 1, 1]} : vector<4x55x32xf32> to vector<4x30x32xf32>
    %24 = vector.extract_strided_slice %16 {offsets = [0, 7, 0], sizes = [4, 30, 32], strides = [1, 1, 1]} : vector<4x55x32xf32> to vector<4x30x32xf32>
    %25 = vector.extract_strided_slice %16 {offsets = [0, 8, 0], sizes = [4, 30, 32], strides = [1, 1, 1]} : vector<4x55x32xf32> to vector<4x30x32xf32>
    %26 = vector.extract_strided_slice %16 {offsets = [0, 9, 0], sizes = [4, 30, 32], strides = [1, 1, 1]} : vector<4x55x32xf32> to vector<4x30x32xf32>
    %27 = vector.extract_strided_slice %16 {offsets = [0, 10, 0], sizes = [4, 30, 32], strides = [1, 1, 1]} : vector<4x55x32xf32> to vector<4x30x32xf32>
    %28 = vector.extract_strided_slice %16 {offsets = [0, 11, 0], sizes = [4, 30, 32], strides = [1, 1, 1]} : vector<4x55x32xf32> to vector<4x30x32xf32>
    %29 = vector.extract_strided_slice %16 {offsets = [0, 12, 0], sizes = [4, 30, 32], strides = [1, 1, 1]} : vector<4x55x32xf32> to vector<4x30x32xf32>
    %30 = vector.extract_strided_slice %16 {offsets = [0, 13, 0], sizes = [4, 30, 32], strides = [1, 1, 1]} : vector<4x55x32xf32> to vector<4x30x32xf32>
    %31 = vector.extract_strided_slice %16 {offsets = [0, 14, 0], sizes = [4, 30, 32], strides = [1, 1, 1]} : vector<4x55x32xf32> to vector<4x30x32xf32>
    %32 = vector.extract_strided_slice %16 {offsets = [0, 15, 0], sizes = [4, 30, 32], strides = [1, 1, 1]} : vector<4x55x32xf32> to vector<4x30x32xf32>
    %33 = vector.extract_strided_slice %16 {offsets = [0, 16, 0], sizes = [4, 30, 32], strides = [1, 1, 1]} : vector<4x55x32xf32> to vector<4x30x32xf32>
    %34 = vector.extract_strided_slice %16 {offsets = [0, 17, 0], sizes = [4, 30, 32], strides = [1, 1, 1]} : vector<4x55x32xf32> to vector<4x30x32xf32>
    %35 = vector.extract_strided_slice %16 {offsets = [0, 18, 0], sizes = [4, 30, 32], strides = [1, 1, 1]} : vector<4x55x32xf32> to vector<4x30x32xf32>
    %36 = vector.extract_strided_slice %16 {offsets = [0, 19, 0], sizes = [4, 30, 32], strides = [1, 1, 1]} : vector<4x55x32xf32> to vector<4x30x32xf32>
    %37 = vector.extract_strided_slice %16 {offsets = [0, 20, 0], sizes = [4, 30, 32], strides = [1, 1, 1]} : vector<4x55x32xf32> to vector<4x30x32xf32>
    %38 = vector.extract_strided_slice %16 {offsets = [0, 21, 0], sizes = [4, 30, 32], strides = [1, 1, 1]} : vector<4x55x32xf32> to vector<4x30x32xf32>
    %39 = vector.extract_strided_slice %16 {offsets = [0, 22, 0], sizes = [4, 30, 32], strides = [1, 1, 1]} : vector<4x55x32xf32> to vector<4x30x32xf32>
    %40 = vector.extract_strided_slice %16 {offsets = [0, 23, 0], sizes = [4, 30, 32], strides = [1, 1, 1]} : vector<4x55x32xf32> to vector<4x30x32xf32>
    %41 = vector.extract_strided_slice %16 {offsets = [0, 24, 0], sizes = [4, 30, 32], strides = [1, 1, 1]} : vector<4x55x32xf32> to vector<4x30x32xf32>
    %42 = vector.extract_strided_slice %16 {offsets = [0, 25, 0], sizes = [4, 30, 32], strides = [1, 1, 1]} : vector<4x55x32xf32> to vector<4x30x32xf32>
    %43 = tpu.concatenate %17, %18, %19, %20, %21, %22, %23, %24, %25, %26, %27, %28, %29, %30, %31, %32 in 2 : vector<4x30x32xf32>, vector<4x30x32xf32>, vector<4x30x32xf32>, vector<4x30x32xf32>, vector<4x30x32xf32>, vector<4x30x32xf32>, vector<4x30x32xf32>, vector<4x30x32xf32>, vector<4x30x32xf32>, vector<4x30x32xf32>, vector<4x30x32xf32>, vector<4x30x32xf32>, vector<4x30x32xf32>, vector<4x30x32xf32>, vector<4x30x32xf32>, vector<4x30x32xf32> -> vector<4x30x512xf32>
    %44 = tpu.concatenate %33, %34, %35, %36, %37, %38, %39, %40, %41, %42 in 2 : vector<4x30x32xf32>, vector<4x30x32xf32>, vector<4x30x32xf32>, vector<4x30x32xf32>, vector<4x30x32xf32>, vector<4x30x32xf32>, vector<4x30x32xf32>, vector<4x30x32xf32>, vector<4x30x32xf32>, vector<4x30x32xf32> -> vector<4x30x320xf32>
    %45 = tpu.concatenate %43, %44 in 2 : vector<4x30x512xf32>, vector<4x30x320xf32> -> vector<4x30x832xf32>
    %46 = vector.shape_cast %45 : vector<4x30x832xf32> to vector<120x832xf32>
    %47 = arith.truncf %46 : vector<120x832xf32> to vector<120x832xbf16>
    %cst_16 = arith.constant dense<0.000000e+00> : vector<120x32xf32>
    %48 = tpu.matmul %47, %14, %cst_16 {dimension_numbers = #tpu.dot_dimension_numbers<[1], [0], [0], [1], [0, 0, 1, 1], [], []>} : vector<120x832xbf16>, vector<832x32xbf16>, vector<120x32xf32> -> vector<120x32xf32>
    %49 = vector.broadcast %15 : vector<1x32xf32> to vector<120x32xf32>
    %50 = arith.addf %48, %49 : vector<120x32xf32>
    %cst_17 = arith.constant 0.000000e+00 : f32
    %51 = vector.broadcast %cst_17 : f32 to vector<120x32xf32>
    %52 = arith.cmpf oge, %50, %51 : vector<120x32xf32>
    %cst_18 = arith.constant 1.000000e-01 : f32
    %53 = vector.broadcast %cst_18 : f32 to vector<120x32xf32>
    %54 = arith.mulf %53, %50 : vector<120x32xf32>
    %55 = arith.select %52, %50, %54 : vector<120x32xi1>, vector<120x32xf32>
    %cst_19 = arith.constant dense<0.000000e+00> : vector<32xf32>
    %56 = vector.multi_reduction <add>, %55, %cst_19 [0] : vector<120x32xf32> to vector<32xf32>
    %57 = vector.shape_cast %56 : vector<32xf32> to vector<1x32xf32>
    %cst_20 = arith.constant 1.200000e+02 : f32
    %58 = vector.broadcast %cst_20 : f32 to vector<1x32xf32>
    %59 = arith.divf %57, %58 : vector<1x32xf32>
    %cst_21 = arith.constant dense<0.000000e+00> : vector<1x8xf32>
    %60 = tpu.matmul %59, %1, %cst_21 {dimension_numbers = #tpu.dot_dimension_numbers<[1], [0], [0], [1], [0, 0, 1, 1], [], []>} : vector<1x32xf32>, vector<32x8xf32>, vector<1x8xf32> -> vector<1x8xf32>
    %61 = arith.addf %60, %0 : vector<1x8xf32>
    %62 = vector.shape_cast %61 : vector<1x8xf32> to vector<1x1x8xf32>
    %c0_22 = arith.constant 0 : index
    %c0_23 = arith.constant 0 : index
    %c0_24 = arith.constant 0 : index
    %63 = vector.load %arg8[%c0_22, %c0_23, %c0_24] : memref<1x1x8xf32, #tpu.memory_space<vmem>>, vector<1x1x8xf32>
    tpu.vector_store %arg8[%c0_22, %c0_23, %c0_24], %62 {strides = array<i32>} : memref<1x1x8xf32, #tpu.memory_space<vmem>>, vector<1x1x8xf32>,
    return
  }
  func.func @transform_0(%arg0: i32) -> (i32, i32, i32) {
    %c0_i32 = arith.constant 0 : i32
    %c0_i32_0 = arith.constant 0 : i32
    %c0_i32_1 = arith.constant 0 : i32
    return %arg0, %c0_i32, %c0_i32_0 : i32, i32, i32
  }
  func.func @transform_1(%arg0: i32) -> (i32, i32) {
    %c0_i32 = arith.constant 0 : i32
    %c0_i32_0 = arith.constant 0 : i32
    %c0_i32_1 = arith.constant 0 : i32
    return %c0_i32, %c0_i32_0 : i32, i32
  }
  func.func @transform_2(%arg0: i32) -> (i32, i32) {
    %c0_i32 = arith.constant 0 : i32
    %c0_i32_0 = arith.constant 0 : i32
    %c0_i32_1 = arith.constant 0 : i32
    return %c0_i32, %c0_i32_0 : i32, i32
  }
  func.func @transform_3(%arg0: i32) -> (i32, i32) {
    %c0_i32 = arith.constant 0 : i32
    %c0_i32_0 = arith.constant 0 : i32
    %c0_i32_1 = arith.constant 0 : i32
    return %c0_i32, %c0_i32_0 : i32, i32
  }
  func.func @transform_4(%arg0: i32) -> (i32, i32) {
    %c0_i32 = arith.constant 0 : i32
    %c0_i32_0 = arith.constant 0 : i32
    %c0_i32_1 = arith.constant 0 : i32
    return %c0_i32, %c0_i32_0 : i32, i32
  }
  func.func @transform_5(%arg0: i32) -> (i32, i32) {
    %c0_i32 = arith.constant 0 : i32
    %c0_i32_0 = arith.constant 0 : i32
    %c0_i32_1 = arith.constant 0 : i32
    return %c0_i32, %c0_i32_0 : i32, i32
  }
  func.func @transform_6(%arg0: i32) -> (i32, i32) {
    %c0_i32 = arith.constant 0 : i32
    %c0_i32_0 = arith.constant 0 : i32
    %c0_i32_1 = arith.constant 0 : i32
    return %c0_i32, %c0_i32_0 : i32, i32
  }
  func.func @transform_7(%arg0: i32) -> (i32, i32, i32) {
    %c0_i32 = arith.constant 0 : i32
    %c0_i32_0 = arith.constant 0 : i32
    %c0_i32_1 = arith.constant 0 : i32
    return %arg0, %c0_i32, %c0_i32_0 : i32, i32, i32
  }
}

</mosaic_0001>

<bundles_post_ra>
// kernel: model_forward.1
= control target key start
LH: loop header
LB: loop body
LE: loop exit
PB: predicated region body
PF: predicated region fallthrough
CT: control target
= control target key end

     0   :  { %12 = vsyncpa [#allocation3], 0  ;;  %s16506_s0 = inlined_call_operand.vmem [shape: bf16[2,220,26], index: 0, kind: input, shape index: {}]   ;;  %s16507_s1 = inlined_call_operand.vmem [shape: bf16[26,32], index: 1, kind: input, shape index: {}]   ;;  %s16508_s2 = inlined_call_operand.vmem [shape: f32[1,32], index: 2, kind: input, shape index: {}]   ;;  %s16509_s3 = inlined_call_operand.vmem [shape: bf16[832,32], index: 3, kind: input, shape index: {}]   ;;  %s16510_s4 = inlined_call_operand.vmem [shape: f32[1,32], index: 4, kind: input, shape index: {}]   ;;  %s16511_s5 = inlined_call_operand.vmem [shape: f32[32,8], index: 5, kind: input, shape index: {}]   ;;  %s16512_s6 = inlined_call_operand.vmem [shape: f32[1,8], index: 6, kind: input, shape index: {}]   ;;  %s16513_s7 = inlined_call_operand.hbm [shape: f32[2,1,8], index: 7, kind: output, shape index: {}]  }
   0x1   :  { %14 = vsyncpa [#allocation3 + $0x1], 0  ;;  %s11240_s24 = smov 0   ;;  %s11242_s25 = smov 0  }
   0x2   :  { %s11244_s26 = smov 0   ;;  %s11246_s27 = smov 0  }
   0x3 LB: > { %s11261_s28 = sadd.s32 4294967295, %s11189_s27   ;;  %s10490_s29 = sadd.s32 4294967294, %s11189_s27   ;;  %s11189_s27 = sphi %s11246_s27, %s17393_s27   ;;  %s11185_s26 = sphi %s11244_s26, %s17392_s26   ;;  %s11181_s25 = sphi %s11242_s25, %s17391_s25   ;;  %s11177_s24 = sphi %s11240_s24, %s17390_s24  }
   0x4   : > { %s11265_s30 = sadd.s32 1, %s11189_s27   ;;  %s179_s8 = sadd.s32 1, %s11185_s26 }
   0x5   : > { %s176_s9 = ssub.s32 %s11189_s27, %s11265_s30  ;;  %p189_p0 = scmp.ne.s32.totalorder %s11185_s26, %s11181_s25 }
   0x6   : > { %p177_p1 = scmp.eq.s32.totalorder %s176_s9, 0  ;;  %p190_p2 = scmp.eq.s32.totalorder %s11261_s28, 1 }
   0x7   : > { %p195_p3 = scmp.ne.s32.totalorder %s11181_s25, %s11177_s24  ;;  %p196_p4 = scmp.eq.s32.totalorder %s10490_s29, 1 }
   0x8   : > { %s11276_s10 = scalar_select %p177_p1, %s11185_s26, %s179_s8  }
   0x9   : > { %p11278_p5 = por %p190_p2, %p189_p0  ;;  %p11282_p6 = por %p196_p4, %p195_p3 }
   0xa   : > { %p10493_p7 = scmp.ge.s32.totalorder %s11189_s27, 1  ;;  %p240_p8 = scmp.lt.s32.totalorder %s11189_s27, 3 }
   0xc   : > { %p241_p9 = pnand %p10493_p7, %p240_p8 }
   0xe   : > { %244 = sbr.rel (%p241_p9) target bundleno = 1368 (0x558), region = 48 }
  0x15   : > { %v11056_v0 = vld [vmem:[%s16507_s1] sm:$0xff]   ;;  %vm445_vm0 = vcmask 1044480   ;;  %v11057_v1 = vld [vmem:[%s16507_s1 + $0x8] sm:$0x1f]   ;;  %p271_p10 = scmp.lt.s32.totalorder %s11261_s28, 1  ;;  %vm402_vm1 = vcmask 211968   ;;  %v815_v19 = vlaneseq }
  0x16   : > { %10934 = vmatprep.subr.bf16.mxu0 %v11056_v0  ;;  %v447_v2 = vsel %vm445_vm0, %v11057_v1, 0  ;;  %v11191_v17 = vmov 1966171168   ;;  %v11316_v20 = vld [vmem:[%s16508_s2] ss:$0 sm:$0xff]  ;;  %s11192_s29 = smov 64  }
  0x17   : > { %10935 = vmatpush3.bf16.msra.mxu0 %v11056_v0  ;;  %s272_s17 = scalar_select %p271_p10, %s11261_s28, 1  ;;  %v813_v18 = vunpack.c.l.s4 %v11191_v17  ;;  %v11318_v22 = vshrl.u32 %v815_v19, 7 }
  0x18   : > { %11007 = vmatprep.subr.msk.bf16.mxu0 %vm445_vm0, %v11057_v1  ;;  %s11193_s8 = smov 32   ;;  %s11194_s9 = smov 96  }
  0x19   : > { %s11008_s18 = smul.u32 112, %s272_s17  ;;  %v814_v21 = vunpack.c.0.s8 %v813_v18  ;;  %16799 = vst [vmem:[#allocation5_spill] sm:$0xff] %v11318_v22  ;;  %s269_s20 = sand.u32 1, %s11181_s25  }
  0x1a   : > { %s10706_s23 = sshll.u32 %s11261_s28, 4  ;;  %s10423_s15 = scalar_lea.sflag [#allocation3], %s269_s20 }
  0x1b   : > { %10937 = vmatpush3.bf16.msra.mxu0 %v447_v2  ;;  %s275_s21 = scalar_lea.vmem %s16506_s0, %s11008_s18  ;;  %v11323_v28 = vsub.s32 %v814_v21, %v11318_v22  ;;  %s16464_s14 = scalar_lea.hbm %s16513_s7, %s10706_s23 }
  0x1c   : > { %v11058_v3 = vld [vmem:[%s275_s21] sm:$0xff]   ;;  %v11059_v4 = vld [vmem:[%s275_s21 + $0x8] sm:$0xff]   ;;  %v11060_v5 = vld [vmem:[%s275_s21 + $0x10] sm:$0xff]   ;;  %s11199_s28 = smov [#allocation2]  }
  0x1d   : > { %10938 = vmatprep.mubr.msk.bf16.mxu0 %vm402_vm1, %v11058_v3  ;;  %v11061_v6 = vld [vmem:[%s275_s21 + $0x18] sm:$0xff]   ;;  %v11062_v7 = vld [vmem:[%s275_s21 + $0x20] sm:$0xff]   ;;  %v11063_v8 = vld [vmem:[%s275_s21 + $0x28] sm:$0xff]   ;;  %s11131_s17 = sshll.u32 %s11199_s28, 4  ;;  %s11132_s17 = int_to_ptr.vmem [resolvable:$false] %s11131_s17 }
  0x1e   : > { %10939 = vmatmul.mubr.msk.bf16.vlgmr.msra.gmra.mrb[0].mxu0 %vm402_vm1, %v11059_v4  ;;  %v11064_v9 = vld [vmem:[%s275_s21 + $0x30] sm:$0xff]   ;;  %v11065_v10 = vld [vmem:[%s275_s21 + $0x38] sm:$0xff]   ;;  %v11066_v11 = vld [vmem:[%s275_s21 + $0x40] sm:$0xff]   ;;  %s11133_s18 = scalar_lea.vmem %s11132_s17, 32 }
  0x1f   : > { %10942 = vmatprep.mubr.msk.bf16.mxu0 %vm402_vm1, %v11060_v5  ;;  %v11067_v12 = vld [vmem:[%s275_s21 + $0x48] sm:$0xff]   ;;  %v11068_v13 = vld [vmem:[%s275_s21 + $0x50] sm:$0xff]   ;;  %v11069_v14 = vld [vmem:[%s275_s21 + $0x58] sm:$0xff]  }
  0x20   : > { %v11070_v15 = vld [vmem:[%s275_s21 + $0x60] sm:$0xff]   ;;  %v11071_v16 = vld [vmem:[%s275_s21 + $0x68] sm:$0x3f]  }
  0x26   : > { %10943 = vmatmul.mubr.msk.bf16.gmra.mrb[4].mxu0 %vm402_vm1, %v11061_v6 }
  0x27   : > { %10946 = vmatprep.mubr.msk.bf16.mxu0 %vm402_vm1, %v11062_v7 }
  0x2e   : > { %10947 = vmatmul.mubr.msk.bf16.gmra.mrb[8].mxu0 %vm402_vm1, %v11063_v8 }
  0x2f   : > { %10950 = vmatprep.mubr.msk.bf16.mxu0 %vm402_vm1, %v11064_v9 }
  0x36   : > { %10951 = vmatmul.mubr.msk.bf16.gmra.mrb[12].mxu0 %vm402_vm1, %v11065_v10 }
  0x37   : > { %10954 = vmatprep.mubr.msk.bf16.mxu0 %vm402_vm1, %v11066_v11 }
  0x3e   : > { %10955 = vmatmul.mubr.msk.bf16.gmra.mrb[16].mxu0 %vm402_vm1, %v11067_v12 }
  0x3f   : > { %10958 = vmatprep.mubr.msk.bf16.mxu0 %vm402_vm1, %v11068_v13 }
  0x46   : > { %10959 = vmatmul.mubr.msk.bf16.gmra.mrb[20].mxu0 %vm402_vm1, %v11069_v14 }
  0x47   : > { %10962 = vmatprep.mubr.msk.bf16.mxu0 %vm402_vm1, %v11070_v15 }
  0x4e   : > { %10963 = vmatmul.mubr.msk.bf16.gmra.mrb[24].mxu0 %vm402_vm1, %v11071_v16 }
  0xf1   : > { %v10940_v23 = vpop.f32.mrb[0].mxu0 }
  0xf2   : > { %v492_v24 = vadd.f32 %v10940_v23, %v11316_v20  ;;  %v483_v25 = vpop.f32.mrb[1].mxu0 }
  0xf3   : > { %v484_v26 = vadd.f32 %v11316_v20, %v483_v25  ;;  %v10941_v27 = vpop.f32.mrb[2].mxu0 }
  0xf4   : > { %v486_v29 = vpop.f32.mrb[3].mxu0  ;;  %v495_v31 = vadd.f32 %v10941_v27, %v11316_v20  ;;  %v624_v32 = vmul.f32 0.1, %v492_v24  ;;  %vm596_vm3 = vcmp.ge.f32.partialorder %v492_v24, 0.0 }
  0xf5   : > { %vm594_vm2 = vcmp.ge.f32.partialorder %v484_v26, 0.0  ;;  %v622_v30 = vmul.f32 0.1, %v484_v26  ;;  %v487_v35 = vadd.f32 %v11316_v20, %v486_v29 }
  0xf6   : > { %v625_v36 = vmul.f32 0.1, %v495_v31  ;;  %v652_v38 = vsel %vm596_vm3, %v492_v24, %v624_v32  ;;  %vm597_vm4 = vcmp.ge.f32.partialorder %v495_v31, 0.0  ;;  %vm5966_vm3 = vcmask 261120  }
  0xf7   : > { %v650_v33 = vsel %vm594_vm2, %v484_v26, %v622_v30  ;;  %v623_v44 = vmul.f32 0.1, %v487_v35  ;;  %v909_v46 = vcombine.high %v652_v38, %v652_v38  ;;  %vm595_vm5 = vcmp.ge.f32.partialorder %v487_v35, 0.0 }
  0xf8   : > { %v818_v34 = vrot.slane %v650_v33, %v11323_v28  ;;  %v653_v47 = vsel %vm597_vm4, %v495_v31, %v625_v36  ;;  %v811_v48 = vcombine.high %v650_v33, %v650_v33  ;;  %v916_v50 = vrot.slane %v652_v38, %v11323_v28 }
  0xf9   : > { %v10944_v37 = vpop.f32.mrb[4].mxu0  ;;  %v958_v51 = vcombine.high %v653_v47, %v653_v47  ;;  %v651_v52 = vsel %vm595_vm5, %v487_v35, %v623_v44  ;;  %v923_v53 = vrot.slane %v909_v46, %v11323_v28  ;;  %v965_v56 = vrot.slane %v653_v47, %v11323_v28 }
  0xfa   : > { %v826_v39 = vcombine.high %v818_v34, %v818_v34  ;;  %v499_v40 = vpop.f32.mrb[5].mxu0  ;;  %v11329_v42 = vrot.slane %v818_v34, %v11323_v28  ;;  %v825_v55 = vrot.slane %v811_v48, %v11323_v28  ;;  %v924_v57 = vcombine.high %v916_v50, %v916_v50 }
  0xfb   : > { %v10945_v41 = vpop.f32.mrb[6].mxu0  ;;  %v860_v58 = vcombine.high %v651_v52, %v651_v52  ;;  %v508_v59 = vadd.f32 %v10944_v37, %v11316_v20  ;;  %v972_v61 = vrot.slane %v958_v51, %v11323_v28  ;;  %v925_v63 = vcombine.high %v923_v53, %v923_v53 }
  0xfc   : > { %16800 = vst [vmem:[#allocation6_spill] sm:$0xff] %v11329_v42  ;;  %v11332_v43 = vrot.slane %v826_v39, %v11323_v28  ;;  %v502_v45 = vpop.f32.mrb[7].mxu0  ;;  %v867_v0 = vrot.slane %v651_v52, %v11323_v28  ;;  %v500_v1 = vadd.f32 %v11316_v20, %v499_v40  ;;  %v11353_v3 = vrot.slane %v916_v50, %v11323_v28 }
  0xfd   : > { %v827_v4 = vcombine.high %v825_v55, %v825_v55  ;;  %v973_v5 = vcombine.high %v965_v56, %v965_v56  ;;  %v11356_v6 = vrot.slane %v923_v53, %v11323_v28  ;;  %v11359_v7 = vrot.slane %v924_v57, %v11323_v28 }
  0xfe   : > { %16801 = vst [vmem:[#allocation7_spill] sm:$0xff] %v11332_v43  ;;  %v874_v8 = vrot.slane %v860_v58, %v11323_v28  ;;  %v628_v9 = vmul.f32 0.1, %v508_v59  ;;  %v11363_v10 = vrot.slane %v825_v55, %v11323_v28  ;;  %v974_v12 = vcombine.high %v972_v61, %v972_v61 }
  0xff   : > { %vm600_vm6 = vcmp.ge.f32.partialorder %v508_v59, 0.0  ;;  %v953_v13 = vrot.slane %v925_v63, %v11323_v28  ;;  %v875_v14 = vcombine.high %v867_v0, %v867_v0  ;;  %v626_v15 = vmul.f32 0.1, %v500_v1 }
 0x100   : > { %v511_v16 = vadd.f32 %v10945_v41, %v11316_v20  ;;  %v11372_v18 = vrot.slane %v827_v4, %v11323_v28  ;;  %v981_v19 = vrot.slane %v965_v56, %v11323_v28  ;;  %v995_v21 = vrot.slane %v973_v5, %v11323_v28 }
 0x101   : > { %v11338_v54 = vpop.f32.mrb[8].mxu0  ;;  %vm598_vm7 = vcmp.ge.f32.partialorder %v500_v1, 0.0  ;;  %v876_v24 = vcombine.high %v874_v8, %v874_v8  ;;  %v656_v25 = vsel %vm600_vm6, %v508_v59, %v628_v9  ;;  %v2256_v26 = vcombine.low %v11353_v3, %v11359_v7 }
 0x102   : > { %v11343_v60 = vpop.f32.mrb[9].mxu0  ;;  %v10530_v27 = vcombine.high %v11353_v3, %v11359_v7  ;;  %v11383_v29 = vrot.slane %v972_v61, %v11323_v28  ;;  %v11386_v30 = vrot.slane %v974_v12, %v11323_v28  ;;  %v11389_v31 = vrot.slane %v867_v0, %v11323_v28 }
 0x103   : > { %v11346_v62 = vpop.f32.mrb[10].mxu0  ;;  %v11392_v32 = vadd.f32 %v11316_v20, %v502_v45  ;;  %v11395_v33 = vrot.slane %v874_v8, %v11323_v28  ;;  %v11398_v34 = vrot.slane %v875_v14, %v11323_v28  ;;  %v654_v35 = vsel %vm598_vm7, %v500_v1, %v626_v15 }
 0x104   : > { %v11350_v2 = vpop.f32.mrb[11].mxu0  ;;  %vm601_vm8 = vcmp.ge.f32.partialorder %v511_v16, 0.0  ;;  %v1105_v36 = vcombine.high %v656_v25, %v656_v25  ;;  %v629_v37 = vmul.f32 0.1, %v511_v16  ;;  %v2258_v38 = vcombine.low %v11356_v6, %v953_v13 }
 0x105   : > { %v10531_v39 = vcombine.high %v11356_v6, %v953_v13  ;;  %v11403_v40 = vrot.slane %v876_v24, %v11323_v28  ;;  %v11406_v41 = vrot.slane %v2256_v26, %v11323_v28  ;;  %v11409_v44 = vrot.slane %v10530_v27, %v11323_v28 }
 0x106   : > { %v2305_v45 = vcombine.low %v981_v19, %v995_v21  ;;  %v1112_v46 = vrot.slane %v656_v25, %v11323_v28  ;;  %v1007_v47 = vcombine.high %v654_v35, %v654_v35  ;;  %v1014_v48 = vrot.slane %v654_v35, %v11323_v28 }
 0x107   : > { %16802 = vst [vmem:[#allocation8_spill] sm:$0xff] %v11406_v41  ;;  %16803 = vst [vmem:[#allocation9_spill] sm:$0xff] %v11409_v44  ;;  %v11414_v50 = vrot.slane %v2258_v38, %v11323_v28  ;;  %v11417_v51 = vrot.slane %v10531_v39, %v11323_v28  ;;  %v10532_v53 = vcombine.high %v981_v19, %v995_v21  ;;  %v627_v58 = vmul.f32 0.1, %v11392_v32 }
 0x108   : > { %v11422_v55 = vrot.slane %v2305_v45, %v11323_v28  ;;  %v1119_v56 = vrot.slane %v1105_v36, %v11323_v28  ;;  %v657_v57 = vsel %vm601_vm8, %v511_v16, %v629_v37  ;;  %vm599_vm9 = vcmp.ge.f32.partialorder %v11392_v32, 0.0 }
 0x109   : > { %v11369_v17 = vpop.f32.mrb[12].mxu0  ;;  %16804 = vst [vmem:[#allocation10_spill] sm:$0xff] %v11414_v50  ;;  %16805 = vst [vmem:[#allocation11_spill] sm:$0xff] %v11417_v51  ;;  %v3752_v59 = vcombine.low %v11409_v44, %v11414_v50  ;;  %v11433_v63 = vrot.slane %v10532_v53, %v11323_v28  ;;  %v955_v1 = vcombine.high %v11356_v6, %v11356_v6  ;;  %vm5983_vm5 = vcmask 523264  }
 0x10a   : > { %v11376_v23 = vpop.f32.mrb[13].mxu0  ;;  %16806 = vst [vmem:[#allocation12_spill] sm:$0xff] %v11422_v55  ;;  %v3753_v0 = vcombine.low %v11417_v51, %v11422_v55  ;;  %v1120_v4 = vcombine.high %v1112_v46, %v1112_v46  ;;  %v11440_v5 = vrot.slane %v1112_v46, %v11323_v28  ;;  %v957_v9 = vcombine.high %v953_v13, %v953_v13 }
 0x10b   : > { %16807 = vst [vmem:[#allocation13_spill] sm:$0xff] %v11433_v63  ;;  %v11443_v8 = vrot.slane %v3752_v59, %v11323_v28  ;;  %v1003_v15 = vcombine.high %v981_v19, %v981_v19  ;;  %v1005_v16 = vcombine.high %v995_v21, %v995_v21  ;;  %v1021_v24 = vrot.slane %v1007_v47, %v11323_v28 }
 0x10c   : > { %v11446_v12 = vrot.slane %v3753_v0, %v11323_v28  ;;  %v1022_v25 = vcombine.high %v1014_v48, %v1014_v48  ;;  %v3022_v26 = vcombine.low %v953_v13, %v955_v1  ;;  %v3023_v27 = vcombine.low %v957_v9, %v981_v19  ;;  %v11463_v13 = vpop.f32.mrb[14].mxu0 }
 0x10d   : > { %v3069_v36 = vcombine.low %v995_v21, %v1003_v15  ;;  %v3070_v37 = vcombine.low %v1005_v16, %v11383_v29  ;;  %v524_v38 = vadd.f32 %v11338_v54, %v11316_v20  ;;  %v11457_v39 = vrot.slane %v1014_v48, %v11323_v28 }
 0x10e   : > { %v3768_v35 = vcombine.low %v11443_v8, %v11446_v12  ;;  %v1154_v45 = vcombine.high %v657_v57, %v657_v57  ;;  %v11460_v46 = vrot.slane %v3022_v26, %v11323_v28  ;;  %v3051_v47 = vrot.slane %v3023_v27, %v11323_v28  ;;  %v11486_v26 = vpop.f32.mrb[15].mxu0 }
 0x10f   : > { %v1121_v19 = vcombine.high %v1119_v56, %v1119_v56  ;;  %v11466_v53 = vrot.slane %v657_v57, %v11323_v28  ;;  %v3078_v54 = vrot.slane %v3069_v36, %v11323_v28  ;;  %v11471_v21 = vrot.slane %v3070_v37, %v11323_v28 }
 0x110   : > { %4022 = vrot.lane.b32.xlu0 %v3768_v35, %s11192_s29  ;;  %v11474_v48 = vrot.slane %v1119_v56, %v11323_v28  ;;  %v11477_v59 = vrot.slane %v1120_v4, %v11323_v28  ;;  %v3053_v0 = vcombine.low %v11460_v46, %v3051_v47  ;;  %v2160_v57 = vcombine.low %v11363_v10, %v11372_v18 }
 0x111   : > { %v1023_v1 = vcombine.high %v1021_v24, %v1021_v24  ;;  %v11483_v9 = vrot.slane %v1021_v24, %v11323_v28  ;;  %v3093_v15 = vcombine.low %v3078_v54, %v11471_v21  ;;  %v632_v16 = vmul.f32 0.1, %v524_v38 }
 0x112   : > { %16808 = vst [vmem:[#allocation14_spill] sm:$0xff] %v11474_v48  ;;  %16809 = vst [vmem:[#allocation15_spill] sm:$0xff] %v11477_v59  ;;  %v11489_v56 = vrot.slane %v1022_v25, %v11323_v28  ;;  %v11492_v4 = vrot.slane %v3053_v0, %v11323_v28  ;;  %vm604_vm10 = vcmp.ge.f32.partialorder %v524_v38, 0.0  ;;  %v10526_v27 = vcombine.high %v11329_v42, %v11332_v43  ;;  %v11530_v0 = vpop.f32.mrb[16].mxu0 }
 0x113   : > { %v11497_v35 = vrot.slane %v1154_v45, %v11323_v28  ;;  %v11502_v36 = vrot.slane %v3093_v15, %v11323_v28  ;;  %v10527_v25 = vcombine.high %v11363_v10, %v11372_v18  ;;  %v11507_v37 = vrot.slane %v1121_v19, %v11323_v28  ;;  %16813 = vst [vmem:[#allocation19_spill] sm:$0xff] %v11530_v0  ;;  %v11541_v61 = vpop.f32.mrb[17].mxu0 }
 0x114   : > { %v11514_v45 = vsel %vm599_vm9, %v11392_v32, %v627_v58  ;;  %v11517_v49 = vrot.slane %v2160_v57, %v11323_v28  ;;  %v11520_v15 = vrot.slane %v1023_v1, %v11323_v28  ;;  %v11524_v52 = vrot.slane %v11466_v53, %v11323_v28  ;;  %16815 = vst [vmem:[#allocation21_spill] sm:$0xff] %v11541_v61 }
 0x115   : > { %16810 = vst [vmem:[#allocation16_spill] sm:$0xff] %v11507_v37  ;;  %v4540_v19 = vcombine.low %v11492_v4, %v11502_v36  ;;  %v11528_v14 = vsel %vm604_vm10, %v524_v38, %v632_v16  ;;  %v11539_v1 = vrot.slane %v10526_v27, %v11323_v28  ;;  %v11547_v16 = vrot.slane %v11514_v45, %v11323_v28 }
 0x116   : > { %16811 = vst [vmem:[#allocation17_spill] sm:$0xff] %v11517_v49  ;;  %16812 = vst [vmem:[#allocation18_spill] sm:$0xff] %v11524_v52  ;;  %v11551_v24 = vrot.slane %v10527_v25, %v11323_v28  ;;  %v2207_v57 = vcombine.low %v11389_v31, %v11398_v34  ;;  %v2307_v38 = vcombine.low %v11383_v29, %v11386_v30  ;;  %vm6000_vm8 = vcmask 785408  }
 0x117   : > { %16814 = vst [vmem:[#allocation20_spill] sm:$0xff] %v11539_v1  ;;  %4650 = vrot.lane.b32.xlu1 %v4540_v19, %s11193_s8  ;;  %v3718_v32 = vcombine.low %v11539_v1, %v11517_v49  ;;  %v1004_v58 = vcombine.high %v11383_v29, %v11383_v29  ;;  %v4101_v25 = vcombine.low %v3051_v47, %v3078_v54 }
 0x118   : > { %16816 = vst [vmem:[#allocation22_spill] sm:$0xff] %v11551_v24  ;;  %v11564_v19 = vrot.slane %v2207_v57, %v11323_v28  ;;  %v10556_v11 = vcombine.high %v11383_v29, %v11386_v30  ;;  %v857_v48 = vcombine.high %v11363_v10, %v11363_v10  ;;  %v11572_v37 = vrot.slane %v2307_v38, %v11323_v28 }
 0x119   : > { %v3726_v27 = vrot.slane %v3718_v32, %v11323_v28  ;;  %v3071_v1 = vcombine.low %v11386_v30, %v1004_v58  ;;  %v859_v22 = vcombine.high %v11372_v18, %v11372_v18  ;;  %v11580_v47 = vrot.slane %v4101_v25, %v11323_v28 }
 0x11a   : > { %16817 = vst [vmem:[#allocation23_spill] sm:$0xff] %v11564_v19  ;;  %16818 = vst [vmem:[#allocation24_spill] sm:$0xff] %v11572_v37  ;;  %v3719_v57 = vcombine.low %v11551_v24, %v11564_v19  ;;  %v11583_v29 = vrot.slane %v10556_v11, %v11323_v28  ;;  %v905_v54 = vcombine.high %v11389_v31, %v11389_v31 }
 0x11b   : > { %v3777_v32 = vcombine.low %v11433_v63, %v11572_v37  ;;  %v11590_v58 = vrot.slane %v3071_v1, %v11323_v28  ;;  %v907_v38 = vcombine.high %v11398_v34, %v11398_v34  ;;  %v2924_v19 = vcombine.low %v11372_v18, %v857_v48 }
 0x11c   : > { %16819 = vst [vmem:[#allocation25_spill] sm:$0xff] %v11583_v29  ;;  %v11596_v25 = vrot.slane %v3719_v57, %v11323_v28  ;;  %v3791_v11 = vrot.slane %v11583_v29, %v11323_v28  ;;  %v2925_v49 = vcombine.low %v859_v22, %v11389_v31  ;;  %v2971_v24 = vcombine.low %v11398_v34, %v905_v54 }
 0x11d   : > { %v11603_v37 = vrot.slane %v3777_v32, %v11323_v28  ;;  %v3107_v1 = vrot.slane %v11590_v58, %v11323_v28  ;;  %v4125_v44 = vcombine.low %v11471_v21, %v11590_v58  ;;  %v11610_v18 = vrot.slane %v2924_v19, %v11323_v28 }
 0x11e   : > { %v3734_v48 = vcombine.low %v3726_v27, %v11596_v25  ;;  %v11614_v57 = vrot.slane %v2925_v49, %v11323_v28  ;;  %v2972_v22 = vcombine.low %v907_v38, %v11395_v33  ;;  %v11618_v54 = vrot.slane %v2971_v24, %v11323_v28 }
 0x11f   : > { %v4696_v32 = vcombine.low %v11446_v12, %v11603_v37  ;;  %v3108_v61 = vcombine.low %v11502_v36, %v3107_v1  ;;  %v11624_v21 = vrot.slane %v4125_v44, %v11323_v28  ;;  %v3792_v19 = vcombine.low %v11603_v37, %v3791_v11 }
 0x120   : > { %4018 = vrot.lane.b32.xlu0 %v3734_v48, %s11192_s29  ;;  %v2955_v49 = vcombine.low %v11610_v18, %v11614_v57  ;;  %v11631_v27 = vrot.slane %v2972_v22, %v11323_v28  ;;  %v954_v24 = vcombine.high %v11353_v3, %v11353_v3  ;;  %v956_v12 = vcombine.high %v11359_v7, %v11359_v7 }
 0x121   : > { %4806 = vrot.lane.b32.xlu1 %v4696_v32, %s11192_s29  ;;  %v4852_v44 = vcombine.low %v11580_v47, %v11624_v21  ;;  %v10528_v38 = vcombine.high %v11389_v31, %v11398_v34  ;;  %v2209_v11 = vcombine.low %v11395_v33, %v11403_v40  ;;  %v10529_v1 = vcombine.high %v11395_v33, %v11403_v40 }
 0x122   : > { %v2969_v48 = vrot.slane %v2955_v49, %v11323_v28  ;;  %v3003_v22 = vcombine.low %v11618_v54, %v11631_v27  ;;  %v3020_v63 = vcombine.low %v11359_v7, %v954_v24  ;;  %v3021_v32 = vcombine.low %v956_v12, %v11356_v6 }
 0x123   : > { %v11652_v55 = vrot.slane %v10528_v38, %v11323_v28  ;;  %v11655_v31 = vrot.slane %v2209_v11, %v11323_v28  ;;  %v11658_v34 = vrot.slane %v10529_v1, %v11323_v28  ;;  %v858_v51 = vcombine.high %v11332_v43, %v11332_v43 }
 0x124   : > { %3676 = vrot.lane.b32.xlu0 %v3108_v61, %s11193_s8  ;;  %v11664_v49 = vrot.slane %v3003_v22, %v11323_v28  ;;  %v11667_v7 = vrot.slane %v3020_v63, %v11323_v28  ;;  %v3037_v6 = vrot.slane %v3021_v32, %v11323_v28  ;;  %v16823_v24 = vcombine.high %v11329_v42, %v11329_v42 }
 0x125   : > { %16820 = vst [vmem:[#allocation26_spill] sm:$0xff] %v11652_v55  ;;  %16821 = vst [vmem:[#allocation27_spill] sm:$0xff] %v11655_v31  ;;  %4962 = vrot.lane.b32.xlu1 %v4852_v44, %s11194_s9  ;;  %v3735_v38 = vcombine.low %v11652_v55, %v11655_v31  ;;  %v3736_v61 = vcombine.low %v11658_v34, %v11406_v41  ;;  %v2923_v11 = vcombine.low %v858_v51, %v11363_v10 }
 0x126   : > { %16822 = vst [vmem:[#allocation28_spill] sm:$0xff] %v11658_v34  ;;  %v2922_v12 = vcombine.low %v11332_v43, %v16823_v24  ;;  %v1006_v63 = vcombine.high %v11386_v30, %v11386_v30  ;;  %v4538_v1 = vcombine.low %v2969_v48, %v11664_v49  ;;  %v3052_v22 = vcombine.low %v11667_v7, %v3037_v6 }
 0x127   : > { %v4100_v32 = vcombine.low %v3037_v6, %v11460_v46  ;;  %v11687_v44 = vrot.slane %v3735_v38, %v11323_v28  ;;  %v3750_v31 = vrot.slane %v3736_v61, %v11323_v28  ;;  %v2939_v34 = vrot.slane %v2923_v11, %v11323_v28 }
 0x128   : > { %v2932_v24 = vrot.slane %v2922_v12, %v11323_v28  ;;  %v4117_v10 = vcombine.low %v1006_v63, %v11457_v39  ;;  %4024 = vrot.lane.b32.xlu0 %v3792_v19, %s11192_s29  ;;  %v11694_v30 = vrot.slane %v3052_v22, %v11323_v28  ;;  %v906_v46 = vcombine.high %v11395_v33, %v11395_v33 }
 0x129   : > { %v11697_v51 = vrot.slane %v4100_v32, %v11323_v28  ;;  %v908_v6 = vcombine.high %v11403_v40, %v11403_v40  ;;  %v1071_v38 = vcombine.high %v11547_v16, %v11547_v16  ;;  %4646 = vrot.lane.b32.xlu1 %v4538_v1, %s11193_s8  ;;  %v3751_v33 = vcombine.low %v11687_v44, %v3750_v31  ;;  %v11717_v32 = vpop.f32.mrb[18].mxu0  ;;  %v11072_v1 = vld [vmem:[%s16509_s3 + $0x40] sm:$0xff]  }
 0x12a   : > { %v2954_v19 = vcombine.low %v2932_v24, %v2939_v34  ;;  %v11709_v61 = vrot.slane %v4117_v10, %v11323_v28  ;;  %v3068_v11 = vcombine.low %v11694_v30, %v11492_v4  ;;  %v2973_v22 = vcombine.low %v11403_v40, %v906_v46  ;;  %16824 = vst [vmem:[#allocation29_spill] sm:$0xff] %v11717_v32  ;;  %v11730_v40 = vpop.f32.mrb[19].mxu0 }
 0x12b   : > { %v4116_v63 = vcombine.low %v11697_v51, %v11580_v47  ;;  %v2974_v4 = vcombine.low %v908_v6, %v11353_v3  ;;  %v4066_v12 = vcombine.low %v2939_v34, %v11610_v18  ;;  %v11073_v47 = vld [vmem:[%s16509_s3 + $0xc0] sm:$0xff]   ;;  %16825 = vst [vmem:[#allocation30_spill] sm:$0xff] %v11730_v40  ;;  %v11734_v46 = vrot.slane %v11547_v16, %v11323_v28  ;;  %v11087_v40 = vld [vmem:[%s16509_s3 + $0x98] sm:$0xff]  }
 0x12c   : > { %v2962_v24 = vrot.slane %v2954_v19, %v11323_v28  ;;  %v4139_v10 = vrot.slane %v11709_v61, %v11323_v28  ;;  %v16826_v19 = vcombine.high %v11528_v14, %v11528_v14  ;;  %3674 = vrot.lane.b32.xlu0 %v3068_v11, %s11193_s8  ;;  %v2995_v3 = vrot.slane %v2973_v22, %v11323_v28 }
 0x12d   : > { %v4067_v18 = vcombine.low %v11614_v57, %v11618_v54  ;;  %v11747_v34 = vrot.slane %v1071_v38, %v11323_v28  ;;  %4020 = vrot.lane.b32.xlu1 %v3751_v33, %s11192_s29  ;;  %v3002_v42 = vrot.slane %v2974_v4, %v11323_v28  ;;  %v11754_v55 = vrot.slane %v4066_v12, %v11323_v28  ;;  %v11074_v54 = vld [vmem:[%s16509_s3] sm:$0xff]  }
 0x12e   : > { %v11740_v43 = vrot.slane %v16826_v19, %v11323_v28  ;;  %v2970_v16 = vcombine.low %v2962_v24, %v2969_v48  ;;  %v4140_v6 = vcombine.low %v11624_v21, %v4139_v10  ;;  %v4695_v19 = vcombine.low %v3750_v31, %v11443_v8  ;;  %10725 = vmatprep.subr.bf16.mxu1 %v11072_v1  ;;  %v11763_v48 = vpop.f32.mrb[20].mxu0 }
 0x12f   : > { %v11757_v11 = vrot.slane %v4067_v18, %v11323_v28  ;;  %v4083_v57 = vcombine.low %v11631_v27, %v2995_v3  ;;  %16827 = vst [vmem:[#allocation31_spill] sm:$0xff] %v11763_v48  ;;  %v3004_v38 = vcombine.low %v2995_v3, %v3002_v42  ;;  %v4084_v33 = vcombine.low %v3002_v42, %v11667_v7  ;;  %v11075_v27 = vld [vmem:[%s16509_s3 + $0x80] sm:$0xff]   ;;  %v11076_v18 = vld [vmem:[%s16509_s3 + $0x48] sm:$0xff]  }
 0x130   : > { %v1052_v8 = vcombine.high %v11457_v39, %v11457_v39  ;;  %v4549_v31 = vcombine.low %v11590_v58, %v11709_v61  ;;  %10789 = vmatprep.subr.bf16.mxu0 %v11073_v47  ;;  %v1317_v12 = vcombine.high %v11740_v43, %v11740_v43  ;;  %v516_v22 = vadd.f32 %v11316_v20, %v11343_v60  ;;  %v11783_v58 = vpop.f32.mrb[21].mxu0 }
 0x131   : > { %4370 = vrot.lane.b32.xlu0 %v4116_v63, %s11194_s9  ;;  %v11781_v7 = vrot.slane %v4083_v57, %v11323_v28  ;;  %16828 = vst [vmem:[#allocation32_spill] sm:$0xff] %v11783_v58  ;;  %4804 = vrot.lane.b32.xlu1 %v4695_v19, %s11192_s29  ;;  %v11787_v1 = vrot.slane %v3004_v38, %v11323_v28 }
 0x132   : > { %v11790_v24 = vrot.slane %v4084_v33, %v11323_v28  ;;  %v4541_v60 = vcombine.low %v11489_v56, %v1052_v8  ;;  %v11794_v63 = vrot.slane %v4549_v31, %v11323_v28  ;;  %v5487_v10 = vcombine.low %v11734_v46, %v11747_v34  ;;  %10726 = vmatpush3.bf16.msra.mxu1 %v11074_v54  ;;  %v11077_v54 = vld [vmem:[%s16509_s3 + $0xc8] sm:$0xff]  }
 0x133   : > { %v10564_v47 = vcombine.high %v11483_v9, %v11520_v15  ;;  %v1055_v3 = vcombine.high %v11520_v15, %v11520_v15  ;;  %v4539_v19 = vcombine.low %v11787_v1, %v11694_v30  ;;  %10790 = vmatpush3.bf16.msra.mxu0 %v11075_v27  ;;  %v11078_v8 = vld [vmem:[%s16509_s3 + $0x8] sm:$0xff]   ;;  %v11822_v30 = vrot.slane %v1317_v12, %v11323_v28 }
 0x134   : > { %v4099_v57 = vcombine.low %v11781_v7, %v11790_v24  ;;  %vm602_vm11 = vcmp.ge.f32.partialorder %v516_v22, 0.0  ;;  %v630_v31 = vmul.f32 0.1, %v516_v22  ;;  %v11826_v38 = vrot.slane %v4541_v60, %v11323_v28  ;;  %v11079_v27 = vld [vmem:[%s16509_s3 + $0x88] sm:$0xff]   ;;  %10727 = vmatprep.subr.bf16.mxu1 %v11076_v18  ;;  %10791 = vmatprep.subr.bf16.mxu0 %v11077_v54  ;;  %v11081_v18 = vld [vmem:[%s16509_s3 + $0xd0] sm:$0xff]  }
 0x135   : > { %3670 = vrot.lane.b32.xlu0 %v2970_v16, %s11193_s8  ;;  %4372 = vrot.lane.b32.xlu1 %v4140_v6, %s11194_s9  ;;  %v10568_v33 = vcombine.high %v11734_v46, %v11747_v34  ;;  %v5363_v4 = vcombine.low %v1055_v3, %v11734_v46  ;;  %v527_v12 = vadd.f32 %v11346_v62, %v11316_v20 }
 0x136   : > { %v4694_v60 = vcombine.low %v11596_v25, %v11687_v44  ;;  %v11842_v42 = vrot.slane %v10564_v47, %v11323_v28  ;;  %v11845_v58 = vrot.slane %v5487_v10, %v11323_v28  ;;  %v4563_v6 = vrot.slane %v11826_v38, %v11323_v28  ;;  %10728 = vmatpush3.bf16.msra.mxu1 %v11078_v8 }
 0x137   : > { %v1170_v3 = vcombine.high %v11497_v35, %v11497_v35  ;;  %v16831_v62 = vcombine.high %v11514_v45, %v11514_v45  ;;  %vm605_vm12 = vcmp.ge.f32.partialorder %v527_v12, 0.0  ;;  %v633_v25 = vmul.f32 0.1, %v527_v12  ;;  %10792 = vmatpush3.bf16.msra.mxu0 %v11079_v27  ;;  %v11080_v45 = vld [vmem:[%s16509_s3 + $0x50] sm:$0xff]  }
 0x138   : > { %16829 = vst [vmem:[#allocation33_spill] sm:$0xff] %v11842_v42  ;;  %16830 = vst [vmem:[#allocation34_spill] sm:$0xff] %v11845_v58  ;;  %v11857_v44 = vrot.slane %v11497_v35, %v11323_v28  ;;  %v658_v10 = vsel %vm602_vm11, %v516_v22, %v630_v31  ;;  %v11862_v47 = vcombine.low %v11794_v63, %v4563_v6  ;;  %10729 = vmatprep.subr.bf16.mxu1 %v11080_v45  ;;  %v11083_v45 = vld [vmem:[%s16509_s3 + $0x90] sm:$0xff]  }
 0x139   : > { %v1070_v16 = vrot.slane %v16831_v62, %v11323_v28  ;;  %4802 = vrot.lane.b32.xlu0 %v4694_v60, %s11192_s29  ;;  %4648 = vrot.lane.b32.xlu1 %v4539_v19, %s11193_s8  ;;  %v11872_v35 = vrot.slane %v10568_v33, %v11323_v28  ;;  %v16833_v22 = vcombine.high %v11489_v56, %v11489_v56  ;;  %v11082_v62 = vld [vmem:[%s16509_s3 + $0x10] sm:$0xff]  }
 0x13a   : > { %v16834_v8 = vcombine.high %v11483_v9, %v11483_v9  ;;  %v661_v27 = vsel %vm605_vm12, %v527_v12, %v633_v25  ;;  %v5727_v60 = vcombine.low %v11842_v42, %v11845_v58  ;;  %v1349_v19 = vcombine.high %v11822_v30, %v11822_v30  ;;  %10793 = vmatprep.subr.bf16.mxu0 %v11081_v18 }
 0x13b   : > { %16832 = vst [vmem:[#allocation35_spill] sm:$0xff] %v11872_v35  ;;  %v4853_v54 = vcombine.low %v16833_v22, %v11483_v9  ;;  %v1350_v6 = vcombine.high %v661_v27, %v661_v27  ;;  %v11887_v33 = vrot.slane %v661_v27, %v11323_v28  ;;  %v16835_v22 = vcombine.high %v11466_v53, %v11466_v53 }
 0x13c   : > { %v5115_v31 = vcombine.low %v11520_v15, %v16834_v8  ;;  %v1072_v25 = vcombine.high %v1070_v16, %v1070_v16  ;;  %v11900_v8 = vrot.slane %v11528_v14, %v11323_v28  ;;  %v5007_v27 = vcombine.low %v11483_v9, %v11520_v15  ;;  %10730 = vmatpush3.bf16.msra.mxu1 %v11082_v62  ;;  %v11086_v62 = vld [vmem:[%s16509_s3 + $0x18] sm:$0xff]  }
 0x13d   : > { %v11896_v12 = vrot.slane %v16835_v22, %v11323_v28  ;;  %v1203_v58 = vcombine.high %v658_v10, %v658_v10  ;;  %v11908_v48 = vrot.slane %v658_v10, %v11323_v28  ;;  %v16836_v53 = vcombine.low %v11754_v55, %v11757_v11  ;;  %4368 = vrot.lane.b32.xlu1 %v4099_v57, %s11194_s9  ;;  %v11084_v57 = vld [vmem:[%s16509_s3 + $0x58] sm:$0xff]  }
 0x13e   : > { %v11915_v14 = vrot.slane %v1350_v6, %v11323_v28  ;;  %v11919_v9 = vrot.slane %v11887_v33, %v11323_v28  ;;  %v11922_v15 = vrot.slane %v1170_v3, %v11323_v28  ;;  %v11925_v18 = vrot.slane %v1070_v16, %v11323_v28  ;;  %10794 = vmatpush3.bf16.msra.mxu0 %v11083_v45 }
 0x13f   : > { %4366 = vrot.lane.b32.xlu0 %v16836_v53, %s11194_s9  ;;  %v11929_v10 = vrot.slane %v4853_v54, %v11323_v28  ;;  %v11932_v55 = vrot.slane %v5115_v31, %v11323_v28  ;;  %v11935_v6 = vrot.slane %v5727_v60, %v11323_v28  ;;  %v5741_v22 = vrot.slane %v11872_v35, %v11323_v28  ;;  %v11085_v54 = vld [vmem:[%s16509_s3 + $0xd8] sm:$0xff]  }
 0x140   : > { %v1366_v3 = vcombine.high %v11915_v14, %v11915_v14  ;;  %v11942_v16 = vcombine.low %v1349_v19, %v11919_v9  ;;  %v11951_v31 = vrot.slane %v1072_v25, %v11323_v28  ;;  %v1316_v60 = vcombine.high %v11900_v8, %v11900_v8  ;;  %10731 = vmatprep.subr.bf16.mxu1 %v11084_v57 }
 0x141   : > { %16837 = vst [vmem:[#allocation36_spill] sm:$0xff] %v11935_v6  ;;  %v11956_v53 = vrot.slane %v5363_v4, %v11323_v28  ;;  %v11959_v19 = vrot.slane %v5007_v27, %v11323_v28  ;;  %v11969_v25 = vrot.slane %v11900_v8, %v11323_v28  ;;  %v11972_v32 = vrot.slane %v1203_v58, %v11323_v28 }
 0x142   : > { %16838 = vst [vmem:[#allocation37_spill] sm:$0xff] %v11942_v16  ;;  %v1218_v4 = vcombine.high %v11908_v48, %v11908_v48  ;;  %v16840_v27 = vcombine.low %v11757_v11, %v11781_v7  ;;  %v519_v45 = vadd.f32 %v11316_v20, %v11350_v2  ;;  %v16841_v41 = vcombine.low %v11790_v24, %v11697_v51 }
 0x143   : > { %16839 = vst [vmem:[#allocation38_spill] sm:$0xff] %v11959_v19  ;;  %v5371_v58 = vcombine.low %v11929_v10, %v11932_v55  ;;  %v16842_v8 = vcombine.low %v11457_v39, %v11489_v56  ;;  %v16844_v11 = vcombine.high %v11457_v39, %v11489_v56  ;;  %v532_v2 = vadd.f32 %v11316_v20, %v11376_v23  ;;  %v11089_v56 = vld [vmem:[%s16509_s3 + $0xe0] sm:$0xff]  }
 0x144   : > { %4958 = vrot.lane.b32.xlu0 %v16840_v27, %s11194_s9  ;;  %4960 = vrot.lane.b32.xlu1 %v16841_v41, %s11194_s9  ;;  %v5742_v41 = vcombine.low %v11935_v6, %v5741_v22  ;;  %v12004_v51 = vrot.slane %v1366_v3, %v11323_v28  ;;  %v4861_v24 = vcombine.low %v11709_v61, %v11826_v38  ;;  %v11088_v27 = vld [vmem:[%s16509_s3 + $0x60] sm:$0xff]   ;;  %v631_v3 = vmul.f32 0.1, %v519_v45 }
 0x145   : > { %v11992_v50 = vrot.slane %v16842_v8, %v11323_v28  ;;  %v11998_v7 = vrot.slane %v16844_v11, %v11323_v28  ;;  %10795 = vmatprep.subr.bf16.mxu0 %v11085_v54  ;;  %v5385_v39 = vrot.slane %v11956_v53, %v11323_v28  ;;  %vm606_vm13 = vcmp.ge.f32.partialorder %v532_v2, 0.0  ;;  %10732 = vmatpush3.bf16.msra.mxu1 %v11086_v62 }
 0x146   : > { %v634_v23 = vmul.f32 0.1, %v532_v2  ;;  %10796 = vmatpush3.bf16.msra.mxu0 %v11087_v40  ;;  %v12020_v61 = vrot.slane %v11908_v48, %v11323_v28  ;;  %v16846_v22 = vcombine.low %v11664_v49, %v11787_v1  ;;  %v12027_v57 = vrot.slane %v4861_v24, %v11323_v28  ;;  %10733 = vmatprep.subr.bf16.mxu1 %v11088_v27  ;;  %v11091_v27 = vld [vmem:[%s16509_s3 + $0xa0] sm:$0xff]  }
 0x147   : > { %16843 = vst [vmem:[#allocation39_spill] sm:$0xff] %v11992_v50  ;;  %16845 = vst [vmem:[#allocation40_spill] sm:$0xff] %v11998_v7  ;;  %v5247_v20 = vcombine.low %v11998_v7, %v11959_v19  ;;  %v4875_v40 = vrot.slane %v11929_v10, %v11323_v28  ;;  %v12033_v54 = vrot.slane %v5371_v58, %v11323_v28  ;;  %vm603_vm14 = vcmp.ge.f32.partialorder %v519_v45, 0.0  ;;  %v11090_v58 = vld [vmem:[%s16509_s3 + $0x20] sm:$0xff]  }
 0x148   : > { %3672 = vrot.lane.b32.xlu0 %v16846_v22, %s11193_s8  ;;  %5820 = vrot.lane.b32.xlu1 %v5742_v41, %s11192_s29  ;;  %v4705_v48 = vcombine.low %v11583_v29, %v11992_v50  ;;  %v12037_v62 = vsel %vm606_vm13, %v532_v2, %v634_v23  ;;  %v3109_v49 = vcombine.low %v11524_v52, %v11896_v12 }
 0x149   : > { %16847 = vst [vmem:[#allocation41_spill] sm:$0xff] %v12033_v54  ;;  %v1398_v1 = vcombine.high %v12004_v51, %v12004_v51  ;;  %v12045_v8 = vrot.slane %v12037_v62, %v11323_v28  ;;  %v12048_v11 = vcombine.low %v12027_v57, %v4875_v40  ;;  %v5386_v2 = vcombine.low %v12033_v54, %v5385_v39 }
 0x14a   : > { %v12055_v41 = vrot.slane %v5247_v20, %v11323_v28  ;;  %v10541_v24 = vcombine.high %v11524_v52, %v11896_v12  ;;  %v3111_v23 = vcombine.low %v11857_v44, %v11922_v15  ;;  %10797 = vmatprep.subr.bf16.mxu0 %v11089_v56  ;;  %v12066_v22 = vrot.slane %v11740_v43, %v11323_v28 }
 0x14b   : > { %v1219_v39 = vcombine.high %v11972_v32, %v11972_v32  ;;  %v12074_v20 = vrot.slane %v12045_v8, %v11323_v28  ;;  %v10542_v56 = vcombine.high %v11857_v44, %v11922_v15  ;;  %v12079_v40 = vrot.slane %v1316_v60, %v11323_v28  ;;  %10734 = vmatpush3.bf16.msra.mxu1 %v11090_v58 }
 0x14c   : > { %16848 = vst [vmem:[#allocation42_spill] sm:$0xff] %v12055_v41  ;;  %4652 = vrot.lane.b32.xlu0 %v11862_v47, %s11193_s8  ;;  %5464 = vrot.lane.b32.xlu1 %v5386_v2, %s11194_s9  ;;  %v659_v43 = vsel %vm603_vm14, %v519_v45, %v631_v3  ;;  %v12084_v6 = vrot.slane %v4705_v48, %v11323_v28  ;;  %v11092_v45 = vld [vmem:[%s16509_s3 + $0x68] sm:$0xff]  }
 0x14d   : > { %16849 = vst [vmem:[#allocation43_spill] sm:$0xff] %v12074_v20  ;;  %v3119_v19 = vrot.slane %v3109_v49, %v11323_v28  ;;  %v12089_v47 = vrot.slane %v11972_v32, %v11323_v28  ;;  %v12092_v50 = vrot.slane %v1218_v4, %v11323_v28  ;;  %v4719_v60 = vrot.slane %v11998_v7, %v11323_v28  ;;  %v11093_v49 = vld [vmem:[%s16509_s3 + $0xe8] sm:$0xff]  }
 0x14e   : > { %v12097_v29 = vcombine.low %v1398_v1, %v12074_v20  ;;  %v5718_v3 = vcombine.low %v12084_v6, %v12055_v41  ;;  %v12105_v32 = vrot.slane %v10541_v24, %v11323_v28  ;;  %v12108_v4 = vrot.slane %v3111_v23, %v11323_v28  ;;  %10798 = vmatpush3.bf16.msra.mxu0 %v11091_v27 }
 0x14f   : > { %v12111_v48 = vrot.slane %v10542_v56, %v11323_v28  ;;  %v12117_v1 = vrot.slane %v1219_v39, %v11323_v28  ;;  %v16851_v58 = vcombine.low %v11502_v36, %v11794_v63  ;;  %v1252_v2 = vcombine.high %v659_v43, %v659_v43  ;;  %10735 = vmatprep.subr.bf16.mxu1 %v11092_v45 }
 0x150   : > { %16850 = vst [vmem:[#allocation44_spill] sm:$0xff] %v12097_v29  ;;  %v12124_v24 = vrot.slane %v659_v43, %v11323_v28  ;;  %v1101_v23 = vcombine.high %v11734_v46, %v11734_v46  ;;  %5818 = vrot.lane.b32.xlu1 %v5718_v3, %s11192_s29  ;;  %v3141_v27 = vcombine.low %v3119_v19, %v12105_v32  ;;  %v11094_v19 = vld [vmem:[%s16509_s3 + $0x28] sm:$0xff]  }
 0x151   : > { %5214 = vrot.lane.b32.xlu0 %v16851_v58, %s11193_s8  ;;  %v3142_v39 = vcombine.low %v12108_v4, %v12111_v48  ;;  %v5603_v56 = vcombine.low %v11932_v55, %v11956_v53  ;;  %v4720_v58 = vcombine.low %v12084_v6, %v4719_v60  ;;  %v1103_v46 = vcombine.high %v11747_v34, %v11747_v34 }
 0x152   : > { %v5595_v43 = vcombine.low %v11747_v34, %v1101_v23  ;;  %v5123_v3 = vcombine.low %v11826_v38, %v11929_v10  ;;  %v5842_v7 = vcombine.low %v12027_v57, %v12033_v54  ;;  %v3149_v36 = vrot.slane %v3141_v27, %v11323_v28  ;;  %10799 = vmatprep.subr.bf16.mxu0 %v11093_v49  ;;  %v11095_v34 = vld [vmem:[%s16509_s3 + $0xa8] sm:$0xff]  }
 0x153   : > { %v12149_v60 = vrot.slane %v3142_v39, %v11323_v28  ;;  %v10572_v23 = vcombine.high %v11925_v18, %v11951_v31  ;;  %v1365_v38 = vcombine.high %v11887_v33, %v11887_v33  ;;  %v5843_v45 = vcombine.low %v1103_v46, %v11925_v18  ;;  %10736 = vmatpush3.bf16.msra.mxu1 %v11094_v19 }
 0x154   : > { %v12160_v10 = vrot.slane %v5595_v43, %v11323_v28  ;;  %v6594_v27 = vcombine.low %v11440_v5, %v11477_v59  ;;  %v12166_v39 = vrot.slane %v1252_v2, %v11323_v28  ;;  %5942 = vrot.lane.b32.xlu1 %v5842_v7, %s11194_s9  ;;  %v12172_v33 = vrot.slane %v5603_v56, %v11323_v28  ;;  %v11096_v7 = vld [vmem:[%s16509_s3 + $0x70] sm:$0xff]  }
 0x155   : > { %4808 = vrot.lane.b32.xlu0 %v4720_v58, %s11192_s29  ;;  %v10576_v58 = vcombine.high %v11440_v5, %v11477_v59  ;;  %v12178_v43 = vrot.slane %v11915_v14, %v11323_v28  ;;  %v12185_v49 = vrot.slane %v5123_v3, %v11323_v28  ;;  %v3157_v56 = vcombine.low %v3149_v36, %v12149_v60 }
 0x156   : > { %16852 = vst [vmem:[#allocation45_spill] sm:$0xff] %v12172_v33  ;;  %v5617_v46 = vrot.slane %v12160_v10, %v11323_v28  ;;  %v5851_v2 = vcombine.low %v11956_v53, %v12160_v10  ;;  %v12192_v54 = vrot.slane %v10572_v23, %v11323_v28  ;;  %v12195_v14 = vrot.slane %v6594_v27, %v11323_v28  ;;  %v11097_v53 = vld [vmem:[%s16509_s3 + $0xf0] sm:$0xff]  }
 0x157   : > { %v1102_v29 = vcombine.high %v11925_v18, %v11925_v18  ;;  %10800 = vmatpush3.bf16.msra.mxu0 %v11095_v34  ;;  %v12203_v3 = vrot.slane %v1365_v38, %v11323_v28  ;;  %v5238_v36 = vcombine.low %v11603_v37, %v12084_v6  ;;  %v12210_v19 = vrot.slane %v5843_v45, %v11323_v28 }
 0x158   : > { %16853 = vst [vmem:[#allocation46_spill] sm:$0xff] %v12192_v54  ;;  %16854 = vst [vmem:[#allocation47_spill] sm:$0xff] %v12195_v14  ;;  %v1104_v23 = vcombine.high %v11951_v31, %v11951_v31  ;;  %3678 = vrot.lane.b32.xlu1 %v3157_v56, %s11193_s8  ;;  %v5618_v34 = vcombine.low %v12172_v33, %v5617_v46  ;;  %v12217_v27 = vrot.slane %v5851_v2, %v11323_v28  ;;  %v11098_v46 = vld [vmem:[%s16509_s3 + $0x30] sm:$0xff]  }
 0x159   : > { %4964 = vrot.lane.b32.xlu0 %v12048_v11, %s11194_s9  ;;  %v12220_v38 = vrot.slane %v10576_v58, %v11323_v28  ;;  %v6222_v11 = vcombine.low %v11951_v31, %v1102_v29  ;;  %v5865_v37 = vrot.slane %v12210_v19, %v11323_v28  ;;  %v1199_v56 = vcombine.high %v11524_v52, %v11524_v52 }
 0x15a   : > { %16855 = vst [vmem:[#allocation48_spill] sm:$0xff] %v12217_v27  ;;  %v6470_v6 = vcombine.low %v1104_v23, %v11440_v5  ;;  %10737 = vmatprep.subr.bf16.mxu1 %v11096_v7  ;;  %v6834_v58 = vcombine.low %v12192_v54, %v12195_v14  ;;  %v1200_v2 = vcombine.high %v11857_v44, %v11857_v44  ;;  %v11099_v7 = vld [vmem:[%s16509_s3 + $0xb0] sm:$0xff]   ;;  %v12250_v14 = vld [vmem:[%s16508_s2] ss:$0 sm:$0xff] }
 0x15b   : > { %16856 = vst [vmem:[#allocation49_spill] sm:$0xff] %v12220_v38  ;;  %v12236_v29 = vrot.slane %v6222_v11, %v11323_v28  ;;  %v1201_v23 = vcombine.high %v11896_v12, %v11896_v12  ;;  %10801 = vmatprep.subr.bf16.mxu0 %v11097_v53  ;;  %v12254_v11 = vadd.f32 %v12250_v14, %v11369_v17 }
 0x15c   : > { %v1202_v53 = vcombine.high %v11922_v15, %v11922_v15  ;;  %v2346_v52 = vcombine.low %v11896_v12, %v1199_v56  ;;  %5696 = vrot.lane.b32.xlu1 %v5618_v34, %s11193_s8  ;;  %v5137_v45 = vrot.slane %v11932_v55, %v11323_v28  ;;  %v5261_v20 = vrot.slane %v11842_v42, %v11323_v28  ;;  %v11100_v55 = vld [vmem:[%s16509_s3 + $0x78] sm:$0xff]  }
 0x15d   : > { %5338 = vrot.lane.b32.xlu0 %v5238_v36, %s11192_s29  ;;  %v2347_v0 = vcombine.low %v1201_v23, %v11857_v44  ;;  %v2348_v17 = vcombine.low %v11922_v15, %v1200_v2  ;;  %v6848_v36 = vrot.slane %v12220_v38, %v11323_v28  ;;  %v12270_v16 = vrot.slane %v6470_v6, %v11323_v28  ;;  %v11101_v2 = vld [vmem:[%s16509_s3 + $0xf8] sm:$0xff]  }
 0x15e   : > { %v6478_v12 = vcombine.low %v12210_v19, %v12236_v29  ;;  %v2394_v34 = vcombine.low %v1202_v53, %v12020_v61  ;;  %10738 = vmatpush3.bf16.msra.mxu1 %v11098_v46  ;;  %v5866_v44 = vcombine.low %v12217_v27, %v5865_v37  ;;  %v6841_v15 = vrot.slane %v6834_v58, %v11323_v28 }
 0x15f   : > { %16857 = vst [vmem:[#allocation50_spill] sm:$0xff] %v12270_v16  ;;  %v12281_v56 = vrot.slane %v2346_v52, %v11323_v28  ;;  %v12284_v6 = vrot.slane %v2347_v0, %v11323_v28  ;;  %10802 = vmatpush3.bf16.msra.mxu0 %v11099_v7  ;;  %v636_v46 = vmul.f32 0.1, %v12254_v11  ;;  %v16860_v23 = vcombine.low %v11624_v21, %v12027_v57 }
 0x160   : > { %v12295_v37 = vrot.slane %v2348_v17, %v11323_v28  ;;  %v12298_v52 = vrot.slane %v2394_v34, %v11323_v28  ;;  %v1150_v0 = vcombine.high %v11440_v5, %v11440_v5  ;;  %vm608_vm15 = vcmp.ge.f32.partialorder %v12254_v11, 0.0  ;;  %5944 = vrot.lane.b32.xlu1 %v5866_v44, %s11194_s9  ;;  %10739 = vmatprep.subr.bf16.mxu1 %v11100_v55  ;;  %v11103_v44 = vld [vmem:[%s16509_s3 + $0xb8] sm:$0xff]  }
 0x161   : > { %16858 = vst [vmem:[#allocation51_spill] sm:$0xff] %v12281_v56  ;;  %16859 = vst [vmem:[#allocation52_spill] sm:$0xff] %v12284_v6  ;;  %5462 = vrot.lane.b32.xlu0 %v16860_v23, %s11194_s9  ;;  %v5138_v58 = vcombine.low %v12185_v49, %v5137_v45  ;;  %v5262_v7 = vcombine.low %v12055_v41, %v5261_v20  ;;  %v3793_v21 = vcombine.low %v12281_v56, %v12284_v6  ;;  %v11102_v20 = vld [vmem:[%s16509_s3 + $0x38] sm:$0xff]  }
 0x162   : > { %16861 = vst [vmem:[#allocation53_spill] sm:$0xff] %v12295_v37  ;;  %16862 = vst [vmem:[#allocation54_spill] sm:$0xff] %v12298_v52  ;;  %v6230_v57 = vcombine.low %v12160_v10, %v12210_v19  ;;  %v12311_v53 = vrot.slane %v6478_v12, %v11323_v28  ;;  %v6492_v5 = vrot.slane %v12270_v16, %v11323_v28  ;;  %10803 = vmatprep.subr.bf16.mxu0 %v11101_v2 }
 0x163   : > { %v3794_v17 = vcombine.low %v12295_v37, %v12298_v52  ;;  %v6114_v45 = vcombine.low %v11925_v18, %v11951_v31  ;;  %v6849_v34 = vcombine.low %v6841_v15, %v6848_v36  ;;  %v6702_v10 = vcombine.low %v11477_v59, %v1150_v0  ;;  %10740 = vmatpush3.bf16.msra.mxu1 %v11102_v20 }
 0x164   : > { %16863 = vst [vmem:[#allocation55_spill] sm:$0xff] %v12311_v53  ;;  %v3158_v19 = vcombine.low %v12020_v61, %v12092_v50  ;;  %v10543_v12 = vcombine.high %v12020_v61, %v12092_v50  ;;  %v3801_v18 = vrot.slane %v3793_v21, %v11323_v28  ;;  %v6710_v36 = vcombine.low %v12236_v29, %v12270_v16 }
 0x165   : > { %5216 = vrot.lane.b32.xlu0 %v5138_v58, %s11193_s8  ;;  %v12333_v31 = vrot.slane %v3794_v17, %v11323_v28  ;;  %v3258_v55 = vcombine.low %v12066_v22, %v11822_v30  ;;  %6927 = vrot.lane.b32.xlu1 %v6849_v34, %s11192_s29  ;;  %v10557_v23 = vcombine.high %v12066_v22, %v11822_v30 }
 0x166   : > { %v3168_v15 = vrot.slane %v3158_v19, %v11323_v28  ;;  %v12342_v2 = vrot.slane %v10543_v12, %v11323_v28  ;;  %v4568_v0 = vcombine.low %v11919_v9, %v12203_v3  ;;  %v6493_v58 = vcombine.low %v12311_v53, %v6492_v5  ;;  %10804 = vmatpush3.bf16.msra.mxu0 %v11103_v44 }
 0x167   : > { %v12350_v21 = vrot.slane %v6230_v57, %v11323_v28  ;;  %v12353_v17 = vrot.slane %v6114_v45, %v11323_v28  ;;  %v12356_v34 = vrot.slane %v3258_v55, %v11323_v28  ;;  %v12359_v19 = vrot.slane %v6702_v10, %v11323_v28 }
 0x168   : > { %v3190_v12 = vcombine.low %v3168_v15, %v12342_v2  ;;  %v12363_v38 = vrot.slane %v10557_v23, %v11323_v28  ;;  %v12366_v5 = vrot.slane %v4568_v0, %v11323_v28  ;;  %v3809_v57 = vcombine.low %v3801_v18, %v12333_v31 }
 0x169   : > { %16864 = vst [vmem:[#allocation56_spill] sm:$0xff] %v12350_v21  ;;  %16865 = vst [vmem:[#allocation57_spill] sm:$0xff] %v12353_v17  ;;  %5340 = vrot.lane.b32.xlu0 %v5262_v7, %s11192_s29  ;;  %v6244_v45 = vrot.slane %v12236_v29, %v11323_v28  ;;  %v12373_v20 = vrot.slane %v6710_v36, %v11323_v28  ;;  %v6354_v10 = vcombine.low %v11872_v35, %v12353_v17 }
 0x16a   : > { %16866 = vst [vmem:[#allocation58_spill] sm:$0xff] %v12359_v19  ;;  %6571 = vrot.lane.b32.xlu1 %v6493_v58, %s11194_s9  ;;  %v6724_v55 = vrot.slane %v12359_v19, %v11323_v28  ;;  %v12381_v44 = vrot.slane %v3190_v12, %v11323_v28  ;;  %v4576_v7 = vcombine.low %v12356_v34, %v12363_v38 }
 0x16b   : > { %16867 = vst [vmem:[#allocation59_spill] sm:$0xff] %v12373_v20  ;;  %v4590_v29 = vrot.slane %v12366_v5, %v11323_v28  ;;  %v3256_v18 = vcombine.low %v11969_v25, %v12079_v40  ;;  %v10547_v36 = vcombine.high %v11969_v25, %v12079_v40  ;;  %v16868_v23 = vcombine.high %v11919_v9, %v12203_v3 }
 0x16c   : > { %v4141_v58 = vcombine.low %v12105_v32, %v12108_v4  ;;  %v4565_v12 = vcombine.low %v12149_v60, %v12381_v44  ;;  %v12402_v53 = vrot.slane %v4576_v7, %v11323_v28  ;;  %v4142_v27 = vcombine.low %v12111_v48, %v3168_v15 }
 0x16d   : > { %v12395_v0 = vrot.slane %v16868_v23, %v11323_v28  ;;  %v4888_v41 = vcombine.low %v12363_v38, %v12366_v5  ;;  %v664_v16 = vsel %vm608_vm15, %v12254_v11, %v636_v46  ;;  %v16869_v23 = vcombine.low %v11794_v63, %v12185_v49 }
 0x16e   : > { %v6245_v32 = vcombine.low %v12350_v21, %v6244_v45  ;;  %v6368_v4 = vrot.slane %v12192_v54, %v11323_v28  ;;  %v12418_v60 = vrot.slane %v4141_v58, %v11323_v28  ;;  %4026 = vrot.lane.b32.xlu1 %v3809_v57, %s11192_s29  ;;  %v4591_v48 = vcombine.low %v12402_v53, %v4590_v29 }
 0x16f   : > { %5694 = vrot.lane.b32.xlu0 %v16869_v23, %s11193_s8  ;;  %v12423_v15 = vrot.slane %v4142_v27, %v11323_v28  ;;  %v12426_v11 = vrot.slane %v4888_v41, %v11323_v28  ;;  %v4902_v63 = vrot.slane %v12395_v0, %v11323_v28  ;;  %v6725_v46 = vcombine.low %v12373_v20, %v6724_v55 }
 0x170   : > { %v12432_v45 = vrot.slane %v6354_v10, %v11323_v28  ;;  %v12435_v7 = vrot.slane %v3256_v18, %v11323_v28  ;;  %v3272_v57 = vrot.slane %v10547_v36, %v11323_v28  ;;  %v1250_v41 = vcombine.high %v12092_v50, %v12092_v50 }
 0x171   : > { %v12441_v29 = vcombine.low %v12426_v11, %v4902_v63  ;;  %v3160_v55 = vcombine.low %v12089_v47, %v12117_v1  ;;  %v1346_v10 = vcombine.high %v11969_v25, %v11969_v25  ;;  %v1348_v18 = vcombine.high %v12079_v40, %v12079_v40 }
 0x172   : > { %16870 = vst [vmem:[#allocation60_spill] sm:$0xff] %v12432_v45  ;;  %v1497_v58 = vcombine.high %v664_v16, %v664_v16  ;;  %v5140_v36 = vcombine.low %v12178_v43, %v12004_v51  ;;  %v12456_v23 = vrot.slane %v12124_v24, %v11323_v28  ;;  %v1399_v63 = vcombine.high %v12037_v62, %v12037_v62 }
 0x173   : > { %6323 = vrot.lane.b32.xlu0 %v6245_v32, %s11193_s8  ;;  %6803 = vrot.lane.b32.xlu1 %v6725_v46, %s11193_s8  ;;  %v1248_v27 = vcombine.high %v12020_v61, %v12020_v61  ;;  %v12464_v20 = vrot.slane %v3160_v55, %v11323_v28  ;;  %v1268_v32 = vcombine.high %v12166_v39, %v12166_v39 }
 0x174   : > { %v6369_v19 = vcombine.low %v12432_v45, %v6368_v4  ;;  %v3280_v59 = vcombine.low %v12435_v7, %v3272_v57  ;;  %v5148_v21 = vcombine.low %v12366_v5, %v12395_v0  ;;  %v12474_v62 = vrot.slane %v12166_v39, %v11323_v28 }
 0x175   : > { %v16871_v61 = vcombine.high %v12124_v24, %v12124_v24  ;;  %v2396_v55 = vcombine.low %v1250_v41, %v12089_v47  ;;  %v4158_v4 = vcombine.low %v12342_v2, %v12464_v20  ;;  %v1504_v45 = vrot.slane %v664_v16, %v11323_v28 }
 0x176   : > { %v12487_v52 = vrot.slane %v1497_v58, %v11323_v28  ;;  %v12491_v39 = vrot.slane %v5140_v36, %v11323_v28  ;;  %v4200_v5 = vcombine.low %v3272_v57, %v12356_v34  ;;  %v1413_v24 = vrot.slane %v1399_v63, %v11323_v28 }
 0x177   : > { %v12480_v46 = vrot.slane %v16871_v61, %v11323_v28  ;;  %6447 = vrot.lane.b32.xlu0 %v6369_v19, %s11192_s29  ;;  %4654 = vrot.lane.b32.xlu1 %v4565_v12, %s11193_s8  ;;  %v6221_v41 = vcombine.low %v12185_v49, %v12172_v33  ;;  %v2395_v2 = vcombine.low %v12092_v50, %v1248_v27 }
 0x178   : > { %v12500_v16 = vrot.slane %v4158_v4, %v11323_v28  ;;  %v12503_v58 = vrot.slane %v3280_v59, %v11323_v28  ;;  %v3294_v19 = vrot.slane %v12356_v34, %v11323_v28  ;;  %v12508_v57 = vrot.slane %v5148_v21, %v11323_v28 }
 0x179   : > { %v5162_v12 = vrot.slane %v12491_v39, %v11323_v28  ;;  %v12513_v36 = vrot.slane %v2396_v55, %v11323_v28  ;;  %v1347_v49 = vcombine.high %v12066_v22, %v12066_v22  ;;  %v12520_v59 = vrot.slane %v4200_v5, %v11323_v28 }
 0x17a   : > { %16872 = vst [vmem:[#allocation61_spill] sm:$0xff] %v12508_v57  ;;  %v1397_v34 = vcombine.high %v12203_v3, %v12203_v3  ;;  %v12525_v21 = vrot.slane %v1268_v32, %v11323_v28  ;;  %v1512_v27 = vcombine.high %v1504_v45, %v1504_v45  ;;  %v2493_v63 = vcombine.low %v12079_v40, %v1346_v10 }
 0x17b   : > { %16873 = vst [vmem:[#allocation62_spill] sm:$0xff] %v12513_v36  ;;  %6321 = vrot.lane.b32.xlu0 %v6221_v41, %s11193_s8  ;;  %v12530_v61 = vrot.slane %v1504_v45, %v11323_v28  ;;  %v1414_v55 = vcombine.high %v12045_v8, %v12045_v8  ;;  %4660 = vrot.lane.b32.xlu1 %v4591_v48, %s11193_s8 }
 0x17c   : > { %v12536_v4 = vrot.slane %v2395_v2, %v11323_v28  ;;  %v2494_v5 = vcombine.low %v1348_v18, %v12066_v22  ;;  %v1513_v32 = vcombine.high %v12487_v52, %v12487_v52  ;;  %v1415_v50 = vcombine.high %v1413_v24, %v1413_v24 }
 0x17d   : > { %v3295_v41 = vcombine.low %v12503_v58, %v3294_v19  ;;  %v1395_v40 = vcombine.high %v11919_v9, %v11919_v9  ;;  %v5163_v45 = vcombine.low %v12508_v57, %v5162_v12  ;;  %v3844_v48 = vcombine.low %v11822_v30, %v1347_v49  ;;  %v16878_v12 = vld [vmem:[#allocation37_spill] sm:$0xff] }
 0x17e   : > { %16874 = vst [vmem:[#allocation63_spill] sm:$0xff] %v12536_v4  ;;  %v3810_v8 = vcombine.low %v12536_v4, %v12513_v36  ;;  %v12552_v22 = vrot.slane %v12487_v52, %v11323_v28  ;;  %v12556_v18 = vrot.slane %v2493_v63, %v11323_v28  ;;  %v543_v9 = vadd.f32 %v12250_v14, %v11463_v13  ;;  %v16895_v36 = vld [vmem:[#allocation12_spill] sm:$0xff] }
 0x17f   : > { %3684 = vrot.lane.b32.xlu0 %v3295_v41, %s11193_s8  ;;  %v535_v2 = vadd.f32 %v12250_v14, %v11486_v26  ;;  %v12563_v30 = vrot.slane %v1512_v27, %v11323_v28  ;;  %v12566_v19 = vrot.slane %v1413_v24, %v11323_v28  ;;  %5220 = vrot.lane.b32.xlu1 %v5163_v45, %s11193_s8 }
 0x180   : > { %16875 = vst [vmem:[#allocation64_spill] sm:$0xff] %v12556_v18  ;;  %v12570_v52 = vrot.slane %v2494_v5, %v11323_v28  ;;  %v12574_v49 = vrot.slane %v16878_v12, %v11323_v28  ;;  %v4724_v13 = vcombine.low %v12203_v3, %v1395_v40  ;;  %v5032_v63 = vcombine.low %v1397_v34, %v12178_v43 }
 0x181   : > { %16876 = vst [vmem:[#allocation65_spill] sm:$0xff] %v12566_v19  ;;  %vm607_vm0 = vcmp.ge.f32.partialorder %v535_v2, 0.0  ;;  %v635_v26 = vmul.f32 0.1, %v535_v2  ;;  %v12579_v27 = vrot.slane %v1415_v50, %v11323_v28  ;;  %v12582_v24 = vrot.slane %v3810_v8, %v11323_v28  ;;  %v12634_v19 = vpop.f32.mrb[22].mxu0 }
 0x182   : > { %16877 = vst [vmem:[#allocation66_spill] sm:$0xff] %v12570_v52  ;;  %16879 = vst [vmem:[#allocation37_spill] sm:$0xff] %v12574_v49  ;;  %v12585_v41 = vrot.slane %v3844_v48, %v11323_v28  ;;  %v1396_v5 = vcombine.high %v12178_v43, %v12178_v43  ;;  %v12590_v45 = vrot.slane %v1414_v55, %v11323_v28  ;;  %v637_v34 = vmul.f32 0.1, %v543_v9 }
 0x183   : > { %16880 = vst [vmem:[#allocation67_spill] sm:$0xff] %v12579_v27  ;;  %v16883_v3 = vcombine.low %v12418_v60, %v12423_v15  ;;  %v3852_v50 = vcombine.low %v12556_v18, %v12570_v52  ;;  %v663_v40 = vsel %vm607_vm0, %v535_v2, %v635_v26  ;;  %4972 = vrot.lane.b32.xlu1 %v12441_v29, %s11194_s9  ;;  %vm609_vm1 = vcmp.ge.f32.partialorder %v543_v9, 0.0 }
 0x184   : > { %16881 = vst [vmem:[#allocation68_spill] sm:$0xff] %v12585_v41  ;;  %16882 = vst [vmem:[#allocation69_spill] sm:$0xff] %v12590_v45  ;;  %v4732_v8 = vcombine.low %v12585_v41, %v12574_v49  ;;  %v1447_v55 = vcombine.high %v12579_v27, %v12579_v27  ;;  %v12605_v48 = vrot.slane %v663_v40, %v11323_v28 }
 0x185   : > { %4374 = vrot.lane.b32.xlu0 %v16883_v3, %s11194_s9  ;;  %v12608_v60 = vrot.slane %v1513_v32, %v11323_v28  ;;  %v5139_v12 = vcombine.low %v12503_v58, %v12402_v53  ;;  %v12613_v2 = vrot.slane %v4724_v13, %v11323_v28  ;;  %v12616_v29 = vrot.slane %v5032_v63, %v11323_v28 }
 0x186   : > { %v4721_v3 = vcombine.low %v12333_v31, %v12582_v24  ;;  %v5264_v10 = vcombine.low %v12004_v51, %v1396_v5  ;;  %v12625_v32 = vrot.slane %v12605_v48, %v11323_v28  ;;  %v5619_v13 = vcombine.low %v12402_v53, %v12508_v57  ;;  %16887 = vst [vmem:[#allocation73_spill] sm:$0xff] %v12634_v19 }
 0x187   : > { %16884 = vst [vmem:[#allocation70_spill] sm:$0xff] %v12613_v2  ;;  %16885 = vst [vmem:[#allocation71_spill] sm:$0xff] %v12616_v29  ;;  %v3866_v63 = vrot.slane %v12585_v41, %v11323_v28  ;;  %v665_v27 = vsel %vm609_vm1, %v543_v9, %v637_v34  ;;  %v10565_v26 = vcombine.high %v12178_v43, %v12004_v51  ;;  %v16889_v43 = vld [vmem:[#allocation19_spill] sm:$0xff]  ;;  %vm11197_vm1 = vmmov 0  }
 0x188   : > { %16886 = vst [vmem:[#allocation72_spill] sm:$0xff] %v12625_v32  ;;  %4810 = vrot.lane.b32.xlu1 %v4721_v3, %s11192_s29  ;;  %v12638_v31 = vrot.slane %v3852_v50, %v11323_v28  ;;  %v12641_v5 = vrot.slane %v4732_v8, %v11323_v28  ;;  %v4746_v53 = vrot.slane %v12613_v2, %v11323_v28 }
 0x189   : > { %5218 = vrot.lane.b32.xlu0 %v5139_v12, %s11193_s8  ;;  %v12646_v12 = vcombine.low %v1447_v55, %v12625_v32  ;;  %v5272_v9 = vcombine.low %v12613_v2, %v12616_v29  ;;  %v5396_v51 = vcombine.low %v12395_v0, %v12491_v39  ;;  %v556_v34 = vadd.f32 %v12250_v14, %v16889_v43  ;;  %v16891_v55 = vld [vmem:[#allocation10_spill] sm:$0xff]  ;;  %v12667_v0 = vpop.f32.mrb[23].mxu0  ;;  %v16896_v29 = vld [vmem:[#allocation13_spill] sm:$0xff] }
 0x18a   : > { %v10544_v50 = vcombine.high %v12089_v47, %v12117_v1  ;;  %v4214_v8 = vrot.slane %v12363_v38, %v11323_v28  ;;  %v12659_v3 = vrot.slane %v5264_v10, %v11323_v28  ;;  %v1546_v33 = vcombine.high %v665_v27, %v665_v27  ;;  %16894 = vst [vmem:[#allocation10_spill] sm:$0xff] %v12667_v0 }
 0x18b   : > { %16888 = vst [vmem:[#allocation74_spill] sm:$0xff] %v12646_v12  ;;  %v16892_v12 = vld [vmem:[#allocation11_spill] sm:$0xff]  ;;  %v3867_v43 = vcombine.low %v12638_v31, %v3866_v63  ;;  %v16897_v38 = vcombine.low %v16895_v36, %v16896_v29  ;;  %v1553_v10 = vrot.slane %v665_v27, %v11323_v28  ;;  %v12679_v49 = vrot.slane %v10565_v26, %v11323_v28 }
 0x18c   : > { %16890 = vst [vmem:[#allocation19_spill] sm:$0xff] %v12659_v3  ;;  %v16893_v32 = vcombine.low %v16891_v55, %v16892_v12  ;;  %v5286_v63 = vrot.slane %v12659_v3, %v11323_v28  ;;  %v1448_v12 = vcombine.high %v663_v40, %v663_v40  ;;  %v3189_v36 = vrot.slane %v10544_v50, %v11323_v28 }
 0x18d   : > { %5698 = vrot.lane.b32.xlu0 %v5619_v13, %s11193_s8  ;;  %v12675_v2 = vrot.slane %v16897_v38, %v11323_v28  ;;  %v4747_v13 = vcombine.low %v12641_v5, %v4746_v53  ;;  %v12690_v29 = vrot.slane %v5272_v9, %v11323_v28  ;;  %v12693_v27 = vrot.slane %v5396_v51, %v11323_v28 }
 0x18e   : > { %v12665_v57 = vrot.slane %v16893_v32, %v11323_v28  ;;  %v16899_v32 = vcombine.low %v12423_v15, %v12500_v16  ;;  %v5410_v26 = vrot.slane %v12679_v49, %v11323_v28  ;;  %v640_v55 = vmul.f32 0.1, %v556_v34  ;;  %v12697_v15 = vpop.f32.mrb[24].mxu0 }
 0x18f   : > { %16898 = vst [vmem:[#allocation11_spill] sm:$0xff] %v12675_v2  ;;  %16900 = vst [vmem:[#allocation12_spill] sm:$0xff] %v12690_v29  ;;  %v12700_v53 = vrot.slane %v1546_v33, %v11323_v28  ;;  %vm612_vm2 = vcmp.ge.f32.partialorder %v556_v34, 0.0  ;;  %v3207_v40 = vcombine.low %v12456_v23, %v12480_v46  ;;  %v10545_v9 = vcombine.high %v12456_v23, %v12480_v46 }
 0x190   : > { %4966 = vrot.lane.b32.xlu1 %v16899_v32, %s11194_s9  ;;  %16901 = vst [vmem:[#allocation13_spill] sm:$0xff] %v12693_v27  ;;  %16902 = vst [vmem:[#allocation75_spill] sm:$0xff] %v12697_v15  ;;  %v4215_v51 = vcombine.low %v12520_v59, %v4214_v8  ;;  %v1561_v50 = vcombine.high %v1553_v10, %v1553_v10  ;;  %v3209_v38 = vcombine.low %v12474_v62, %v12525_v21 }
 0x191   : > { %4032 = vrot.lane.b32.xlu0 %v3867_v43, %s11192_s29  ;;  %v10546_v32 = vcombine.high %v12474_v62, %v12525_v21  ;;  %v5287_v33 = vcombine.low %v12690_v29, %v5286_v63  ;;  %v1462_v41 = vrot.slane %v1448_v12, %v11323_v28  ;;  %v3191_v43 = vcombine.low %v12464_v20, %v3189_v36  ;;  %v16903_v63 = vld [vmem:[#allocation21_spill] sm:$0xff] }
 0x192   : > { %v12719_v8 = vrot.slane %v1553_v10, %v11323_v28  ;;  %v1463_v4 = vcombine.high %v12605_v48, %v12605_v48  ;;  %v5411_v17 = vcombine.low %v12693_v27, %v5410_v26  ;;  %v668_v54 = vsel %vm612_vm2, %v556_v34, %v640_v55  ;;  %v12732_v10 = vpop.permute.xlu0 %4022 }
 0x193   : > { %v548_v52 = vadd.f32 %v12250_v14, %v16903_v63  ;;  %v3217_v12 = vrot.slane %v3207_v40, %v11323_v28  ;;  %v3224_v20 = vrot.slane %v10545_v9, %v11323_v28  ;;  %v12736_v48 = vrot.slane %v12700_v53, %v11323_v28  ;;  %v12743_v63 = vpop.f32.mrb[25].mxu0  ;;  %v4651_v40 = vpop.permute.xlu1 %4650 }
 0x194   : > { %4816 = vrot.lane.b32.xlu1 %v4747_v13, %s11192_s29  ;;  %v1562_v13 = vcombine.high %v12700_v53, %v12700_v53  ;;  %v12739_v34 = vrot.slane %v1561_v50, %v11323_v28  ;;  %v3231_v26 = vrot.slane %v3209_v38, %v11323_v28  ;;  %v3238_v55 = vrot.slane %v10546_v32, %v11323_v28 }
 0x195   : > { %4380 = vrot.lane.b32.xlu0 %v4215_v51, %s11194_s9  ;;  %16904 = vst [vmem:[#allocation21_spill] sm:$0xff] %v12743_v63  ;;  %v1464_v9 = vcombine.high %v1462_v41, %v1462_v41  ;;  %v1693_v51 = vcombine.high %v668_v54, %v668_v54  ;;  %v3205_v35 = vrot.slane %v3191_v43, %v11323_v28  ;;  %v638_v19 = vmul.f32 0.1, %v548_v52  ;;  %v16906_v63 = vld [vmem:[#allocation8_spill] sm:$0xff] }
 0x196   : > { %v3239_v15 = vcombine.low %v3217_v12, %v3224_v20  ;;  %v12748_v53 = vrot.slane %v1462_v41, %v11323_v28  ;;  %v1700_v50 = vrot.slane %v668_v54, %v11323_v28  ;;  %v3240_v0 = vcombine.low %v3231_v26, %v3238_v55 }
 0x197   : > { %v4159_v38 = vcombine.low %v3189_v36, %v3217_v12  ;;  %v4175_v37 = vcombine.low %v3224_v20, %v3231_v26  ;;  %v16909_v43 = vcombine.low %v12520_v59, %v12426_v11  ;;  %vm610_vm4 = vcmp.ge.f32.partialorder %v548_v52, 0.0  ;;  %v12774_v26 = vpop.permute.xlu0 %4018 }
 0x198   : > { %5344 = vrot.lane.b32.xlu1 %v5287_v33, %s11192_s29  ;;  %16905 = vst [vmem:[#allocation76_spill] sm:$0xff] %v12748_v53  ;;  %v3247_v32 = vrot.slane %v3239_v15, %v11323_v28  ;;  %v16907_v33 = vld [vmem:[#allocation9_spill] sm:$0xff]  ;;  %v3254_v54 = vrot.slane %v3240_v0, %v11323_v28  ;;  %v4176_v36 = vcombine.low %v3238_v55, %v12435_v7 }
 0x199   : > { %v16908_v56 = vcombine.low %v16906_v63, %v16907_v33  ;;  %5466 = vrot.lane.b32.xlu0 %v16909_v43, %s11194_s9  ;;  %v12764_v41 = vrot.slane %v4159_v38, %v11323_v28  ;;  %v1707_v15 = vrot.slane %v1693_v51, %v11323_v28  ;;  %v12772_v20 = vrot.slane %v4175_v37, %v11323_v28  ;;  %v16910_v43 = vld [vmem:[#allocation29_spill] sm:$0xff] }
 0x19a   : > { %v1708_v63 = vcombine.high %v1700_v50, %v1700_v50  ;;  %v3206_v0 = vcombine.low %v12381_v44, %v3205_v35  ;;  %v4567_v38 = vcombine.low %v3254_v54, %v12503_v58  ;;  %v666_v55 = vsel %vm610_vm4, %v548_v52, %v638_v19 }
 0x19b   : > { %v12756_v6 = vrot.slane %v16908_v56, %v11323_v28  ;;  %v4566_v56 = vcombine.low %v3205_v35, %v3247_v32  ;;  %v4174_v7 = vcombine.low %v12500_v16, %v12764_v41  ;;  %v3255_v51 = vcombine.low %v3247_v32, %v3254_v54  ;;  %v16913_v16 = vld [vmem:[#allocation24_spill] sm:$0xff] }
 0x19c   : > { %5468 = vrot.lane.b32.xlu1 %v5411_v17, %s11194_s9  ;;  %v12780_v17 = vpop.permute.xlu1 %4806  ;;  %v12783_v33 = vrot.slane %v4176_v36, %v11323_v28  ;;  %v559_v37 = vadd.f32 %v12250_v14, %v16910_v43  ;;  %v12788_v12 = vrot.slane %v1562_v13, %v11323_v28  ;;  %v12791_v35 = vrot.slane %v1463_v4, %v11323_v28  ;;  %v12815_v36 = vpop.permute.xlu0 %3676  ;;  %v16917_v43 = vld [vmem:[#allocation30_spill] sm:$0xff] }
 0x19d   : > { %v12794_v44 = vrot.slane %v1700_v50, %v11323_v28  ;;  %3680 = vrot.lane.b32.xlu0 %v3206_v0, %s11193_s8  ;;  %v2343_v58 = vrot.slane %v16913_v16, %v11323_v28  ;;  %v12800_v19 = vrot.slane %v1464_v9, %v11323_v28  ;;  %v1297_v13 = vcombine.high %v12456_v23, %v12456_v23 }
 0x19e   : > { %16911 = vst [vmem:[#allocation8_spill] sm:$0xff] %v12791_v35  ;;  %v4191_v52 = vcombine.low %v12772_v20, %v12783_v33  ;;  %v4879_v4 = vcombine.low %v12783_v33, %v12520_v59  ;;  %v1709_v50 = vcombine.high %v1707_v15, %v1707_v15  ;;  %v12810_v32 = vrot.slane %v1707_v15, %v11323_v28 }
 0x19f   : > { %16912 = vst [vmem:[#allocation9_spill] sm:$0xff] %v12794_v44  ;;  %16914 = vst [vmem:[#allocation29_spill] sm:$0xff] %v12800_v19  ;;  %v12813_v54 = vrot.slane %v1708_v63, %v11323_v28  ;;  %v1595_v9 = vcombine.high %v666_v55, %v666_v55  ;;  %v551_v35 = vadd.f32 %v12250_v14, %v16917_v43  ;;  %vm613_vm6 = vcmp.ge.f32.partialorder %v559_v37, 0.0 }
 0x1a0   : > { %3682 = vrot.lane.b32.xlu1 %v3255_v51, %s11193_s8  ;;  %16915 = vst [vmem:[#allocation77_spill] sm:$0xff] %v12810_v32  ;;  %v4963_v0 = vpop.permute.xlu1 %4962  ;;  %v641_v51 = vmul.f32 0.1, %v559_v37  ;;  %v1299_v59 = vcombine.high %v12480_v46, %v12480_v46  ;;  %v12824_v15 = vcombine.low %v12675_v2, %v2343_v58  ;;  %v1298_v63 = vcombine.high %v12474_v62, %v12474_v62 }
 0x1a1   : > { %16916 = vst [vmem:[#allocation78_spill] sm:$0xff] %v12813_v54  ;;  %4656 = vrot.lane.b32.xlu0 %v4566_v56, %s11193_s8  ;;  %v16918_v53 = vcombine.low %v12665_v57, %v12675_v2  ;;  %v12834_v42 = vrot.slane %v666_v55, %v11323_v28  ;;  %v2444_v33 = vcombine.low %v12480_v46, %v1297_v13  ;;  %v12847_v2 = vpop.permute.xlu0 %4024  ;;  %v16920_v55 = vld [vmem:[#allocation22_spill] sm:$0xff]  ;;  %v16921_v46 = vld [vmem:[#allocation17_spill] sm:$0xff]  ;;  %vm611_vm7 = vcmp.ge.f32.partialorder %v551_v35, 0.0 }
 0x1a2   : > { %v2445_v58 = vcombine.low %v1299_v59, %v12474_v62  ;;  %v12840_v56 = vrot.slane %v1709_v50, %v11323_v28  ;;  %v12845_v16 = vrot.slane %v1595_v9, %v11323_v28  ;;  %v2191_v13 = vcombine.low %v16921_v46, %v16920_v55  ;;  %v16925_v46 = vld [vmem:[#allocation23_spill] sm:$0xff] }
 0x1a3   : > { %v6019_v43 = vsel %vm5966_vm3, %v16918_v53, %v4651_v40  ;;  %v11195_v40 = vmov 1983009808   ;;  %v669_v50 = vsel %vm613_vm6, %v559_v37, %v641_v51  ;;  %v639_v59 = vmul.f32 0.1, %v551_v35  ;;  %v16924_v51 = vld [vmem:[#allocation26_spill] sm:$0xff] }
 0x1a4   : > { %4658 = vrot.lane.b32.xlu1 %v4567_v38, %s11193_s8  ;;  %16919 = vst [vmem:[#allocation30_spill] sm:$0xff] %v12840_v56  ;;  %v7446_v53 = vunpack.c.l.s4 %v11195_v40  ;;  %v12853_v62 = vpop.permute.xlu1 %4646  ;;  %v1300_v9 = vcombine.high %v12525_v21, %v12525_v21  ;;  %v2446_v19 = vcombine.low %v12525_v21, %v1298_v63  ;;  %v12861_v40 = vrot.slane %v2444_v33, %v11323_v28 }
 0x1a5   : > { %4376 = vrot.lane.b32.xlu0 %v4174_v7, %s11194_s9  ;;  %v12864_v38 = vrot.slane %v2445_v58, %v11323_v28  ;;  %v2239_v7 = vcombine.low %v16925_v46, %v16924_v51  ;;  %v1610_v21 = vcombine.high %v12834_v42, %v12834_v42  ;;  %v1611_v33 = vcombine.high %v12845_v16, %v12845_v16  ;;  %v3675_v63 = vpop.permute.xlu0 %3674 }
 0x1a6   : > { %16922 = vst [vmem:[#allocation22_spill] sm:$0xff] %v12861_v40  ;;  %v5263_v58 = vcombine.low %v12638_v31, %v12641_v5  ;;  %v7447_v55 = vunpack.c.0.s8 %v7446_v53  ;;  %v12880_v37 = vrot.slane %v2191_v13, %v11323_v28  ;;  %v16926_v51 = vcombine.low %v12756_v6, %v12665_v57 }
 0x1a7   : > { %16923 = vst [vmem:[#allocation17_spill] sm:$0xff] %v12864_v38  ;;  %v1742_v44 = vcombine.high %v669_v50, %v669_v50  ;;  %v667_v54 = vsel %vm611_vm7, %v551_v35, %v639_v59  ;;  %v12890_v32 = vrot.slane %v2446_v19, %v11323_v28  ;;  %v2492_v53 = vcombine.low %v1300_v9, %v11969_v25  ;;  %v16928_v59 = vld [vmem:[#allocation5_spill] sm:$0xff] }
 0x1a8   : > { %4378 = vrot.lane.b32.xlu1 %v4191_v52, %s11194_s9  ;;  %v5969_v52 = vsel %vm5966_vm3, %v16926_v51, %v3675_v63  ;;  %v12886_v46 = vpop.permute.xlu1 %4020  ;;  %v3827_v13 = vcombine.low %v12861_v40, %v12864_v38  ;;  %v6035_v56 = vsel %vm5983_vm5, %v6019_v43, %v12780_v17  ;;  %v12898_v57 = vrot.slane %v2239_v7, %v11323_v28 }
 0x1a9   : > { %5342 = vrot.lane.b32.xlu0 %v5263_v58, %s11192_s29  ;;  %16927 = vst [vmem:[#allocation26_spill] sm:$0xff] %v12890_v32  ;;  %v5743_v63 = vcombine.low %v12641_v5, %v12690_v29  ;;  %v1749_v35 = vrot.slane %v669_v50, %v11323_v28  ;;  %v6051_v19 = vsel %vm6000_vm8, %v6035_v56, %v4963_v0  ;;  %v4371_v58 = vpop.permute.xlu0 %4370 }
 0x1aa   : > { %v5986_v25 = vsel %vm5983_vm5, %v5969_v52, %v12732_v10  ;;  %v12908_v9 = vsub.s32 %v7447_v55, %v16928_v59  ;;  %v12911_v17 = vrot.slane %v2492_v53, %v11323_v28  ;;  %v1756_v5 = vrot.slane %v1742_v44, %v11323_v28 }
 0x1ab   : > { %v6003_v43 = vsel %vm6000_vm8, %v5986_v25, %v4371_v58  ;;  %v1644_v7 = vcombine.high %v667_v54, %v667_v54  ;;  %v12918_v50 = vrot.slane %v3827_v13, %v11323_v28  ;;  %v12927_v51 = vrot.slane %v12834_v42, %v11323_v28 }
 0x1ac   : > { %4970 = vrot.lane.b32.xlu1 %v4879_v4, %s11194_s9  ;;  %16929 = vst [vmem:[#allocation23_spill] sm:$0xff] %v12908_v9  ;;  %16930 = vst [vmem:[#allocation5_spill] sm:$0xff] %v12911_v17  ;;  %v12914_v4 = vpop.permute.xlu1 %4804  ;;  %v7477_v0 = vcombine.low %v6003_v43, %v6051_v19  ;;  %v7478_v56 = vcombine.high %v6003_v43, %v6051_v19  ;;  %v3828_v55 = vcombine.low %v12890_v32, %v12911_v17  ;;  %v16940_v32 = vld [vmem:[#allocation31_spill] sm:$0xff] }
 0x1ad   : > { %5822 = vrot.lane.b32.xlu0 %v5743_v63, %s11192_s29  ;;  %v12931_v44 = vrot.slane %v12845_v16, %v11323_v28  ;;  %v1757_v52 = vcombine.high %v1749_v35, %v1749_v35  ;;  %v1651_v53 = vrot.slane %v667_v54, %v11323_v28  ;;  %v12937_v25 = vpop.permute.xlu0 %3670  ;;  %v5867_v59 = vcombine.low %v12426_v11, %v12693_v27 }
 0x1ae   : > { %v7486_v13 = vrot.slane %v7477_v0, %v12908_v9  ;;  %v7493_v63 = vrot.slane %v7478_v56, %v12908_v9  ;;  %v3842_v19 = vrot.slane %v3828_v55, %v11323_v28  ;;  %v12942_v42 = vrot.slane %v1610_v21, %v11323_v28 }
 0x1af   : > { %v12945_v16 = vrot.slane %v1611_v33, %v11323_v28  ;;  %v4414_v54 = vcombine.low %v12880_v37, %v12898_v57  ;;  %v1658_v58 = vrot.slane %v1644_v7, %v11323_v28  ;;  %v1758_v11 = vcombine.high %v1756_v5, %v1756_v5 }
 0x1b0   : > { %v12950_v43 = vpop.permute.xlu1 %4372  ;;  %v12953_v0 = vrot.slane %v7486_v13, %v12908_v9  ;;  %v12956_v56 = vrot.slane %v7493_v63, %v12908_v9  ;;  %v3843_v21 = vcombine.low %v12918_v50, %v3842_v19  ;;  %v5970_v33 = vsel %vm5966_vm3, %v12824_v15, %v12815_v36  ;;  %v12966_v13 = vpop.f32.mrb[26].mxu0  ;;  %v16937_v15 = vld [vmem:[#allocation6_spill] sm:$0xff] }
 0x1b1   : > { %16931 = vst [vmem:[#allocation79_spill] sm:$0xff] %v12945_v16  ;;  %5946 = vrot.lane.b32.xlu0 %v5867_v59, %s11194_s9  ;;  %v1659_v55 = vcombine.high %v1651_v53, %v1651_v53  ;;  %v4723_v7 = vcombine.low %v3842_v19, %v12638_v31  ;;  %v1249_v10 = vcombine.high %v12089_v47, %v12089_v47  ;;  %16932 = vst [vmem:[#allocation80_spill] sm:$0xff] %v12966_v13  ;;  %v12982_v31 = vpop.permute.xlu0 %4802  ;;  %v16938_v19 = vld [vmem:[#allocation7_spill] sm:$0xff] }
 0x1b2   : > { %v12970_v63 = vcombine.low %v12953_v0, %v12956_v56  ;;  %v12973_v27 = vrot.slane %v1756_v5, %v11323_v28  ;;  %v12976_v59 = vrot.slane %v1757_v52, %v11323_v28  ;;  %v12979_v36 = vrot.slane %v1651_v53, %v11323_v28  ;;  %4030 = vrot.lane.b32.xlu1 %v3843_v21, %s11192_s29 }
 0x1b3   : > { %v1660_v47 = vcombine.high %v1658_v58, %v1658_v58  ;;  %v16939_v29 = vcombine.low %v16937_v15, %v16938_v19  ;;  %v572_v5 = vadd.f32 %v12250_v14, %v16940_v32  ;;  %v1251_v52 = vcombine.high %v12117_v1, %v12117_v1 }
 0x1b4   : > { %16933 = vst [vmem:[#allocation81_spill] sm:$0xff] %v12970_v63  ;;  %16934 = vst [vmem:[#allocation82_spill] sm:$0xff] %v12973_v27  ;;  %v12990_v40 = vpop.permute.xlu1 %4648  ;;  %v5987_v53 = vsel %vm5983_vm5, %v5970_v33, %v12847_v2  ;;  %v12998_v21 = vsel %vm5966_vm3, %v4414_v54, %v12853_v62  ;;  %v13001_v13 = vrot.slane %v1749_v35, %v11323_v28  ;;  %v13014_v33 = vpop.f32.mrb[27].mxu0  ;;  %v16947_v62 = vld [vmem:[#allocation27_spill] sm:$0xff] }
 0x1b5   : > { %16935 = vst [vmem:[#allocation83_spill] sm:$0xff] %v12976_v59  ;;  %16936 = vst [vmem:[#allocation84_spill] sm:$0xff] %v12979_v36  ;;  %v2168_v38 = vrot.slane %v16939_v29, %v11323_v28  ;;  %v13004_v29 = vrot.slane %v1758_v11, %v11323_v28  ;;  %v13007_v32 = vrot.slane %v1658_v58, %v11323_v28  ;;  %v13025_v11 = vpop.permute.xlu0 %4366  ;;  %vm616_vm9 = vcmp.ge.f32.partialorder %v572_v5, 0.0 }
 0x1b6   : > { %16941 = vst [vmem:[#allocation6_spill] sm:$0xff] %v13001_v13  ;;  %v13010_v15 = vrot.slane %v1659_v55, %v11323_v28  ;;  %v2397_v19 = vcombine.low %v12117_v1, %v1249_v10  ;;  %v2443_v2 = vcombine.low %v1251_v52, %v12456_v23  ;;  %16944 = vst [vmem:[#allocation85_spill] sm:$0xff] %v13014_v33  ;;  %4814 = vrot.lane.b32.xlu1 %v4723_v7, %s11192_s29  ;;  %v16945_v23 = vld [vmem:[#allocation20_spill] sm:$0xff]  ;;  %v16950_v7 = vld [vmem:[#allocation43_spill] sm:$0xff] }
 0x1b7   : > { %16942 = vst [vmem:[#allocation7_spill] sm:$0xff] %v13004_v29  ;;  %v13028_v1 = vrot.slane %v1660_v47, %v11323_v28  ;;  %v2190_v10 = vcombine.low %v2168_v38, %v16945_v23  ;;  %v644_v55 = vmul.f32 0.1, %v572_v5  ;;  %v16946_v52 = vld [vmem:[#allocation28_spill] sm:$0xff]  ;;  %v5620_v27 = vcombine.low %v16950_v7, %v12590_v45 }
 0x1b8   : > { %16943 = vst [vmem:[#allocation31_spill] sm:$0xff] %v13010_v15  ;;  %v2240_v29 = vcombine.low %v16947_v62, %v16946_v52  ;;  %v13033_v35 = vpop.permute.xlu1 %4368  ;;  %v13036_v54 = vrot.slane %v2397_v19, %v11323_v28  ;;  %v13039_v58 = vrot.slane %v2443_v2, %v11323_v28  ;;  %v1690_v47 = vcombine.high %v13007_v32, %v13007_v32  ;;  %v16951_v19 = vld [vmem:[#allocation32_spill] sm:$0xff] }
 0x1b9   : > { %v1691_v38 = vcombine.high %v13010_v15, %v13010_v15  ;;  %v5628_v23 = vcombine.low %v12491_v39, %v12679_v49  ;;  %v13053_v52 = vadd.f32 %v12250_v14, %v16951_v19  ;;  %v13058_v33 = vrot.slane %v5620_v27, %v11323_v28  ;;  %v13062_v17 = vpop.permute.xlu0 %4958 }
 0x1ba   : > { %16948 = vst [vmem:[#allocation20_spill] sm:$0xff] %v13036_v54  ;;  %16949 = vst [vmem:[#allocation28_spill] sm:$0xff] %v13039_v58  ;;  %v3811_v2 = vcombine.low %v13036_v54, %v13039_v58  ;;  %v1444_v18 = vcombine.high %v16950_v7, %v16950_v7  ;;  %v2198_v62 = vrot.slane %v2190_v10, %v11323_v28  ;;  %v16954_v54 = vld [vmem:[#allocation44_spill] sm:$0xff] }
 0x1bb   : > { %16952 = vst [vmem:[#allocation27_spill] sm:$0xff] %v13058_v33  ;;  %v13065_v36 = vsel %vm616_vm9, %v572_v5, %v644_v55  ;;  %v2254_v39 = vrot.slane %v2240_v29, %v11323_v28  ;;  %v13069_v14 = vrot.slane %v5628_v23, %v11323_v28  ;;  %v5642_v27 = vrot.slane %v13058_v33, %v11323_v28 }
 0x1bc   : > { %v13071_v19 = vpop.permute.xlu1 %4960  ;;  %v3825_v58 = vrot.slane %v3811_v2, %v11323_v28  ;;  %v13078_v15 = vrot.slane %v16954_v54, %v11323_v28  ;;  %v5744_v10 = vcombine.low %v12590_v45, %v1444_v18  ;;  %v13082_v5 = vcombine.low %v1691_v38, %v13007_v32 }
 0x1bd   : > { %16953 = vst [vmem:[#allocation43_spill] sm:$0xff] %v13069_v14  ;;  %v13085_v29 = vcombine.low %v13028_v1, %v1690_v47  ;;  %v2206_v23 = vcombine.low %v2198_v62, %v12880_v37  ;;  %v13092_v2 = vsel %vm6000_vm8, %v5987_v53, %v12950_v43  ;;  %v5643_v16 = vcombine.low %v13069_v14, %v5642_v27  ;;  %v3673_v38 = vpop.permute.xlu0 %3672 }
 0x1be   : > { %16955 = vst [vmem:[#allocation32_spill] sm:$0xff] %v13078_v15  ;;  %v3826_v54 = vcombine.low %v12582_v24, %v3825_v58  ;;  %v13097_v18 = vrot.slane %v5744_v10, %v11323_v28  ;;  %v4415_v37 = vcombine.low %v2254_v39, %v12756_v6  ;;  %v5752_v43 = vcombine.low %v12659_v3, %v13078_v15 }
 0x1bf   : > { %16956 = vst [vmem:[#allocation44_spill] sm:$0xff] %v13085_v29  ;;  %v5967_v47 = vsel %vm5966_vm3, %v2206_v23, %v12937_v25  ;;  %v13109_v24 = vmul.f32 0.1, %v13053_v52  ;;  %5700 = vrot.lane.b32.xlu1 %v5643_v16, %s11193_s8  ;;  %v4878_v62 = vcombine.low %v12764_v41, %v12772_v20  ;;  %v10569_v6 = vcombine.high %v16950_v7, %v12590_v45 }
 0x1c0   : > { %16957 = vst [vmem:[#allocation86_spill] sm:$0xff] %v13097_v18  ;;  %v13106_v53 = vpop.permute.xlu1 %5820  ;;  %4028 = vrot.lane.b32.xlu0 %v3826_v54, %s11192_s29  ;;  %v5766_v25 = vrot.slane %v13097_v18, %v11323_v28  ;;  %v13121_v27 = vrot.slane %v13065_v36, %v11323_v28  ;;  %v6018_v10 = vsel %vm5966_vm3, %v4415_v37, %v12990_v40  ;;  %vm614_vm10 = vcmp.ge.f32.partialorder %v13053_v52, 0.0 }
 0x1c1   : > { %v13126_v23 = vrot.slane %v5752_v43, %v11323_v28  ;;  %v5876_v16 = vcombine.low %v12679_v49, %v13058_v33  ;;  %v4722_v54 = vcombine.low %v3825_v58, %v12918_v50  ;;  %v13132_v41 = vrot.slane %v10569_v6, %v11323_v28  ;;  %v13138_v55 = vpop.permute.xlu0 %4652 }
 0x1c2   : > { %v2533_v20 = vcombine.low %v12530_v61, %v12563_v30  ;;  %v10534_v7 = vcombine.high %v12530_v61, %v12563_v30  ;;  %v5984_v40 = vsel %vm5983_vm5, %v5967_v47, %v12774_v26  ;;  %v2535_v49 = vcombine.low %v12552_v22, %v12608_v60 }
 0x1c3   : > { %16958 = vst [vmem:[#allocation87_spill] sm:$0xff] %v13126_v23  ;;  %16959 = vst [vmem:[#allocation88_spill] sm:$0xff] %v13132_v41  ;;  %v5767_v37 = vcombine.low %v13126_v23, %v5766_v25  ;;  %v10535_v50 = vcombine.high %v12552_v22, %v12608_v60  ;;  %v5890_v43 = vrot.slane %v13132_v41, %v11323_v28 }
 0x1c4   : > { %v13147_v58 = vpop.permute.xlu1 %5464  ;;  %4812 = vrot.lane.b32.xlu0 %v4722_v54, %s11192_s29  ;;  %v2255_v6 = vcombine.low %v12898_v57, %v2254_v39  ;;  %v13154_v18 = vrot.slane %v2533_v20, %v11323_v28  ;;  %v13157_v26 = vrot.slane %v10534_v7, %v11323_v28  ;;  %v13161_v47 = vrot.slane %v5876_v16, %v11323_v28 }
 0x1c5   : > { %5824 = vrot.lane.b32.xlu1 %v5767_v37, %s11192_s29  ;;  %v13164_v25 = vrot.slane %v2535_v49, %v11323_v28  ;;  %v13167_v54 = vrot.slane %v10535_v50, %v11323_v28  ;;  %v2582_v57 = vcombine.low %v12719_v8, %v12739_v34  ;;  %v6033_v39 = vsel %vm5983_vm5, %v12998_v21, %v12982_v31  ;;  %v13182_v37 = vpop.permute.xlu0 %5214 }
 0x1c6   : > { %16960 = vst [vmem:[#allocation89_spill] sm:$0xff] %v13154_v18  ;;  %16961 = vst [vmem:[#allocation90_spill] sm:$0xff] %v13157_v26  ;;  %v13176_v20 = vsel %vm6000_vm8, %v5984_v40, %v13025_v11  ;;  %v3868_v16 = vcombine.low %v13154_v18, %v13157_v26  ;;  %v10536_v7 = vcombine.high %v12719_v8, %v12739_v34 }
 0x1c7   : > { %16962 = vst [vmem:[#allocation91_spill] sm:$0xff] %v13161_v47  ;;  %16963 = vst [vmem:[#allocation92_spill] sm:$0xff] %v13164_v25  ;;  %v5891_v49 = vcombine.low %v13161_v47, %v5890_v43  ;;  %v5968_v50 = vsel %vm5966_vm3, %v2255_v6, %v3673_v38  ;;  %v3869_v31 = vcombine.low %v13164_v25, %v13167_v54 }
 0x1c8   : > { %16964 = vst [vmem:[#allocation93_spill] sm:$0xff] %v13167_v54  ;;  %v13190_v21 = vrot.slane %v2582_v57, %v11323_v28  ;;  %v13192_v11 = vpop.permute.xlu1 %5818  ;;  %v6049_v40 = vsel %vm6000_vm8, %v6033_v39, %v13062_v17  ;;  %v6034_v23 = vsel %vm5983_vm5, %v6018_v10, %v12914_v4  ;;  %4968 = vrot.lane.b32.xlu0 %v4878_v62, %s11194_s9  ;;  %v16973_v54 = vld [vmem:[#allocation78_spill] sm:$0xff] }
 0x1c9   : > { %v3876_v43 = vrot.slane %v3868_v16, %v11323_v28  ;;  %v13201_v38 = vrot.slane %v10536_v7, %v11323_v28  ;;  %5948 = vrot.lane.b32.xlu1 %v5891_v49, %s11194_s9  ;;  %v3883_v6 = vrot.slane %v3869_v31, %v11323_v28  ;;  %v1542_v57 = vcombine.high %v12530_v61, %v12530_v61  ;;  %v13219_v7 = vpop.permute.xlu0 %4808 }
 0x1ca   : > { %16965 = vst [vmem:[#allocation94_spill] sm:$0xff] %v13190_v21  ;;  %v1543_v17 = vcombine.high %v12552_v22, %v12552_v22  ;;  %v1544_v4 = vcombine.high %v12563_v30, %v12563_v30  ;;  %v5985_v62 = vsel %vm5983_vm5, %v5968_v50, %v12886_v46  ;;  %v1545_v39 = vcombine.high %v12608_v60, %v12608_v60 }
 0x1cb   : > { %16966 = vst [vmem:[#allocation95_spill] sm:$0xff] %v13201_v38  ;;  %v3885_v10 = vcombine.low %v13190_v21, %v13201_v38  ;;  %v1591_v16 = vcombine.high %v12719_v8, %v12719_v8  ;;  %v3884_v49 = vcombine.low %v3876_v43, %v3883_v6  ;;  %v3297_v31 = vcombine.low %v12563_v30, %v1542_v57 }
 0x1cc   : > { %v3298_v47 = vcombine.low %v1544_v4, %v12552_v22  ;;  %v3299_v14 = vcombine.low %v12608_v60, %v1543_v17  ;;  %v13224_v33 = vpop.permute.xlu1 %5942  ;;  %v7441_v46 = vcombine.low %v13176_v20, %v6049_v40  ;;  %v3345_v41 = vcombine.low %v1545_v39, %v12719_v8 }
 0x1cd   : > { %v13228_v50 = vrot.slane %v3885_v10, %v11323_v28  ;;  %v3346_v45 = vcombine.low %v12739_v34, %v1591_v16  ;;  %v6002_v43 = vsel %vm6000_vm8, %v5985_v62, %v13033_v35  ;;  %4034 = vrot.lane.b32.xlu0 %v3884_v49, %s11192_s29  ;;  %v13236_v22 = vrot.slane %v3297_v31, %v11323_v28  ;;  %v13244_v10 = vpop.permute.xlu0 %4964 }
 0x1ce   : > { %v3320_v30 = vrot.slane %v3298_v47, %v11323_v28  ;;  %v3327_v60 = vrot.slane %v3299_v14, %v11323_v28  ;;  %v7442_v57 = vcombine.high %v13176_v20, %v6049_v40  ;;  %v3355_v8 = vrot.slane %v3345_v41, %v11323_v28 }
 0x1cf   : > { %v4748_v17 = vcombine.low %v3883_v6, %v13228_v50  ;;  %v3362_v4 = vrot.slane %v3346_v45, %v11323_v28  ;;  %v6050_v35 = vsel %vm6000_vm8, %v6034_v23, %v13071_v19  ;;  %v1592_v47 = vcombine.high %v12736_v48, %v12736_v48 }
 0x1d0   : > { %v4216_v62 = vcombine.low %v13236_v22, %v3320_v30  ;;  %v3329_v39 = vcombine.low %v3320_v30, %v3327_v60  ;;  %v13251_v14 = vpop.permute.xlu1 %3678  ;;  %v7443_v20 = vcombine.low %v6002_v43, %v6050_v35  ;;  %v7444_v40 = vcombine.high %v6002_v43, %v6050_v35 }
 0x1d1   : > { %4818 = vrot.lane.b32.xlu1 %v4748_v17, %s11192_s29  ;;  %v4217_v41 = vcombine.low %v3327_v60, %v3355_v8  ;;  %v3377_v6 = vcombine.low %v3355_v8, %v3362_v4  ;;  %v1593_v19 = vcombine.high %v12739_v34, %v12739_v34  ;;  %v3348_v23 = vcombine.low %v12788_v12, %v1592_v47  ;;  %v13270_v60 = vpop.permute.xlu0 %5338 }
 0x1d2   : > { %v4224_v45 = vrot.slane %v4216_v62, %v11323_v28  ;;  %v13256_v16 = vrot.slane %v3329_v39, %v11323_v28  ;;  %v13265_v49 = vsel %vm614_vm10, %v13053_v52, %v13109_v24  ;;  %v7451_v31 = vrot.slane %v7441_v46, %v12908_v9 }
 0x1d3   : > { %v4231_v43 = vrot.slane %v4217_v41, %v11323_v28  ;;  %v3385_v30 = vrot.slane %v3377_v6, %v11323_v28  ;;  %v7458_v17 = vrot.slane %v7442_v57, %v12908_v9  ;;  %v3347_v34 = vcombine.low %v1593_v19, %v12736_v48 }
 0x1d4   : > { %v13275_v8 = vrot.slane %v3348_v23, %v11323_v28  ;;  %v2584_v35 = vcombine.low %v12736_v48, %v12788_v12  ;;  %v13279_v52 = vpop.permute.xlu1 %5696  ;;  %v16967_v24 = vcombine.high %v13065_v36, %v13065_v36  ;;  %v10537_v57 = vcombine.high %v12736_v48, %v12788_v12 }
 0x1d5   : > { %v4232_v62 = vcombine.low %v4224_v45, %v4231_v43  ;;  %v4592_v39 = vcombine.low %v13256_v16, %v3385_v30  ;;  %v3369_v47 = vrot.slane %v3347_v34, %v11323_v28  ;;  %v7465_v6 = vrot.slane %v7443_v20, %v12908_v9  ;;  %v13304_v23 = vpop.permute.xlu0 %5462 }
 0x1d6   : > { %v13285_v46 = vrot.slane %v16967_v24, %v11323_v28  ;;  %v13292_v41 = vrot.slane %v2584_v35, %v11323_v28  ;;  %v7472_v19 = vrot.slane %v7444_v40, %v12908_v9  ;;  %v1904_v36 = vcombine.high %v13121_v27, %v13121_v27 }
 0x1d7   : > { %4382 = vrot.lane.b32.xlu0 %v4232_v62, %s11194_s9  ;;  %4662 = vrot.lane.b32.xlu1 %v4592_v39, %s11193_s8  ;;  %v13301_v45 = vrot.slane %v10537_v57, %v11323_v28  ;;  %v8323_v48 = vrot.slane %v7451_v31, %v12908_v9  ;;  %v3378_v34 = vcombine.low %v3369_v47, %v13275_v8  ;;  %v16971_v31 = vld [vmem:[#allocation30_spill] sm:$0xff] }
 0x1d8   : > { %16968 = vst [vmem:[#allocation96_spill] sm:$0xff] %v13292_v41  ;;  %v4233_v35 = vcombine.low %v3362_v4, %v3369_v47  ;;  %v8330_v20 = vrot.slane %v7465_v6, %v12908_v9  ;;  %v8337_v40 = vrot.slane %v7458_v17, %v12908_v9  ;;  %v13309_v24 = vpop.permute.xlu1 %5944  ;;  %v8344_v39 = vrot.slane %v7472_v19, %v12908_v9 }
 0x1d9   : > { %16969 = vst [vmem:[#allocation97_spill] sm:$0xff] %v13301_v45  ;;  %v3886_v62 = vcombine.low %v13292_v41, %v13301_v45  ;;  %v13316_v57 = vcombine.high %v12953_v0, %v12956_v56  ;;  %v1741_v18 = vcombine.high %v16971_v31, %v16971_v31  ;;  %v13321_v4 = vrot.slane %v3378_v34, %v11323_v28  ;;  %v16972_v41 = vld [vmem:[#allocation77_spill] sm:$0xff]  ;;  %v13333_v21 = vpop.permute.xlu0 %5216 }
 0x1da   : > { %v13324_v47 = vrot.slane %v4233_v35, %v11323_v28  ;;  %v8346_v17 = vcombine.high %v8323_v48, %v8337_v40  ;;  %v8345_v6 = vcombine.low %v8323_v48, %v8337_v40  ;;  %v8348_v45 = vcombine.high %v8330_v20, %v8344_v39 }
 0x1db   : > { %16970 = vst [vmem:[#allocation98_spill] sm:$0xff] %v13316_v57  ;;  %v13327_v38 = vrot.slane %v3886_v62, %v11323_v28  ;;  %v8347_v19 = vcombine.low %v8330_v20, %v8344_v39  ;;  %v16974_v0 = vcombine.high %v16973_v54, %v16973_v54  ;;  %v3393_v34 = vcombine.low %v3385_v30, %v13321_v4 }
 0x1dc   : > { %v4904_v26 = vcombine.low %v4231_v43, %v13324_v47  ;;  %v16975_v35 = vcombine.high %v16972_v41, %v16972_v41  ;;  %v5645_v40 = vcombine.low %v1741_v18, %v13001_v13  ;;  %v13342_v62 = vpop.permute.xlu1 %6927  ;;  %v1791_v20 = vcombine.high %v13265_v49, %v13265_v49 }
 0x1dd   : > { %v5165_v56 = vcombine.low %v16974_v0, %v16972_v41  ;;  %16976 = vst [vmem:[#allocation30_spill] sm:$0xff] %v13342_v62  ;;  %v9484_v39 = vpack.c.bf16 %v8348_v45, %v8346_v17  ;;  %v9486_v0 = vpack.c.bf16 %v13316_v57, %v8348_v45  ;;  %v9483_v25 = vpack.c.bf16 %v8347_v19, %v8345_v6 }
 0x1de   : > { %v5413_v48 = vcombine.low %v16971_v31, %v16975_v35  ;;  %3688 = vrot.lane.b32.xlu0 %v3393_v34, %s11193_s8  ;;  %4974 = vrot.lane.b32.xlu1 %v4904_v26, %s11194_s9  ;;  %v9485_v43 = vpack.c.bf16 %v12970_v63, %v8347_v19  ;;  %v13358_v35 = vrot.slane %v13121_v27, %v11323_v28  ;;  %v13365_v26 = vpop.permute.xlu0 %5340  ;;  %v16980_v34 = vld [vmem:[#allocation25_spill] sm:$0xff] }
 0x1df   : > { %v13351_v30 = vrot.slane %v5165_v56, %v11323_v28  ;;  %v1798_v45 = vrot.slane %v13265_v49, %v11323_v28  ;;  %9913 = vmatprep.mubr.bf16.mxu1 %v9484_v39  ;;  %10009 = vmatprep.mubr.bf16.mxu0 %v9486_v0  ;;  %v13363_v17 = vrot.slane %v5645_v40, %v11323_v28  ;;  %v16982_v0 = vld [vmem:[#allocation29_spill] sm:$0xff] }
 0x1e0   : > { %v13354_v18 = vrot.slane %v5413_v48, %v11323_v28  ;;  %16977 = vst [vmem:[#allocation77_spill] sm:$0xff] %v13358_v35  ;;  %v1905_v6 = vcombine.high %v13285_v46, %v13285_v46  ;;  %v3901_v19 = vcombine.low %v13228_v50, %v13327_v38  ;;  %9914 = vmatmul.mubr.bf16.vlgmr.msra.gmra.mrb[0].mxu1 %v9483_v25  ;;  %v13373_v56 = vpop.permute.xlu1 %6571  ;;  %v16981_v48 = vld [vmem:[#allocation24_spill] sm:$0xff] }
 0x1e1   : > { %16978 = vst [vmem:[#allocation78_spill] sm:$0xff] %v13363_v17  ;;  %10010 = vmatmul.mubr.bf16.vlgmr.msra.gmra.mrb[28].mxu0 %v9485_v43  ;;  %16979 = vst [vmem:[#allocation99_spill] sm:$0xff] %v13373_v56  ;;  %v1805_v49 = vrot.slane %v1791_v20, %v11323_v28  ;;  %v4425_v40 = vcombine.low %v16981_v48, %v16980_v34  ;;  %v5667_v39 = vrot.slane %v13363_v17, %v11323_v28 }
 0x1e2   : > { %v5653_v27 = vcombine.low %v13351_v30, %v13354_v18  ;;  %v1496_v62 = vcombine.high %v16982_v0, %v16982_v0  ;;  %v13384_v25 = vrot.slane %v13285_v46, %v11323_v28  ;;  %v13387_v50 = vrot.slane %v1904_v36, %v11323_v28  ;;  %4036 = vrot.lane.b32.xlu0 %v3901_v19, %s11192_s29  ;;  %v13400_v0 = vpop.permute.xlu0 %5694 }
 0x1e3   : > { %v5289_v43 = vcombine.low %v16972_v41, %v16971_v31  ;;  %v1807_v48 = vcombine.high %v1805_v49, %v1805_v49  ;;  %v10566_v46 = vcombine.high %v16972_v41, %v16971_v31  ;;  %v1806_v36 = vcombine.high %v1798_v45, %v1798_v45 }
 0x1e4   : > { %16983 = vst [vmem:[#allocation25_spill] sm:$0xff] %v13384_v25  ;;  %16984 = vst [vmem:[#allocation24_spill] sm:$0xff] %v13387_v50  ;;  %v13391_v20 = vrot.slane %v5653_v27, %v11323_v28  ;;  %v3296_v56 = vcombine.low %v1496_v62, %v12530_v61  ;;  %v5769_v15 = vcombine.low %v13001_v13, %v12976_v59  ;;  %v13408_v3 = vpop.permute.xlu1 %4026  ;;  %v16999_v25 = vld [vmem:[#allocation79_spill] sm:$0xff] }
 0x1e5   : > { %v13404_v27 = vrot.slane %v5289_v43, %v11323_v28  ;;  %v13411_v34 = vrot.slane %v1798_v45, %v11323_v28  ;;  %v13414_v61 = vrot.slane %v4425_v40, %v11323_v28  ;;  %v13418_v31 = vrot.slane %v10566_v46, %v11323_v28  ;;  %v17011_v50 = vld [vmem:[#allocation31_spill] sm:$0xff] }
 0x1e6   : > { %16985 = vst [vmem:[#allocation100_spill] sm:$0xff] %v13391_v20  ;;  %v5668_v19 = vcombine.low %v13391_v20, %v5667_v39  ;;  %v3306_v41 = vrot.slane %v3296_v56, %v11323_v28  ;;  %v13421_v62 = vrot.slane %v1905_v6, %v11323_v28  ;;  %v13424_v39 = vrot.slane %v1805_v49, %v11323_v28  ;;  %v13440_v46 = vpop.permute.xlu0 %6323 }
 0x1e7   : > { %16986 = vst [vmem:[#allocation101_spill] sm:$0xff] %v13404_v27  ;;  %16987 = vst [vmem:[#allocation102_spill] sm:$0xff] %v13411_v34  ;;  %v13428_v43 = vrot.slane %v5769_v15, %v11323_v28  ;;  %v1594_v45 = vcombine.high %v12788_v12, %v12788_v12  ;;  %v13433_v40 = vrot.slane %v1807_v48, %v11323_v28 }
 0x1e8   : > { %16988 = vst [vmem:[#allocation103_spill] sm:$0xff] %v13418_v31  ;;  %16989 = vst [vmem:[#allocation104_spill] sm:$0xff] %v13421_v62  ;;  %5704 = vrot.lane.b32.xlu1 %v5668_v19, %s11193_s8  ;;  %v3328_v56 = vcombine.low %v3306_v41, %v13236_v22  ;;  %v5777_v6 = vcombine.low %v13404_v27, %v13418_v31  ;;  %v1640_v49 = vcombine.high %v12927_v51, %v12927_v51  ;;  %v16994_v19 = vld [vmem:[#allocation39_spill] sm:$0xff]  ;;  %v13449_v22 = vpop.permute.xlu1 %6803 }
 0x1e9   : > { %16990 = vst [vmem:[#allocation105_spill] sm:$0xff] %v13424_v39  ;;  %16991 = vst [vmem:[#allocation106_spill] sm:$0xff] %v13428_v43  ;;  %v4439_v15 = vrot.slane %v16994_v19, %v11323_v28  ;;  %v5791_v34 = vrot.slane %v13428_v43, %v11323_v28  ;;  %v3394_v12 = vcombine.low %v1594_v45, %v12927_v51  ;;  %v16996_v41 = vld [vmem:[#allocation11_spill] sm:$0xff]  ;;  %v17033_v39 = vld [vmem:[#allocation52_spill] sm:$0xff] }
 0x1ea   : > { %16992 = vst [vmem:[#allocation107_spill] sm:$0xff] %v13433_v40  ;;  %16993 = vst [vmem:[#allocation108_spill] sm:$0xff] %v13440_v46  ;;  %v1641_v48 = vcombine.high %v12931_v44, %v12931_v44  ;;  %v5006_v20 = vcombine.low %v16996_v41, %v13414_v61  ;;  %v3336_v31 = vrot.slane %v3328_v56, %v11323_v28  ;;  %v13472_v35 = vpop.permute.xlu0 %6447 }
 0x1eb   : > { %16995 = vst [vmem:[#allocation39_spill] sm:$0xff] %v13449_v22  ;;  %v13455_v46 = vrot.slane %v5777_v6, %v11323_v28  ;;  %v1642_v63 = vcombine.high %v12942_v42, %v12942_v42  ;;  %v13460_v43 = vrot.slane %v1806_v36, %v11323_v28  ;;  %v3404_v45 = vrot.slane %v3394_v12, %v11323_v28 }
 0x1ec   : > { %v3395_v57 = vcombine.low %v12942_v42, %v1640_v49  ;;  %v3397_v22 = vcombine.low %v16999_v25, %v1641_v48  ;;  %v13467_v41 = vsel %vm5966_vm3, %v5006_v20, %v13182_v37  ;;  %v3344_v56 = vcombine.low %v3336_v31, %v13256_v16  ;;  %17000 = vst [vmem:[#allocation79_spill] sm:$0xff] %v13472_v35  ;;  %v13482_v37 = vpop.permute.xlu1 %4654 }
 0x1ed   : > { %16997 = vst [vmem:[#allocation11_spill] sm:$0xff] %v13455_v46  ;;  %16998 = vst [vmem:[#allocation109_spill] sm:$0xff] %v13460_v43  ;;  %v5792_v6 = vcombine.low %v13455_v46, %v5791_v34  ;;  %v3396_v62 = vcombine.low %v1642_v63, %v12931_v44  ;;  %v4440_v36 = vcombine.low %v13414_v61, %v4439_v15 }
 0x1ee   : > { %v4234_v12 = vcombine.low %v13275_v8, %v3404_v45  ;;  %v13477_v49 = vrot.slane %v3395_v57, %v11323_v28  ;;  %v13480_v48 = vrot.slane %v3397_v22, %v11323_v28  ;;  %3686 = vrot.lane.b32.xlu0 %v3344_v56, %s11193_s8  ;;  %v7479_v20 = vcombine.high %v13467_v41, %v13467_v41  ;;  %v17001_v22 = vld [vmem:[#allocation9_spill] sm:$0xff] }
 0x1ef   : > { %5828 = vrot.lane.b32.xlu1 %v5792_v6, %s11192_s29  ;;  %v13491_v8 = vrot.slane %v3396_v62, %v11323_v28  ;;  %v6020_v57 = vsel %vm5966_vm3, %v4440_v36, %v13138_v55  ;;  %v17002_v56 = vcombine.low %v17001_v22, %v16973_v54  ;;  %v17004_v55 = vcombine.high %v17001_v22, %v16973_v54 }
 0x1f0   : > { %v13498_v34 = vrot.slane %v4234_v12, %v11323_v28  ;;  %v3426_v31 = vcombine.low %v3404_v45, %v13477_v49  ;;  %v2631_v36 = vcombine.low %v12927_v51, %v12942_v42  ;;  %v13517_v12 = vpop.permute.xlu0 %6321  ;;  %v2633_v63 = vcombine.low %v12931_v44, %v16999_v25  ;;  %v13526_v35 = vpop.permute.xlu1 %4660 }
 0x1f1   : > { %v3427_v15 = vcombine.low %v13491_v8, %v13480_v48  ;;  %v13507_v62 = vrot.slane %v17002_v56, %v11323_v28  ;;  %v13513_v6 = vrot.slane %v17004_v55, %v11323_v28  ;;  %17006 = vst [vmem:[#allocation111_spill] sm:$0xff] %v13517_v12  ;;  %v10538_v56 = vcombine.high %v12927_v51, %v12942_v42 }
 0x1f2   : > { %v4249_v45 = vcombine.low %v13324_v47, %v13498_v34  ;;  %v3434_v16 = vrot.slane %v3426_v31, %v11323_v28  ;;  %17007 = vst [vmem:[#allocation112_spill] sm:$0xff] %v13526_v35  ;;  %v5311_v46 = vrot.slane %v13404_v27, %v11323_v28  ;;  %v10539_v47 = vcombine.high %v12931_v44, %v16999_v25  ;;  %v17008_v31 = vld [vmem:[#allocation16_spill] sm:$0xff] }
 0x1f3   : > { %17003 = vst [vmem:[#allocation9_spill] sm:$0xff] %v13507_v62  ;;  %17005 = vst [vmem:[#allocation110_spill] sm:$0xff] %v13513_v6  ;;  %v13529_v55 = vrot.slane %v3427_v15, %v11323_v28  ;;  %v5297_v43 = vcombine.low %v13507_v62, %v13513_v6  ;;  %v1153_v51 = vcombine.high %v17008_v31, %v17008_v31  ;;  %v17012_v35 = vld [vmem:[#allocation84_spill] sm:$0xff] }
 0x1f4   : > { %4384 = vrot.lane.b32.xlu0 %v4249_v45, %s11194_s9  ;;  %v13541_v42 = vrot.slane %v2631_v36, %v11323_v28  ;;  %v13544_v15 = vrot.slane %v10538_v56, %v11323_v28  ;;  %v2680_v6 = vcombine.low %v17012_v35, %v17011_v50  ;;  %v13553_v44 = vrot.slane %v2633_v63, %v11323_v28  ;;  %v13558_v45 = vpop.permute.xlu0 %3684  ;;  %v13568_v29 = vpop.permute.xlu1 %5220 }
 0x1f5   : > { %v3442_v62 = vcombine.low %v3434_v16, %v13529_v55  ;;  %v13550_v27 = vrot.slane %v5297_v43, %v11323_v28  ;;  %v13556_v31 = vrot.slane %v10539_v47, %v11323_v28  ;;  %v6036_v36 = vsel %vm5983_vm5, %v6020_v57, %v13219_v7  ;;  %17017 = vst [vmem:[#allocation117_spill] sm:$0xff] %v13568_v29 }
 0x1f6   : > { %17009 = vst [vmem:[#allocation113_spill] sm:$0xff] %v13541_v42  ;;  %17010 = vst [vmem:[#allocation114_spill] sm:$0xff] %v13544_v15  ;;  %v13563_v56 = vrot.slane %v2680_v6, %v11323_v28  ;;  %v3902_v12 = vcombine.low %v13541_v42, %v13544_v15  ;;  %v4593_v43 = vcombine.low %v13321_v4, %v3434_v16  ;;  %v17024_v15 = vld [vmem:[#allocation40_spill] sm:$0xff] }
 0x1f7   : > { %17013 = vst [vmem:[#allocation31_spill] sm:$0xff] %v13550_v27  ;;  %17014 = vst [vmem:[#allocation84_spill] sm:$0xff] %v13553_v44  ;;  %3690 = vrot.lane.b32.xlu1 %v3442_v62, %s11193_s8  ;;  %v5312_v63 = vcombine.low %v13550_v27, %v5311_v46  ;;  %v3903_v47 = vcombine.low %v13553_v44, %v13556_v31  ;;  %v17018_v7 = vcombine.high %v17012_v35, %v17011_v50  ;;  %v17020_v46 = vld [vmem:[#allocation18_spill] sm:$0xff] }
 0x1f8   : > { %17015 = vst [vmem:[#allocation115_spill] sm:$0xff] %v13556_v31  ;;  %17016 = vst [vmem:[#allocation116_spill] sm:$0xff] %v13563_v56  ;;  %v1787_v6 = vcombine.high %v13001_v13, %v13001_v13  ;;  %v13586_v16 = vsel %vm6000_vm8, %v6036_v36, %v13244_v10  ;;  %v2345_v62 = vcombine.low %v1153_v51, %v17020_v46  ;;  %v13597_v42 = vpop.permute.xlu0 %4374  ;;  %v17022_v36 = vld [vmem:[#allocation33_spill] sm:$0xff]  ;;  %v17023_v46 = vld [vmem:[#allocation38_spill] sm:$0xff] }
 0x1f9   : > { %v13578_v57 = vrot.slane %v17018_v7, %v11323_v28  ;;  %5348 = vrot.lane.b32.xlu0 %v5312_v63, %s11192_s29  ;;  %v3910_v7 = vrot.slane %v3902_v12, %v11323_v28  ;;  %v3917_v44 = vrot.slane %v3903_v47, %v11323_v28  ;;  %v13602_v51 = vrot.slane %v7479_v20, %v12908_v9  ;;  %v13608_v47 = vpop.permute.xlu1 %4972  ;;  %v17026_v31 = vld [vmem:[#allocation34_spill] sm:$0xff] }
 0x1fa   : > { %v5893_v4 = vcombine.low %v12976_v59, %v1787_v6  ;;  %v5495_v63 = vcombine.low %v17023_v46, %v17022_v36  ;;  %v5015_v12 = vcombine.low %v16994_v19, %v17024_v15  ;;  %v5901_v10 = vcombine.low %v13354_v18, %v13363_v17 }
 0x1fb   : > { %17019 = vst [vmem:[#allocation118_spill] sm:$0xff] %v13578_v57  ;;  %v3927_v13 = vcombine.low %v13563_v56, %v13578_v57  ;;  %17021 = vst [vmem:[#allocation18_spill] sm:$0xff] %v13602_v51  ;;  %v7590_v57 = vcombine.low %v13092_v2, %v13586_v16  ;;  %v3918_v6 = vcombine.low %v3910_v7, %v3917_v44 }
 0x1fc   : > { %v2355_v36 = vrot.slane %v2345_v62, %v11323_v28  ;;  %v5029_v19 = vrot.slane %v17023_v46, %v11323_v28  ;;  %v17025_v15 = vcombine.high %v17001_v22, %v17001_v22  ;;  %v13632_v20 = vrot.slane %v5893_v4, %v11323_v28  ;;  %v13634_v62 = vpop.permute.xlu0 %5218 }
 0x1fd   : > { %v13613_v59 = vrot.slane %v3927_v13, %v11323_v28  ;;  %v5509_v13 = vrot.slane %v17026_v31, %v11323_v28  ;;  %4038 = vrot.lane.b32.xlu1 %v3918_v6, %s11192_s29  ;;  %4664 = vrot.lane.b32.xlu0 %v4593_v43, %s11193_s8  ;;  %17028 = vst [vmem:[#allocation38_spill] sm:$0xff] %v13634_v62  ;;  %v13647_v43 = vpop.permute.xlu1 %4810 }
 0x1fe   : > { %v4907_v56 = vcombine.low %v16973_v54, %v17025_v15  ;;  %17027 = vst [vmem:[#allocation33_spill] sm:$0xff] %v13632_v20  ;;  %v13637_v46 = vrot.slane %v5495_v63, %v11323_v28  ;;  %v13640_v40 = vrot.slane %v5015_v12, %v11323_v28  ;;  %v1643_v6 = vcombine.high %v16999_v25, %v16999_v25 }
 0x1ff   : > { %v4750_v17 = vcombine.low %v3917_v44, %v13613_v59  ;;  %v4749_v44 = vcombine.low %v13327_v38, %v3910_v7  ;;  %v13651_v4 = vrot.slane %v5901_v10, %v11323_v28  ;;  %v5915_v63 = vrot.slane %v13632_v20, %v11323_v28  ;;  %v17034_v7 = vld [vmem:[#allocation51_spill] sm:$0xff] }
 0x200   : > { %17029 = vst [vmem:[#allocation40_spill] sm:$0xff] %v13637_v46  ;;  %v13643_v54 = vrot.slane %v4907_v56, %v11323_v28  ;;  %v17031_v12 = vcombine.high %v17012_v35, %v17012_v35  ;;  %v17032_v56 = vld [vmem:[#allocation53_spill] sm:$0xff]  ;;  %v5030_v25 = vcombine.low %v13640_v40, %v5029_v19  ;;  %v5435_v38 = vrot.slane %v13354_v18, %v11323_v28 }
 0x201   : > { %17030 = vst [vmem:[#allocation34_spill] sm:$0xff] %v13651_v4  ;;  %v2378_v62 = vcombine.low %v17033_v39, %v17032_v56  ;;  %v2377_v10 = vcombine.low %v2355_v36, %v17034_v7  ;;  %4822 = vrot.lane.b32.xlu1 %v4750_v17, %s11192_s29  ;;  %4820 = vrot.lane.b32.xlu0 %v4749_v44, %s11192_s29  ;;  %v13673_v39 = vpop.permute.xlu0 %5698  ;;  %v17036_v44 = vld [vmem:[#allocation73_spill] sm:$0xff] }
 0x202   : > { %v3444_v15 = vcombine.low %v17011_v50, %v17031_v12  ;;  %v5421_v29 = vcombine.low %v13643_v54, %v13351_v30  ;;  %v3443_v20 = vcombine.low %v1643_v6, %v17012_v35  ;;  %v5510_v19 = vcombine.low %v13637_v46, %v5509_v13  ;;  %v13690_v13 = vld [vmem:[%s16508_s2] ss:$0 sm:$0xff] }
 0x203   : > { %v6066_v12 = vsel %vm5966_vm3, %v5030_v25, %v13333_v21  ;;  %v5486_v18 = vcombine.low %v13414_v61, %v13640_v40  ;;  %v5916_v35 = vcombine.low %v13651_v4, %v5915_v63  ;;  %v575_v21 = vadd.f32 %v13690_v13, %v17036_v44 }
 0x204   : > { %v13671_v50 = vrot.slane %v3444_v15, %v11323_v28  ;;  %v13681_v36 = vrot.slane %v5421_v29, %v11323_v28  ;;  %v6074_v17 = vsel %vm5983_vm5, %v6066_v12, %v13365_v26  ;;  %v3452_v6 = vrot.slane %v3443_v20, %v11323_v28  ;;  %v13694_v15 = vpop.permute.xlu1 %4966 }
 0x205   : > { %v13697_v29 = vrot.slane %v2378_v62, %v11323_v28  ;;  %v6089_v26 = vsel %vm5966_vm3, %v5486_v18, %v13400_v0  ;;  %v4250_v20 = vcombine.low %v13477_v49, %v13491_v8  ;;  %v6090_v63 = vsel %vm5966_vm3, %v5510_v19, %v13279_v52  ;;  %5952 = vrot.lane.b32.xlu1 %v5916_v35, %s11194_s9  ;;  %v13708_v7 = vpop.permute.xlu0 %4032  ;;  %v17037_v8 = vld [vmem:[#allocation10_spill] sm:$0xff] }
 0x206   : > { %17035 = vst [vmem:[#allocation53_spill] sm:$0xff] %v13681_v36  ;;  %v5436_v61 = vcombine.low %v13681_v36, %v5435_v38  ;;  %v3467_v56 = vcombine.low %v3452_v6, %v13671_v50  ;;  %vm617_vm11 = vcmp.ge.f32.partialorder %v575_v21, 0.0  ;;  %v645_v25 = vmul.f32 0.1, %v575_v21 }
 0x207   : > { %v2385_v62 = vrot.slane %v2377_v10, %v11323_v28  ;;  %v6082_v0 = vsel %vm6000_vm8, %v6074_v17, %v13147_v58  ;;  %v4258_v49 = vrot.slane %v4250_v20, %v11323_v28  ;;  %v567_v52 = vadd.f32 %v13690_v13, %v17037_v8 }
 0x208   : > { %5472 = vrot.lane.b32.xlu0 %v5436_v61, %s11194_s9  ;;  %v6097_v38 = vsel %vm5983_vm5, %v6089_v26, %v13192_v11  ;;  %v13720_v19 = vrot.slane %v3467_v56, %v11323_v28  ;;  %v673_v12 = vsel %vm617_vm11, %v575_v21, %v645_v25  ;;  %v4251_v18 = vcombine.low %v13480_v48, %v3452_v6  ;;  %v17038_v61 = vld [vmem:[#allocation75_spill] sm:$0xff] }
 0x209   : > { %v7600_v10 = vrot.slane %v7590_v57, %v12908_v9  ;;  %v6098_v58 = vsel %vm5983_vm5, %v6090_v63, %v13106_v53  ;;  %v1938_v17 = vcombine.high %v673_v12, %v673_v12  ;;  %v4905_v35 = vcombine.low %v13498_v34, %v4258_v49  ;;  %v13737_v57 = vpop.permute.xlu1 %4816  ;;  %v13739_v6 = vpop.permute.xlu0 %4380 }
 0x20a   : > { %v6073_v44 = vsel %vm5983_vm5, %v13467_v41, %v13270_v60  ;;  %v6106_v11 = vsel %vm6000_vm8, %v6098_v58, %v13309_v24  ;;  %v4594_v21 = vcombine.low %v13529_v55, %v13720_v19  ;;  %v13735_v48 = vrot.slane %v4251_v18, %v11323_v28 }
 0x20b   : > { %v2393_v53 = vcombine.low %v2385_v62, %v13697_v29  ;;  %v7592_v34 = vcombine.low %v6082_v0, %v6106_v11  ;;  %v6105_v26 = vsel %vm6000_vm8, %v6097_v38, %v13224_v33  ;;  %v643_v60 = vmul.f32 0.1, %v567_v52 }
 0x20c   : > { %4976 = vrot.lane.b32.xlu0 %v4905_v35, %s11194_s9  ;;  %4666 = vrot.lane.b32.xlu1 %v4594_v21, %s11193_s8  ;;  %v13747_v24 = vrot.slane %v1938_v17, %v11323_v28  ;;  %vm615_vm12 = vcmp.ge.f32.partialorder %v567_v52, 0.0  ;;  %v4266_v55 = vcombine.low %v4258_v49, %v13735_v48  ;;  %v588_v20 = vadd.f32 %v13690_v13, %v17038_v61  ;;  %v17047_v21 = vld [vmem:[#allocation21_spill] sm:$0xff] }
 0x20d   : > { %v17039_v63 = vrot.slane %v13467_v41, %v12908_v9  ;;  %v6081_v25 = vsel %vm6000_vm8, %v6073_v44, %v13304_v23  ;;  %v7593_v62 = vcombine.high %v6082_v0, %v6106_v11  ;;  %v17041_v49 = vcombine.high %v13092_v2, %v13586_v16  ;;  %v17043_v16 = vld [vmem:[#allocation35_spill] sm:$0xff] }
 0x20e   : > { %v13769_v38 = vrot.slane %v7600_v10, %v12908_v9  ;;  %v5971_v41 = vsel %vm5966_vm3, %v2393_v53, %v13251_v14  ;;  %v7516_v18 = vcombine.low %v6081_v25, %v6105_v26  ;;  %v671_v17 = vsel %vm615_vm12, %v567_v52, %v643_v60  ;;  %v13787_v14 = vpop.permute.xlu1 %5344  ;;  %v17049_v60 = vld [vmem:[#allocation46_spill] sm:$0xff] }
 0x20f   : > { %v13756_v56 = vrot.slane %v17039_v63, %v12908_v9  ;;  %v13766_v8 = vrot.slane %v17041_v49, %v12908_v9  ;;  %v13775_v58 = vsel %vm5983_vm5, %v5971_v41, %v13408_v3  ;;  %v648_v23 = vmul.f32 0.1, %v588_v20  ;;  %v13789_v3 = vpop.permute.xlu0 %5466 }
 0x210   : > { %v3919_v0 = vcombine.low %v13007_v32, %v13028_v1  ;;  %v13780_v2 = vrot.slane %v7592_v34, %v12908_v9  ;;  %v6122_v10 = vcombine.low %v17026_v31, %v17043_v16  ;;  %v1954_v35 = vcombine.high %v13747_v24, %v13747_v24  ;;  %4386 = vrot.lane.b32.xlu1 %v4266_v55, %s11194_s9  ;;  %v17050_v55 = vld [vmem:[#allocation57_spill] sm:$0xff]  ;;  %v17053_v16 = vld [vmem:[#allocation54_spill] sm:$0xff] }
 0x211   : > { %17040 = vst [vmem:[#allocation52_spill] sm:$0xff] %v13756_v56  ;;  %vm620_vm13 = vcmp.ge.f32.partialorder %v588_v20, 0.0  ;;  %17044 = vst [vmem:[#allocation73_spill] sm:$0xff] %v13789_v3  ;;  %v13792_v52 = vrot.slane %v7593_v62, %v12908_v9  ;;  %v7517_v44 = vcombine.high %v6081_v25, %v6105_v26  ;;  %v580_v31 = vadd.f32 %v13690_v13, %v17047_v21 }
 0x212   : > { %17042 = vst [vmem:[#allocation51_spill] sm:$0xff] %v13780_v2  ;;  %v13795_v11 = vrot.slane %v3919_v0, %v11323_v28  ;;  %v13800_v53 = vrot.slane %v7516_v18, %v12908_v9  ;;  %v1945_v34 = vrot.slane %v673_v12, %v11323_v28  ;;  %v6602_v61 = vcombine.low %v17050_v55, %v17049_v60  ;;  %v17052_v0 = vld [vmem:[#allocation63_spill] sm:$0xff] }
 0x213   : > { %17045 = vst [vmem:[#allocation10_spill] sm:$0xff] %v13792_v52  ;;  %v1840_v63 = vcombine.high %v671_v17, %v671_v17  ;;  %v676_v49 = vsel %vm620_vm13, %v588_v20, %v648_v23  ;;  %vm618_vm14 = vcmp.ge.f32.partialorder %v580_v31, 0.0  ;;  %v646_v26 = vmul.f32 0.1, %v580_v31  ;;  %v13831_v51 = vpop.permute.xlu0 %3680 }
 0x214   : > { %17046 = vst [vmem:[#allocation75_spill] sm:$0xff] %v13795_v11  ;;  %17048 = vst [vmem:[#allocation35_spill] sm:$0xff] %v13800_v53  ;;  %v3941_v62 = vrot.slane %v13795_v11, %v11323_v28  ;;  %v13808_v25 = vrot.slane %v6122_v10, %v11323_v28  ;;  %v6136_v41 = vrot.slane %v17050_v55, %v11323_v28  ;;  %v17055_v55 = vld [vmem:[#allocation47_spill] sm:$0xff] }
 0x215   : > { %v13813_v18 = vrot.slane %v1954_v35, %v11323_v28  ;;  %v1847_v12 = vrot.slane %v671_v17, %v11323_v28  ;;  %v2426_v21 = vcombine.low %v17053_v16, %v17052_v0  ;;  %v674_v23 = vsel %vm618_vm14, %v580_v31, %v646_v26  ;;  %v13829_v17 = vpop.permute.xlu1 %5468  ;;  %17057 = vst [vmem:[#allocation63_spill] sm:$0xff] %v13831_v51 }
 0x216   : > { %17051 = vst [vmem:[#allocation21_spill] sm:$0xff] %v13808_v25  ;;  %v3942_v20 = vcombine.low %v13613_v59, %v3941_v62  ;;  %v13821_v60 = vrot.slane %v13082_v5, %v11323_v28  ;;  %v13824_v10 = vrot.slane %v6602_v61, %v11323_v28  ;;  %v6616_v33 = vrot.slane %v17055_v55, %v11323_v28 }
 0x217   : > { %v1854_v35 = vrot.slane %v1840_v63, %v11323_v28  ;;  %v2085_v56 = vcombine.high %v676_v49, %v676_v49  ;;  %17056 = vst [vmem:[#allocation57_spill] sm:$0xff] %v13829_v17  ;;  %v1953_v0 = vcombine.high %v1945_v34, %v1945_v34  ;;  %v13834_v31 = vrot.slane %v1945_v34, %v11323_v28  ;;  %v17066_v17 = vld [vmem:[#allocation111_spill] sm:$0xff] }
 0x218   : > { %17054 = vst [vmem:[#allocation46_spill] sm:$0xff] %v13824_v10  ;;  %v2092_v5 = vrot.slane %v676_v49, %v11323_v28  ;;  %4040 = vrot.lane.b32.xlu0 %v3942_v20, %s11192_s29  ;;  %v4275_v61 = vcombine.low %v13671_v50, %v13821_v60  ;;  %v13841_v62 = vrot.slane %v7517_v44, %v12908_v9 }
 0x219   : > { %v13844_v63 = vcombine.low %v13808_v25, %v6136_v41  ;;  %v1986_v26 = vcombine.high %v13813_v18, %v13813_v18  ;;  %v1994_v16 = vrot.slane %v674_v23, %v11323_v28  ;;  %v1855_v34 = vcombine.high %v1847_v12, %v1847_v12  ;;  %v13882_v4 = vpop.permute.xlu1 %3682 }
 0x21a   : > { %17058 = vst [vmem:[#allocation54_spill] sm:$0xff] %v13841_v62  ;;  %v13850_v55 = vrot.slane %v1847_v12, %v11323_v28  ;;  %v13853_v49 = vrot.slane %v2426_v21, %v11323_v28  ;;  %v13856_v50 = vrot.slane %v4275_v61, %v11323_v28  ;;  %v13859_v44 = vcombine.low %v13824_v10, %v6616_v33  ;;  %v17065_v62 = vld [vmem:[#allocation44_spill] sm:$0xff] }
 0x21b   : > { %17059 = vst [vmem:[#allocation119_spill] sm:$0xff] %v13844_v63  ;;  %v1856_v41 = vcombine.high %v1854_v35, %v1854_v35  ;;  %v2099_v20 = vrot.slane %v2085_v56, %v11323_v28  ;;  %v13863_v25 = vrot.slane %v1994_v16, %v11323_v28  ;;  %v13867_v63 = vrot.slane %v13747_v24, %v11323_v28  ;;  %v13884_v24 = vpop.permute.xlu0 %4656 }
 0x21c   : > { %17060 = vst [vmem:[#allocation120_spill] sm:$0xff] %v13859_v44  ;;  %v13870_v12 = vrot.slane %v1953_v0, %v11323_v28  ;;  %v2100_v61 = vcombine.high %v2092_v5, %v2092_v5  ;;  %v13875_v33 = vrot.slane %v1854_v35, %v11323_v28  ;;  %v1987_v10 = vcombine.high %v674_v23, %v674_v23 }
 0x21d   : > { %v13878_v56 = vcombine.low %v1986_v26, %v13863_v25  ;;  %v4906_v44 = vcombine.low %v13735_v48, %v13856_v50  ;;  %17061 = vst [vmem:[#allocation121_spill] sm:$0xff] %v13884_v24  ;;  %v13887_v0 = vrot.slane %v1855_v34, %v11323_v28  ;;  %v13892_v35 = vrot.slane %v2092_v5, %v11323_v28 }
 0x21e   : > { %v4441_v23 = vcombine.low %v13697_v29, %v13853_v49  ;;  %v13897_v26 = vrot.slane %v1856_v41, %v11323_v28  ;;  %v2101_v48 = vcombine.high %v2099_v20, %v2099_v20  ;;  %v13900_v2 = vrot.slane %v2099_v20, %v11323_v28 }
 0x21f   : > { %17062 = vst [vmem:[#allocation122_spill] sm:$0xff] %v13892_v35  ;;  %4978 = vrot.lane.b32.xlu1 %v4906_v44, %s11194_s9  ;;  %v3481_v34 = vrot.slane %v13821_v60, %v11323_v28  ;;  %v13906_v21 = vrot.slane %v2100_v61, %v11323_v28  ;;  %v6113_v29 = vcombine.low %v13640_v40, %v13637_v46  ;;  %v17069_v40 = vld [vmem:[#allocation66_spill] sm:$0xff]  ;;  %v13935_v61 = vpop.permute.xlu1 %4658 }
 0x220   : > { %17063 = vst [vmem:[#allocation123_spill] sm:$0xff] %v13900_v2  ;;  %v6021_v5 = vsel %vm5966_vm3, %v4441_v23, %v13482_v37  ;;  %v1692_v41 = vcombine.high %v13028_v1, %v13028_v1  ;;  %v2001_v20 = vrot.slane %v1987_v10, %v11323_v28  ;;  %v2002_v52 = vcombine.high %v1994_v16, %v1994_v16  ;;  %v17068_v23 = vld [vmem:[#allocation68_spill] sm:$0xff] }
 0x221   : > { %17064 = vst [vmem:[#allocation124_spill] sm:$0xff] %v13906_v21  ;;  %v3482_v44 = vcombine.low %v13720_v19, %v3481_v34  ;;  %v4274_v53 = vrot.slane %v17065_v62, %v11323_v28  ;;  %v13922_v37 = vsel %vm5966_vm3, %v6113_v29, %v17066_v17  ;;  %v4452_v46 = vcombine.low %v17069_v40, %v17068_v23  ;;  %v13937_v17 = vpop.permute.xlu0 %4376 }
 0x222   : > { %17067 = vst [vmem:[#allocation44_spill] sm:$0xff] %v13922_v37  ;;  %v4595_v3 = vcombine.low %v1692_v41, %v17001_v22  ;;  %v13928_v10 = vrot.slane %v2101_v48, %v11323_v28  ;;  %17071 = vst [vmem:[#allocation68_spill] sm:$0xff] %v13935_v61  ;;  %v17073_v22 = vld [vmem:[#allocation37_spill] sm:$0xff]  ;;  %v13951_v16 = vrot.slane %v2002_v52, %v11323_v28  ;;  %v17076_v52 = vld [vmem:[#allocation70_spill] sm:$0xff] }
 0x223   : > { %3692 = vrot.lane.b32.xlu0 %v3482_v44, %s11193_s8  ;;  %v4603_v62 = vcombine.low %v13821_v60, %v4274_v53  ;;  %v4289_v34 = vrot.slane %v4274_v53, %v11323_v28  ;;  %17072 = vst [vmem:[#allocation66_spill] sm:$0xff] %v13937_v17  ;;  %v4466_v48 = vrot.slane %v17073_v22, %v11323_v28  ;;  %v17077_v17 = vld [vmem:[#allocation9_spill] sm:$0xff] }
 0x224   : > { %17070 = vst [vmem:[#allocation111_spill] sm:$0xff] %v13928_v10  ;;  %v4602_v41 = vrot.slane %v4595_v3, %v11323_v28  ;;  %v17074_v44 = vcombine.high %v13007_v32, %v13028_v1  ;;  %v2003_v60 = vcombine.high %v2001_v20, %v2001_v20  ;;  %v2032_v10 = vcombine.high %v13863_v25, %v13863_v25 }
 0x225   : > { %v13954_v2 = vrot.slane %v4603_v62, %v11323_v28  ;;  %v4290_v29 = vcombine.low %v13856_v50, %v4289_v34  ;;  %v13960_v3 = vrot.slane %v4452_v46, %v11323_v28  ;;  %v13966_v1 = vrot.slane %v2001_v20, %v11323_v28 }
 0x226   : > { %v13948_v23 = vrot.slane %v17074_v44, %v11323_v28  ;;  %v4617_v21 = vrot.slane %v4602_v41, %v11323_v28  ;;  %v5040_v62 = vcombine.low %v17073_v22, %v17076_v52  ;;  %v4915_v44 = vcombine.low %v4274_v53, %v4602_v41  ;;  %v13991_v22 = vpop.permute.xlu0 %5342 }
 0x227   : > { %4388 = vrot.lane.b32.xlu0 %v4290_v29, %s11194_s9  ;;  %v5164_v34 = vcombine.low %v13720_v19, %v13954_v2  ;;  %v4773_v24 = vrot.slane %v17077_v17, %v11323_v28  ;;  %v4929_v20 = vrot.slane %v13643_v54, %v11323_v28  ;;  %v2033_v29 = vcombine.high %v13966_v1, %v13966_v1  ;;  %v17080_v19 = vld [vmem:[#allocation64_spill] sm:$0xff] }
 0x228   : > { %17075 = vst [vmem:[#allocation37_spill] sm:$0xff] %v13948_v23  ;;  %v4759_v32 = vcombine.low %v13795_v11, %v13948_v23  ;;  %v4618_v46 = vcombine.low %v13954_v2, %v4617_v21  ;;  %v13980_v23 = vrot.slane %v2003_v60, %v11323_v28  ;;  %v13987_v53 = vrot.slane %v4915_v44, %v11323_v28  ;;  %v13989_v21 = vpop.permute.xlu1 %4378  ;;  %v17079_v44 = vld [vmem:[#allocation5_spill] sm:$0xff] }
 0x229   : > { %17078 = vst [vmem:[#allocation70_spill] sm:$0xff] %v13989_v21  ;;  %v10555_v52 = vcombine.high %v13863_v25, %v13951_v16  ;;  %v4467_v17 = vcombine.low %v13960_v3, %v4466_v48  ;;  %v17081_v11 = vcombine.low %v17079_v44, %v17080_v19  ;;  %v17082_v21 = vld [vmem:[#allocation71_spill] sm:$0xff]  ;;  %v14015_v48 = vrot.slane %v5040_v62, %v11323_v28 }
 0x22a   : > { %v4766_v35 = vrot.slane %v4759_v32, %v11323_v28  ;;  %v13994_v32 = vcombine.low %v13951_v16, %v2032_v10  ;;  %4668 = vrot.lane.b32.xlu1 %v4618_v46, %s11193_s8  ;;  %v2530_v10 = vrot.slane %v17069_v40, %v11323_v28  ;;  %v5054_v61 = vrot.slane %v17082_v21, %v11323_v28 }
 0x22b   : > { %v14006_v37 = vrot.slane %v17081_v11, %v11323_v28  ;;  %5222 = vrot.lane.b32.xlu0 %v5164_v34, %s11193_s8  ;;  %v4930_v60 = vcombine.low %v13987_v53, %v4929_v20  ;;  %17083 = vst [vmem:[#allocation5_spill] sm:$0xff] %v14015_v48  ;;  %v6037_v51 = vsel %vm5983_vm5, %v6021_v5, %v13647_v43  ;;  %v17084_v34 = vld [vmem:[#allocation85_spill] sm:$0xff]  ;;  %v17086_v43 = vld [vmem:[#allocation112_spill] sm:$0xff] }
 0x22c   : > { %v4774_v46 = vcombine.low %v4766_v35, %v4773_v24  ;;  %v5412_v11 = vcombine.low %v13856_v50, %v13987_v53  ;;  %v5288_v19 = vcombine.low %v13613_v59, %v4766_v35  ;;  %v6053_v40 = vsel %vm6000_vm8, %v6037_v51, %v13694_v15  ;;  %v17087_v59 = vld [vmem:[#allocation80_spill] sm:$0xff] }
 0x22d   : > { %v5173_v44 = vcombine.low %v4602_v41, %v13643_v54  ;;  %v583_v20 = vadd.f32 %v13690_v13, %v17084_v34  ;;  %v14030_v24 = vcombine.low %v13980_v23, %v2033_v29  ;;  %v6024_v5 = vsel %vm5966_vm3, %v4467_v17, %v17086_v43  ;;  %v14042_v41 = vpop.permute.xlu1 %4970  ;;  %v14044_v29 = vpop.permute.xlu0 %5822 }
 0x22e   : > { %4824 = vrot.lane.b32.xlu1 %v4774_v46, %s11192_s29  ;;  %v591_v50 = vadd.f32 %v13690_v13, %v17087_v59  ;;  %v2531_v51 = vcombine.low %v14006_v37, %v2530_v10  ;;  %v6005_v54 = vsel %vm6000_vm8, %v13775_v58, %v13597_v42  ;;  %v5768_v46 = vcombine.low %v4766_v35, %v13550_v27 }
 0x22f   : > { %17085 = vst [vmem:[#allocation64_spill] sm:$0xff] %v14030_v24  ;;  %5346 = vrot.lane.b32.xlu0 %v5288_v19, %s11192_s29  ;;  %vm619_vm15 = vcmp.ge.f32.partialorder %v583_v20, 0.0  ;;  %v647_v15 = vmul.f32 0.1, %v583_v20  ;;  %v7659_v13 = vcombine.low %v6005_v54, %v6053_v40  ;;  %v6040_v10 = vsel %vm5983_vm5, %v6024_v5, %v13737_v57 }
 0x230   : > { %v5974_v42 = vsel %vm5966_vm3, %v2531_v51, %v13558_v45  ;;  %v5055_v58 = vcombine.low %v14015_v48, %v5054_v61  ;;  %v14055_v19 = vrot.slane %v5173_v44, %v11323_v28  ;;  %v5187_v34 = vrot.slane %v13351_v30, %v11323_v28  ;;  %v17089_v44 = vld [vmem:[#allocation117_spill] sm:$0xff] }
 0x231   : > { %v5031_v35 = vcombine.low %v14006_v37, %v13960_v3  ;;  %v649_v43 = vmul.f32 0.1, %v591_v50  ;;  %v5991_v57 = vsel %vm5983_vm5, %v5974_v42, %v13708_v7  ;;  %v675_v5 = vsel %vm619_vm15, %v583_v20, %v647_v15  ;;  %v17090_v7 = vld [vmem:[#allocation38_spill] sm:$0xff]  ;;  %v14091_v42 = vpop.permute.xlu1 %4030 }
 0x232   : > { %17088 = vst [vmem:[#allocation71_spill] sm:$0xff] %v14055_v19  ;;  %5826 = vrot.lane.b32.xlu1 %v5768_v46, %s11192_s29  ;;  %v14066_v45 = vrot.slane %v10555_v52, %v11323_v28  ;;  %vm621_vm0 = vcmp.ge.f32.partialorder %v591_v50, 0.0  ;;  %v14071_v30 = vsel %vm6000_vm8, %v6040_v10, %v13608_v47  ;;  %v14075_v61 = vsel %vm6000_vm8, %v5991_v57, %v13739_v6  ;;  %v17093_v47 = vld [vmem:[#allocation24_spill] sm:$0xff]  ;;  %v17094_v46 = vld [vmem:[#allocation77_spill] sm:$0xff] }
 0x233   : > { %5470 = vrot.lane.b32.xlu0 %v5412_v11, %s11194_s9  ;;  %v6068_v59 = vsel %vm5966_vm3, %v5055_v58, %v17089_v44  ;;  %v14081_v20 = vsel %vm5966_vm3, %v5031_v35, %v17090_v7  ;;  %v7660_v52 = vcombine.high %v6005_v54, %v6053_v40  ;;  %v14084_v51 = vrot.slane %v7659_v13, %v12908_v9  ;;  %v14093_v58 = vpop.permute.xlu0 %5946  ;;  %v17095_v35 = vld [vmem:[#allocation104_spill] sm:$0xff]  ;;  %v17096_v57 = vld [vmem:[#allocation25_spill] sm:$0xff] }
 0x234   : > { %17091 = vst [vmem:[#allocation85_spill] sm:$0xff] %v14081_v20  ;;  %v2036_v11 = vcombine.high %v675_v5, %v675_v5  ;;  %v5188_v15 = vcombine.low %v14055_v19, %v5187_v34  ;;  %v3533_v10 = vcombine.low %v17094_v46, %v17093_v47  ;;  %v10551_v6 = vcombine.high %v17094_v46, %v17093_v47 }
 0x235   : > { %17092 = vst [vmem:[#allocation112_spill] sm:$0xff] %v14084_v51  ;;  %v5511_v40 = vcombine.low %v13960_v3, %v14015_v48  ;;  %v677_v54 = vsel %vm621_vm0, %v591_v50, %v649_v43  ;;  %v2043_v13 = vrot.slane %v675_v5, %v11323_v28  ;;  %v7808_v34 = vcombine.low %v14075_v61, %v14071_v30 }
 0x236   : > { %4980 = vrot.lane.b32.xlu1 %v4930_v60, %s11194_s9  ;;  %v3535_v44 = vcombine.low %v17096_v57, %v17095_v35  ;;  %v14105_v7 = vrot.slane %v3533_v10, %v11323_v28  ;;  %v3556_v17 = vrot.slane %v10551_v6, %v11323_v28  ;;  %v10552_v60 = vcombine.high %v17096_v57, %v17095_v35 }
 0x237   : > { %5224 = vrot.lane.b32.xlu0 %v5188_v15, %s11193_s8  ;;  %v14112_v3 = vsel %vm5966_vm3, %v5511_v40, %v13673_v39  ;;  %v14115_v50 = vrot.slane %v7660_v52, %v12908_v9  ;;  %v10580_v43 = vcombine.low %v13766_v8, %v14084_v51  ;;  %v5644_v5 = vcombine.low %v13954_v2, %v14055_v19 }
 0x238   : > { %v2050_v15 = vrot.slane %v2036_v11, %v11323_v28  ;;  %v5892_v10 = vcombine.low %v13987_v53, %v13681_v36  ;;  %v3563_v6 = vrot.slane %v3535_v44, %v11323_v28  ;;  %v3591_v62 = vrot.slane %v10552_v60, %v11323_v28  ;;  %v14143_v44 = vpop.permute.xlu1 %4814  ;;  %v14145_v60 = vpop.permute.xlu0 %4028 }
 0x239   : > { %17097 = vst [vmem:[#allocation80_spill] sm:$0xff] %v14115_v50  ;;  %v14127_v39 = vrot.slane %v677_v54, %v11323_v28  ;;  %v2051_v52 = vcombine.high %v2043_v13, %v2043_v13  ;;  %v7809_v8 = vcombine.high %v14075_v61, %v14071_v30  ;;  %v14134_v2 = vsel %vm5983_vm5, %v6068_v59, %v13787_v14  ;;  %v17104_v50 = vld [vmem:[#allocation81_spill] sm:$0xff] }
 0x23a   : > { %5702 = vrot.lane.b32.xlu1 %v5644_v5, %s11193_s8  ;;  %17099 = vst [vmem:[#allocation38_spill] sm:$0xff] %v14134_v2  ;;  %v14137_v11 = vrot.slane %v2043_v13, %v11323_v28  ;;  %v14140_v53 = vrot.slane %v7808_v34, %v12908_v9  ;;  %v4308_v40 = vcombine.low %v14105_v7, %v3556_v17  ;;  %v17125_v2 = vld [vmem:[#allocation17_spill] sm:$0xff] }
 0x23b   : > { %17098 = vst [vmem:[#allocation117_spill] sm:$0xff] %v14127_v39  ;;  %v4309_v54 = vcombine.low %v3563_v6, %v3591_v62  ;;  %v3565_v5 = vcombine.low %v3556_v17, %v3563_v6  ;;  %v3582_v30 = vcombine.low %v13834_v31, %v13870_v12  ;;  %v10553_v14 = vcombine.high %v13834_v31, %v13870_v12 }
 0x23c   : > { %17100 = vst [vmem:[#allocation24_spill] sm:$0xff] %v14137_v11  ;;  %17101 = vst [vmem:[#allocation77_spill] sm:$0xff] %v14140_v53  ;;  %v3584_v61 = vcombine.low %v13867_v63, %v13813_v18  ;;  %v2052_v59 = vcombine.high %v2050_v15, %v2050_v15  ;;  %v14154_v13 = vrot.slane %v4308_v40, %v11323_v28 }
 0x23d   : > { %v4323_v34 = vrot.slane %v4309_v54, %v11323_v28  ;;  %v8550_v48 = vrot.slane %v10580_v43, %v12908_v9  ;;  %v14159_v36 = vrot.slane %v2050_v15, %v11323_v28  ;;  %v3598_v17 = vrot.slane %v3582_v30, %v11323_v28 }
 0x23e   : > { %5950 = vrot.lane.b32.xlu1 %v5892_v10, %s11194_s9  ;;  %v3605_v6 = vrot.slane %v10553_v14, %v11323_v28  ;;  %v14165_v27 = vrot.slane %v3584_v61, %v11323_v28  ;;  %v14168_v19 = vrot.slane %v2051_v52, %v11323_v28  ;;  %v14174_v15 = vrot.slane %v3565_v5, %v11323_v28  ;;  %v17103_v52 = vld [vmem:[#allocation98_spill] sm:$0xff] }
 0x23f   : > { %v4324_v40 = vcombine.low %v14154_v13, %v4323_v34  ;;  %v8559_v54 = vcombine.high %v13769_v38, %v8550_v48  ;;  %v8558_v43 = vcombine.low %v13769_v38, %v8550_v48  ;;  %v3613_v10 = vcombine.low %v3591_v62, %v3598_v17  ;;  %v14185_v38 = vpop.permute.xlu1 %5700  ;;  %v14187_v48 = vpop.permute.xlu0 %4812 }
 0x240   : > { %v3614_v30 = vcombine.low %v3605_v6, %v14165_v27  ;;  %v4325_v39 = vcombine.low %v3598_v17, %v3605_v6  ;;  %v2081_v14 = vcombine.high %v14137_v11, %v14137_v11  ;;  %v14180_v61 = vrot.slane %v7809_v8, %v12908_v9  ;;  %v17124_v9 = vld [vmem:[#allocation26_spill] sm:$0xff] }
 0x241   : > { %4392 = vrot.lane.b32.xlu0 %v4324_v40, %s11194_s9  ;;  %v9491_v53 = vpack.c.bf16 %v8559_v54, %v17103_v52  ;;  %v9490_v51 = vpack.c.bf16 %v8558_v43, %v17104_v50  ;;  %v14190_v62 = vrot.slane %v2052_v59, %v11323_v28  ;;  %v3621_v5 = vrot.slane %v3613_v10, %v11323_v28 }
 0x242   : > { %17102 = vst [vmem:[#allocation104_spill] sm:$0xff] %v14180_v61  ;;  %v14194_v17 = vrot.slane %v3614_v30, %v11323_v28  ;;  %v14197_v8 = vrot.slane %v4325_v39, %v11323_v28  ;;  %v1937_v40 = vcombine.high %v17095_v35, %v17095_v35  ;;  %v1984_v54 = vcombine.high %v13867_v63, %v13867_v63 }
 0x243   : > { %17105 = vst [vmem:[#allocation25_spill] sm:$0xff] %v14190_v62  ;;  %9921 = vmatprep.mubr.bf16.mxu1 %v9491_v53  ;;  %v1985_v59 = vcombine.high %v13870_v12, %v13870_v12  ;;  %v4620_v10 = vcombine.low %v14174_v15, %v3621_v5  ;;  %v4934_v53 = vcombine.low %v14137_v11, %v14168_v19 }
 0x244   : > { %v3629_v39 = vcombine.low %v3621_v5, %v14194_v17  ;;  %v4932_v30 = vcombine.low %v4323_v34, %v14197_v8  ;;  %9922 = vmatmul.mubr.bf16.gmra.mrb[4].mxu1 %v9490_v51  ;;  %v2818_v6 = vcombine.low %v1937_v40, %v13834_v31  ;;  %v17106_v50 = vcombine.high %v13834_v31, %v13834_v31 }
 0x245   : > { %v2820_v61 = vcombine.low %v1985_v59, %v13867_v63  ;;  %4672 = vrot.lane.b32.xlu1 %v4620_v10, %s11193_s8  ;;  %v2866_v5 = vcombine.low %v13813_v18, %v1984_v54  ;;  %v1935_v51 = vcombine.high %v17096_v57, %v17096_v57  ;;  %v1936_v34 = vcombine.high %v17093_v47, %v17093_v47  ;;  %v14239_v59 = vpop.permute.xlu1 %5824  ;;  %v14241_v54 = vpop.permute.xlu0 %4968 }
 0x246   : > { %v2819_v52 = vcombine.low %v13870_v12, %v17106_v50  ;;  %3698 = vrot.lane.b32.xlu0 %v3629_v39, %s11193_s8  ;;  %v14228_v40 = vcombine.low %v14168_v19, %v2081_v14  ;;  %v14231_v31 = vrot.slane %v2818_v6, %v11323_v28  ;;  %17111 = vst [vmem:[#allocation129_spill] sm:$0xff] %v14239_v59 }
 0x247   : > { %v14237_v50 = vrot.slane %v2820_v61, %v11323_v28  ;;  %v10563_v10 = vcombine.high %v14137_v11, %v14168_v19  ;;  %v14246_v39 = vrot.slane %v2866_v5, %v11323_v28  ;;  %v2771_v14 = vcombine.low %v1936_v34, %v17096_v57  ;;  %v17113_v5 = vld [vmem:[#allocation20_spill] sm:$0xff]  ;;  %v17114_v11 = vld [vmem:[#allocation62_spill] sm:$0xff] }
 0x248   : > { %17107 = vst [vmem:[#allocation125_spill] sm:$0xff] %v14228_v40  ;;  %17108 = vst [vmem:[#allocation126_spill] sm:$0xff] %v14231_v31  ;;  %v14234_v12 = vrot.slane %v2819_v52, %v11323_v28  ;;  %v2817_v6 = vcombine.low %v17095_v35, %v1935_v51  ;;  %v14251_v52 = vrot.slane %v4934_v53, %v11323_v28  ;;  %v17117_v51 = vld [vmem:[#allocation22_spill] sm:$0xff]  ;;  %v17118_v34 = vld [vmem:[#allocation28_spill] sm:$0xff] }
 0x249   : > { %17110 = vst [vmem:[#allocation128_spill] sm:$0xff] %v14237_v50  ;;  %17112 = vst [vmem:[#allocation130_spill] sm:$0xff] %v14246_v39  ;;  %v10554_v43 = vcombine.high %v13867_v63, %v13813_v18  ;;  %v10550_v40 = vcombine.high %v13875_v33, %v13897_v26  ;;  %4984 = vrot.lane.b32.xlu1 %v4932_v30, %s11194_s9  ;;  %v2427_v24 = vcombine.low %v17114_v11, %v17113_v5 }
 0x24a   : > { %17109 = vst [vmem:[#allocation127_spill] sm:$0xff] %v14234_v12  ;;  %v3977_v61 = vcombine.low %v14231_v31, %v14234_v12  ;;  %v3978_v35 = vcombine.low %v14237_v50, %v14246_v39  ;;  %v14265_v57 = vrot.slane %v2771_v14, %v11323_v28  ;;  %v14268_v53 = vrot.slane %v2817_v6, %v11323_v28  ;;  %v14295_v50 = vpop.permute.xlu1 %5948 }
 0x24b   : > { %v2475_v18 = vcombine.low %v17118_v34, %v17117_v51  ;;  %v14274_v12 = vrot.slane %v10554_v43, %v11323_v28  ;;  %v3542_v30 = vrot.slane %v10550_v40, %v11323_v28  ;;  %v3484_v6 = vcombine.low %v13850_v55, %v13887_v0  ;;  %v17120_v51 = vld [vmem:[#allocation107_spill] sm:$0xff]  ;;  %17122 = vst [vmem:[#allocation22_spill] sm:$0xff] %v14295_v50 }
 0x24c   : > { %17115 = vst [vmem:[#allocation20_spill] sm:$0xff] %v14265_v57  ;;  %17116 = vst [vmem:[#allocation62_spill] sm:$0xff] %v14268_v53  ;;  %v3985_v63 = vrot.slane %v3977_v61, %v11323_v28  ;;  %v14278_v11 = vrot.slane %v3978_v35, %v11323_v28  ;;  %v3961_v14 = vcombine.low %v14265_v57, %v14268_v53  ;;  %v17119_v35 = vld [vmem:[#allocation105_spill] sm:$0xff]  ;;  %v14297_v53 = vpop.permute.xlu0 %4034 }
 0x24d   : > { %v10549_v5 = vcombine.high %v13850_v55, %v13887_v0  ;;  %v4326_v61 = vcombine.low %v14165_v27, %v14274_v12  ;;  %v3564_v43 = vcombine.low %v3542_v30, %v14105_v7  ;;  %v3486_v40 = vcombine.low %v13875_v33, %v13897_v26  ;;  %17123 = vst [vmem:[#allocation28_spill] sm:$0xff] %v14297_v53 }
 0x24e   : > { %v17121_v34 = vcombine.high %v17119_v35, %v17120_v51  ;;  %v3993_v31 = vcombine.low %v3985_v63, %v14278_v11  ;;  %v14301_v57 = vrot.slane %v3961_v14, %v11323_v28  ;;  %v3500_v27 = vrot.slane %v3484_v6, %v11323_v28 }
 0x24f   : > { %v3507_v7 = vrot.slane %v10549_v5, %v11323_v28  ;;  %v2476_v59 = vcombine.low %v17125_v2, %v17124_v9  ;;  %v14308_v62 = vrot.slane %v4326_v61, %v11323_v28  ;;  %v3514_v35 = vrot.slane %v3486_v40, %v11323_v28 }
 0x250   : > { %v3493_v39 = vrot.slane %v17121_v34, %v11323_v28  ;;  %v3572_v34 = vrot.slane %v3564_v43, %v11323_v28  ;;  %4046 = vrot.lane.b32.xlu0 %v3993_v31, %s11192_s29  ;;  %v4776_v53 = vcombine.low %v14301_v57, %v3985_v63  ;;  %v1888_v6 = vcombine.high %v13897_v26, %v13897_v26 }
 0x251   : > { %v4291_v50 = vcombine.low %v3500_v27, %v3507_v7  ;;  %v14317_v5 = vrot.slane %v2475_v18, %v11323_v28  ;;  %v3516_v2 = vcombine.low %v3507_v7, %v3514_v35  ;;  %v4292_v61 = vcombine.low %v3514_v35, %v3542_v30  ;;  %v14335_v35 = vpop.permute.xlu1 %4818 }
 0x252   : > { %v3515_v14 = vcombine.low %v3493_v39, %v3500_v27  ;;  %v3580_v9 = vcombine.low %v3572_v34, %v14174_v15  ;;  %4828 = vrot.lane.b32.xlu1 %v4776_v53, %s11192_s29  ;;  %v4341_v43 = vcombine.low %v14197_v8, %v14308_v62  ;;  %v2769_v39 = vcombine.low %v1888_v6, %v17094_v46  ;;  %v14337_v8 = vpop.permute.xlu0 %4382 }
 0x253   : > { %v17126_v63 = vcombine.high %v17094_v46, %v17094_v46  ;;  %v2490_v18 = vrot.slane %v2476_v59, %v11323_v28  ;;  %v3530_v15 = vrot.slane %v3516_v2, %v11323_v28  ;;  %v4299_v30 = vrot.slane %v4291_v50, %v11323_v28 }
 0x254   : > { %v3523_v31 = vrot.slane %v3515_v14, %v11323_v28  ;;  %v14333_v53 = vrot.slane %v4292_v61, %v11323_v28  ;;  %v14340_v27 = vrot.slane %v10563_v10, %v11323_v28  ;;  %4394 = vrot.lane.b32.xlu0 %v4341_v43, %s11194_s9  ;;  %v1886_v50 = vcombine.high %v13875_v33, %v13875_v33 }
 0x255   : > { %v2770_v40 = vcombine.low %v17093_v47, %v17126_v63  ;;  %v14344_v47 = vrot.slane %v2769_v39, %v11323_v28  ;;  %v2441_v59 = vrot.slane %v2427_v24, %v11323_v28  ;;  %v4619_v14 = vcombine.low %v3530_v15, %v3572_v34 }
 0x256   : > { %v3531_v7 = vcombine.low %v3523_v31, %v3530_v15  ;;  %v1887_v6 = vcombine.high %v13887_v0, %v13887_v0  ;;  %3696 = vrot.lane.b32.xlu1 %v3580_v9, %s11193_s8  ;;  %v17128_v2 = vcombine.high %v17120_v51, %v17120_v51  ;;  %v17129_v43 = vcombine.high %v13850_v55, %v13850_v55 }
 0x257   : > { %17127 = vst [vmem:[#allocation107_spill] sm:$0xff] %v14344_v47  ;;  %v14347_v46 = vrot.slane %v2770_v40, %v11323_v28  ;;  %v2768_v34 = vcombine.low %v13897_v26, %v1886_v50  ;;  %v2491_v31 = vcombine.low %v14317_v5, %v2490_v18  ;;  %v4307_v39 = vcombine.low %v4299_v30, %v14333_v53 }
 0x258   : > { %v2720_v61 = vcombine.low %v17128_v2, %v13850_v55  ;;  %v2721_v24 = vcombine.low %v13887_v0, %v17129_v43  ;;  %v2722_v9 = vcombine.low %v1887_v6, %v13875_v33  ;;  %v17130_v63 = vcombine.low %v13863_v25, %v13951_v16  ;;  %3694 = vrot.lane.b32.xlu0 %v3531_v7, %s11193_s8  ;;  %v14393_v7 = vpop.permute.xlu1 %4662  ;;  %v14395_v6 = vpop.permute.xlu0 %3688  ;;  %v17138_v43 = vld [vmem:[#allocation68_spill] sm:$0xff] }
 0x259   : > { %v3960_v10 = vcombine.low %v14344_v47, %v14347_v46  ;;  %v14384_v26 = vrot.slane %v2768_v34, %v11323_v28  ;;  %v2442_v33 = vcombine.low %v13853_v49, %v2441_v59  ;;  %v5973_v25 = vsel %vm5966_vm3, %v2491_v31, %v13882_v4  ;;  %v17139_v34 = vld [vmem:[#allocation121_spill] sm:$0xff] }
 0x25a   : > { %v3646_v40 = vrot.slane %v17130_v63, %v11323_v28  ;;  %v14378_v55 = vrot.slane %v2720_v61, %v11323_v28  ;;  %v14381_v0 = vrot.slane %v2721_v24, %v11323_v28  ;;  %v14390_v30 = vrot.slane %v2722_v9, %v11323_v28  ;;  %4390 = vrot.lane.b32.xlu1 %v4307_v39, %s11194_s9  ;;  %v17140_v39 = vld [vmem:[#allocation19_spill] sm:$0xff] }
 0x25b   : > { %v14375_v15 = vrot.slane %v3960_v10, %v11323_v28  ;;  %17133 = vst [vmem:[#allocation131_spill] sm:$0xff] %v14384_v26  ;;  %v4442_v10 = vcombine.low %v2441_v59, %v14317_v5  ;;  %v4443_v2 = vcombine.low %v2490_v18, %v14006_v37  ;;  %v4931_v4 = vcombine.low %v14333_v53, %v14154_v13 }
 0x25c   : > { %17131 = vst [vmem:[#allocation26_spill] sm:$0xff] %v14378_v55  ;;  %17132 = vst [vmem:[#allocation17_spill] sm:$0xff] %v14381_v0  ;;  %v3654_v50 = vcombine.low %v14274_v12, %v3646_v40  ;;  %v3943_v49 = vcombine.low %v14378_v55, %v14381_v0  ;;  %v6075_v12 = vsel %vm5983_vm5, %v14081_v20, %v13991_v22  ;;  %4670 = vrot.lane.b32.xlu0 %v4619_v14, %s11193_s8 }
 0x25d   : > { %17134 = vst [vmem:[#allocation132_spill] sm:$0xff] %v14390_v30  ;;  %v5990_v61 = vsel %vm5983_vm5, %v5973_v25, %v14091_v42  ;;  %v3944_v5 = vcombine.low %v14390_v30, %v14384_v26  ;;  %v3976_v18 = vcombine.low %v14375_v15, %v14301_v57  ;;  %v14420_v53 = vrot.slane %v13878_v56, %v11323_v28  ;;  %v17137_v42 = vld [vmem:[#allocation63_spill] sm:$0xff] }
 0x25e   : > { %v14412_v37 = vrot.slane %v3654_v50, %v11323_v28  ;;  %v3951_v13 = vrot.slane %v3943_v49, %v11323_v28  ;;  %v14424_v22 = vrot.slane %v13994_v32, %v11323_v28  ;;  %v5972_v59 = vsel %vm5966_vm3, %v2442_v33, %v17137_v42  ;;  %v17141_v33 = vld [vmem:[#allocation70_spill] sm:$0xff]  ;;  %v17142_v50 = vld [vmem:[#allocation73_spill] sm:$0xff] }
 0x25f   : > { %17135 = vst [vmem:[#allocation133_spill] sm:$0xff] %v14420_v53  ;;  %v6023_v24 = vsel %vm5966_vm3, %v4443_v2, %v17138_v43  ;;  %v3958_v14 = vrot.slane %v3944_v5, %v11323_v28  ;;  %v6022_v31 = vsel %vm5966_vm3, %v4442_v10, %v17139_v34  ;;  %4044 = vrot.lane.b32.xlu1 %v3976_v18, %s11192_s29  ;;  %v14451_v2 = vpop.permute.xlu1 %4974 }
 0x260   : > { %17136 = vst [vmem:[#allocation134_spill] sm:$0xff] %v14424_v22  ;;  %v4621_v57 = vcombine.low %v14194_v17, %v14412_v37  ;;  %v6039_v56 = vsel %vm5983_vm5, %v6023_v24, %v14143_v44  ;;  %v4002_v32 = vcombine.low %v14420_v53, %v14424_v22  ;;  %v5520_v9 = vcombine.low %v17082_v21, %v17140_v39  ;;  %v14453_v44 = vpop.permute.xlu0 %4036 }
 0x261   : > { %v6099_v63 = vsel %vm5983_vm5, %v14112_v3, %v14044_v29  ;;  %v6007_v17 = vsel %vm6000_vm8, %v5990_v61, %v17141_v33  ;;  %v3959_v25 = vcombine.low %v3951_v13, %v3958_v14  ;;  %v14449_v10 = vsel %vm6000_vm8, %v6075_v12, %v17142_v50  ;;  %v17143_v29 = vld [vmem:[#allocation32_spill] sm:$0xff] }
 0x262   : > { %v14457_v49 = vsel %vm6000_vm8, %v6099_v63, %v14093_v58  ;;  %v14460_v21 = vrot.slane %v4002_v32, %v11323_v28  ;;  %v5534_v3 = vrot.slane %v17143_v29, %v11323_v28  ;;  %v4350_v61 = vcombine.low %v3646_v40, %v14066_v45  ;;  %v17148_v63 = vld [vmem:[#allocation66_spill] sm:$0xff] }
 0x263   : > { %4042 = vrot.lane.b32.xlu0 %v3959_v25, %s11192_s29  ;;  %v6055_v12 = vsel %vm6000_vm8, %v6039_v56, %v14042_v41  ;;  %v3668_v5 = vrot.slane %v14066_v45, %v11323_v28  ;;  %v17144_v58 = vcombine.low %v13966_v1, %v13980_v23  ;;  %v17145_v13 = vcombine.high %v13966_v1, %v13980_v23  ;;  %v14518_v33 = vpop.permute.xlu1 %5704 }
 0x264   : > { %4674 = vrot.lane.b32.xlu1 %v4621_v57, %s11193_s8  ;;  %v5989_v41 = vsel %vm5983_vm5, %v5972_v59, %v14145_v60  ;;  %v14486_v40 = vrot.slane %v5520_v9, %v11323_v28  ;;  %v14489_v43 = vrot.slane %v4350_v61, %v11323_v28  ;;  %v6038_v24 = vsel %vm5983_vm5, %v6022_v31, %v14187_v48 }
 0x265   : > { %v14474_v18 = vrot.slane %v17144_v58, %v11323_v28  ;;  %v14480_v42 = vrot.slane %v17145_v13, %v11323_v28  ;;  %v4777_v34 = vcombine.low %v14278_v11, %v14460_v21  ;;  %v3669_v56 = vcombine.low %v14412_v37, %v3668_v5  ;;  %v17150_v5 = vld [vmem:[#allocation129_spill] sm:$0xff] }
 0x266   : > { %17146 = vst [vmem:[#allocation63_spill] sm:$0xff] %v14486_v40  ;;  %v6054_v60 = vsel %vm6000_vm8, %v6038_v24, %v14241_v54  ;;  %v5535_v59 = vcombine.low %v14486_v40, %v5534_v3  ;;  %v4933_v32 = vcombine.low %v14308_v62, %v14489_v43  ;;  %v2034_v48 = vcombine.high %v13951_v16, %v13951_v16  ;;  %v17149_v3 = vld [vmem:[#allocation25_spill] sm:$0xff]  ;;  %v17154_v24 = vld [vmem:[#allocation38_spill] sm:$0xff]  ;;  %v17171_v40 = vld [vmem:[#allocation24_spill] sm:$0xff] }
 0x267   : > { %v5198_v57 = vcombine.low %v14480_v42, %v14251_v52  ;;  %v4630_v39 = vcombine.low %v14066_v45, %v14474_v18  ;;  %v17147_v11 = vcombine.high %v14168_v19, %v14168_v19  ;;  %v7734_v54 = vcombine.low %v14449_v10, %v14457_v49  ;;  %4982 = vrot.lane.b32.xlu0 %v4931_v4, %s11194_s9  ;;  %v14520_v45 = vpop.permute.xlu0 %3686 }
 0x268   : > { %v7695_v9 = vcombine.low %v6007_v17, %v6055_v12  ;;  %v6006_v62 = vsel %vm6000_vm8, %v5989_v41, %v17148_v63  ;;  %v7696_v16 = vcombine.high %v6007_v17, %v6055_v12  ;;  %4830 = vrot.lane.b32.xlu1 %v4777_v34, %s11192_s29  ;;  %v6092_v19 = vsel %vm5966_vm3, %v5535_v59, %v14185_v38  ;;  %v17152_v41 = vld [vmem:[#allocation22_spill] sm:$0xff] }
 0x269   : > { %v14511_v31 = vcombine.low %v17147_v11, %v14159_v36  ;;  %v7661_v25 = vcombine.low %v6006_v62, %v6054_v60  ;;  %v3994_v50 = vcombine.low %v2034_v48, %v13966_v1  ;;  %v4775_v4 = vcombine.low %v3958_v14, %v14375_v15  ;;  %v17153_v14 = vld [vmem:[#allocation57_spill] sm:$0xff] }
 0x26a   : > { %v6100_v58 = vsel %vm5983_vm5, %v6092_v19, %v17150_v5  ;;  %v7662_v13 = vcombine.high %v6006_v62, %v6054_v60  ;;  %v17151_v17 = vcombine.high %v14159_v36, %v14159_v36  ;;  %v14538_v38 = vrot.slane %v4630_v39, %v11323_v28  ;;  %v17155_v60 = vld [vmem:[#allocation23_spill] sm:$0xff] }
 0x26b   : > { %v14542_v1 = vsel %vm6000_vm8, %v6100_v58, %v17152_v41  ;;  %v5446_v15 = vcombine.low %v14251_v52, %v14340_v27  ;;  %v14549_v34 = vsel %vm6000_vm8, %v17154_v24, %v17153_v14  ;;  %v14552_v59 = vrot.slane %v7734_v54, %v17155_v60  ;;  %4826 = vrot.lane.b32.xlu0 %v4775_v4, %s11192_s29  ;;  %v17164_v14 = vld [vmem:[#allocation94_spill] sm:$0xff]  ;;  %v17165_v24 = vld [vmem:[#allocation93_spill] sm:$0xff] }
 0x26c   : > { %v14535_v12 = vcombine.low %v17149_v3, %v17151_v17  ;;  %v14556_v39 = vrot.slane %v5198_v57, %v11323_v28  ;;  %v14559_v48 = vrot.slane %v3994_v50, %v11323_v28  ;;  %v14562_v11 = vrot.slane %v7695_v9, %v17155_v60  ;;  %4986 = vrot.lane.b32.xlu1 %v4933_v32, %s11194_s9  ;;  %v14582_v50 = vpop.permute.xlu1 %5828  ;;  %v14584_v32 = vpop.permute.xlu0 %4384  ;;  %v17163_v17 = vld [vmem:[#allocation90_spill] sm:$0xff]  ;;  %v17166_v9 = vld [vmem:[#allocation64_spill] sm:$0xff] }
 0x26d   : > { %17156 = vst [vmem:[#allocation68_spill] sm:$0xff] %v14552_v59  ;;  %v14565_v63 = vrot.slane %v7696_v16, %v17155_v60  ;;  %v14569_v62 = vrot.slane %v7661_v25, %v17155_v60  ;;  %v4942_v54 = vcombine.low %v14474_v18, %v14480_v42  ;;  %v14576_v19 = vrot.slane %v7662_v13, %v17155_v60  ;;  %v17162_v13 = vld [vmem:[#allocation92_spill] sm:$0xff] }
 0x26e   : > { %17157 = vst [vmem:[#allocation121_spill] sm:$0xff] %v14556_v39  ;;  %17158 = vst [vmem:[#allocation19_spill] sm:$0xff] %v14559_v48  ;;  %v5669_v57 = vcombine.low %v14538_v38, %v14556_v39  ;;  %v4016_v16 = vrot.slane %v14559_v48, %v11323_v28  ;;  %v14587_v25 = vrot.slane %v5446_v15, %v11323_v28 }
 0x26f   : > { %17159 = vst [vmem:[#allocation70_spill] sm:$0xff] %v14562_v11  ;;  %17160 = vst [vmem:[#allocation73_spill] sm:$0xff] %v14565_v63  ;;  %v4364_v4 = vrot.slane %v14474_v18, %v11323_v28  ;;  %v4644_v5 = vrot.slane %v14480_v42, %v11323_v28  ;;  %v5189_v58 = vcombine.low %v14412_v37, %v14538_v38  ;;  %3700 = vrot.lane.b32.xlu0 %v3669_v56, %s11193_s8  ;;  %v17168_v37 = vld [vmem:[#allocation35_spill] sm:$0xff] }
 0x270   : > { %17161 = vst [vmem:[#allocation66_spill] sm:$0xff] %v14587_v25  ;;  %v2565_v41 = vcombine.low %v17163_v17, %v17162_v13  ;;  %v2613_v61 = vcombine.low %v17165_v24, %v17164_v14  ;;  %v2035_v15 = vcombine.high %v13980_v23, %v13980_v23  ;;  %v14604_v18 = vrot.slane %v17166_v9, %v11323_v28  ;;  %v17169_v13 = vld [vmem:[#allocation54_spill] sm:$0xff] }
 0x271   : > { %5706 = vrot.lane.b32.xlu1 %v5669_v57, %s11193_s8  ;;  %v14608_v42 = vrot.slane %v4942_v54, %v11323_v28  ;;  %v8430_v56 = vrot.slane %v17168_v37, %v17155_v60  ;;  %v8444_v17 = vrot.slane %v17169_v13, %v17155_v60  ;;  %v17170_v14 = vld [vmem:[#allocation10_spill] sm:$0xff]  ;;  %v4017_v9 = vcombine.low %v14460_v21, %v4016_v16  ;;  %v17172_v13 = vld [vmem:[#allocation51_spill] sm:$0xff] }
 0x272   : > { %17167 = vst [vmem:[#allocation25_spill] sm:$0xff] %v14604_v18  ;;  %v10581_v24 = vcombine.low %v17170_v14, %v14569_v62  ;;  %v4778_v29 = vcombine.low %v2035_v15, %v17171_v40  ;;  %v4786_v54 = vcombine.low %v14559_v48, %v14604_v18  ;;  %v4365_v37 = vcombine.low %v14489_v43, %v4364_v4  ;;  %v14639_v18 = vpop.permute.xlu1 %3690  ;;  %v14641_v4 = vpop.permute.xlu0 %5348 }
 0x273   : > { %v5917_v57 = vcombine.low %v14608_v42, %v14587_v25  ;;  %v8543_v20 = vrot.slane %v17172_v13, %v17155_v60  ;;  %4048 = vrot.lane.b32.xlu0 %v4017_v9, %s11192_s29  ;;  %v4645_v23 = vcombine.low %v14538_v38, %v4644_v5  ;;  %v14631_v16 = vrot.slane %v2565_v41, %v11323_v28  ;;  %v17177_v41 = vld [vmem:[#allocation95_spill] sm:$0xff] }
 0x274   : > { %v8557_v14 = vrot.slane %v10581_v24, %v17155_v60  ;;  %v14634_v40 = vrot.slane %v2613_v61, %v11323_v28  ;;  %v14637_v15 = vrot.slane %v4778_v29, %v11323_v28  ;;  %v14644_v24 = vcombine.high %v8430_v56, %v8444_v17  ;;  %v17176_v29 = vld [vmem:[#allocation96_spill] sm:$0xff] }
 0x275   : > { %5954 = vrot.lane.b32.xlu1 %v5917_v57, %s11194_s9  ;;  %v14646_v13 = vcombine.low %v8430_v56, %v8444_v17  ;;  %v14649_v5 = vrot.slane %v4786_v54, %v11323_v28  ;;  %v2614_v48 = vcombine.low %v17177_v41, %v17176_v29  ;;  %v4956_v22 = vrot.slane %v14251_v52, %v11323_v28  ;;  %v17178_v56 = vld [vmem:[#allocation112_spill] sm:$0xff] }
 0x276   : > { %17173 = vst [vmem:[#allocation129_spill] sm:$0xff] %v14637_v15  ;;  %17174 = vst [vmem:[#allocation22_spill] sm:$0xff] %v14644_v24  ;;  %v8561_v9 = vcombine.high %v8543_v20, %v8557_v14  ;;  %v8560_v38 = vcombine.low %v8543_v20, %v8557_v14  ;;  %v4800_v61 = vrot.slane %v14637_v15, %v11323_v28  ;;  %v17179_v20 = vld [vmem:[#allocation80_spill] sm:$0xff] }
 0x277   : > { %17175 = vst [vmem:[#allocation57_spill] sm:$0xff] %v14646_v13  ;;  %v7692_v17 = vcombine.high %v17178_v56, %v14569_v62  ;;  %v7694_v54 = vcombine.high %v17179_v20, %v14576_v19  ;;  %4396 = vrot.lane.b32.xlu0 %v4365_v37, %s11194_s9  ;;  %v4957_v55 = vcombine.low %v14608_v42, %v4956_v22 }
 0x278   : > { %v9493_v57 = vpack.c.bf16 %v8561_v9, %v14644_v24  ;;  %v9492_v53 = vpack.c.bf16 %v8560_v38, %v14646_v13  ;;  %v4801_v14 = vcombine.low %v14649_v5, %v4800_v61  ;;  %v7731_v29 = vcombine.high %v14569_v62, %v14562_v11 }
 0x279   : > { %v7733_v52 = vcombine.high %v14576_v19, %v14565_v63  ;;  %4676 = vrot.lane.b32.xlu1 %v4645_v23, %s11193_s8  ;;  %v10584_v9 = vcombine.low %v7692_v17, %v17179_v20  ;;  %v10586_v38 = vcombine.low %v7694_v54, %v14569_v62  ;;  %v7693_v37 = vcombine.low %v17179_v20, %v14576_v19  ;;  %v14681_v23 = vpop.permute.xlu1 %4038 }
 0x27a   : > { %10017 = vmatprep.mubr.bf16.mxu0 %v9493_v57  ;;  %v10592_v61 = vcombine.low %v7731_v29, %v14576_v19  ;;  %v7730_v41 = vcombine.low %v14569_v62, %v14562_v11  ;;  %v7732_v56 = vcombine.low %v14576_v19, %v14565_v63  ;;  %v14683_v57 = vpop.permute.xlu0 %4664 }
 0x27b   : > { %10018 = vmatmul.mubr.bf16.gmra.mrb[32].mxu0 %v9492_v53  ;;  %v10594_v22 = vcombine.low %v7733_v52, %v14562_v11  ;;  %v8607_v17 = vrot.slane %v10584_v9, %v17155_v60  ;;  %v8621_v54 = vrot.slane %v10586_v38, %v17155_v60  ;;  %v7769_v53 = vcombine.low %v14562_v11, %v14552_v59 }
 0x27c   : > { %v10585_v20 = vcombine.high %v14569_v62, %v7693_v37  ;;  %5226 = vrot.lane.b32.xlu0 %v5189_v58, %s11193_s8  ;;  %v8678_v29 = vrot.slane %v10592_v61, %v17155_v60  ;;  %v10587_v13 = vcombine.high %v14576_v19, %v7730_v41  ;;  %v10593_v24 = vcombine.high %v14562_v11, %v7732_v56 }
 0x27d   : > { %v8692_v52 = vrot.slane %v10594_v22, %v17155_v60  ;;  %4832 = vrot.lane.b32.xlu1 %v4801_v14, %s11192_s29  ;;  %v5313_v9 = vcombine.low %v14460_v21, %v14649_v5  ;;  %v8630_v38 = vcombine.high %v8607_v17, %v8621_v54  ;;  %v10595_v62 = vcombine.high %v14565_v63, %v7769_v53 }
 0x27e   : > { %v8614_v0 = vrot.slane %v10585_v20, %v17155_v60  ;;  %v8628_v58 = vrot.slane %v10587_v13, %v17155_v60  ;;  %v8685_v61 = vrot.slane %v10593_v24, %v17155_v60  ;;  %v8629_v22 = vcombine.low %v8607_v17, %v8621_v54  ;;  %v17181_v17 = vld [vmem:[#allocation125_spill] sm:$0xff]  ;;  %v14719_v20 = vpop.permute.xlu1 %4822 }
 0x27f   : > { %v8701_v37 = vcombine.high %v8678_v29, %v8692_v52  ;;  %v17180_v19 = vcombine.low %v14549_v34, %v14542_v1  ;;  %v4468_v21 = vcombine.low %v14631_v16, %v14634_v40  ;;  %v8699_v14 = vrot.slane %v10595_v62, %v17155_v60 }
 0x280   : > { %v8700_v56 = vcombine.low %v8678_v29, %v8692_v52  ;;  %v14712_v53 = vrot.slane %v2614_v48, %v11323_v28  ;;  %5350 = vrot.lane.b32.xlu0 %v5313_v9, %s11192_s29  ;;  %v8632_v24 = vcombine.high %v8614_v0, %v8628_v58  ;;  %v14717_v54 = vrot.slane %v17181_v17, %v11323_v28  ;;  %v17183_v29 = vld [vmem:[#allocation29_spill] sm:$0xff]  ;;  %v17184_v52 = vld [vmem:[#allocation76_spill] sm:$0xff] }
 0x281   : > { %v14706_v41 = vrot.slane %v17180_v19, %v17155_v60  ;;  %v9498_v13 = vpack.c.bf16 %v8701_v37, %v8630_v38  ;;  %v14721_v19 = vpop.permute.xlu0 %4820  ;;  %4988 = vrot.lane.b32.xlu1 %v4957_v55, %s11194_s9  ;;  %v8703_v30 = vcombine.high %v8685_v61, %v8699_v14  ;;  %v5437_v48 = vcombine.low %v14489_v43, %v14608_v42 }
 0x282   : > { %17182 = vst [vmem:[#allocation38_spill] sm:$0xff] %v14717_v54  ;;  %v9497_v62 = vpack.c.bf16 %v8700_v56, %v8629_v22  ;;  %v10533_v9 = vcombine.high %v17184_v52, %v17183_v29  ;;  %v5322_v38 = vcombine.low %v14637_v15, %v14717_v54  ;;  %v5212_v37 = vrot.slane %v14340_v27, %v11323_v28  ;;  %v11104_v56 = vld [vmem:[%s16509_s3 + $0x140] sm:$0xff]  }
 0x283   : > { %9929 = vmatprep.mubr.bf16.mxu1 %v9498_v13  ;;  %v8631_v17 = vcombine.low %v8614_v0, %v8628_v58  ;;  %v8702_v26 = vcombine.low %v8685_v61, %v8699_v14  ;;  %v7735_v55 = vcombine.high %v14449_v10, %v14457_v49  ;;  %v9500_v47 = vpack.c.bf16 %v8703_v30, %v8632_v24  ;;  %v17188_v24 = vld [vmem:[#allocation77_spill] sm:$0xff] }
 0x284   : > { %9930 = vmatmul.mubr.bf16.gmra.mrb[8].mxu1 %v9497_v62  ;;  %v2542_v22 = vrot.slane %v10533_v9, %v11323_v28  ;;  %v17185_v43 = vcombine.low %v14159_v36, %v17149_v3  ;;  %v6025_v0 = vsel %vm5966_vm3, %v4468_v21, %v14393_v7  ;;  %5474 = vrot.lane.b32.xlu0 %v5437_v48, %s11194_s9  ;;  %v17189_v7 = vld [vmem:[#allocation89_spill] sm:$0xff]  ;;  %v14774_v9 = vpop.permute.xlu1 %5952 }
 0x285   : > { %v14748_v30 = vrot.slane %v5322_v38, %v11323_v28  ;;  %v9499_v58 = vpack.c.bf16 %v8702_v26, %v8631_v17  ;;  %v10567_v61 = vcombine.high %v14159_v36, %v17149_v3  ;;  %v17187_v14 = vcombine.high %v14549_v34, %v14542_v1  ;;  %10025 = vmatprep.mubr.bf16.mxu0 %v9500_v47  ;;  %v11105_v26 = vld [vmem:[%s16509_s3 + $0x100] sm:$0xff]   ;;  %v14776_v38 = vpop.permute.xlu0 %5472 }
 0x286   : > { %v14739_v42 = vrot.slane %v17185_v43, %v11323_v28  ;;  %v7841_v62 = vcombine.high %v17188_v24, %v14706_v41  ;;  %v2564_v21 = vcombine.low %v2542_v22, %v17189_v7  ;;  %v2629_v36 = vcombine.low %v14634_v40, %v14712_v53  ;;  %10853 = vmatprep.subr.bf16.mxu1 %v11104_v56  ;;  %v11107_v7 = vld [vmem:[%s16509_s3 + $0x108] sm:$0xff]  }
 0x287   : > { %17186 = vst [vmem:[#allocation23_spill] sm:$0xff] %v14748_v30  ;;  %v14756_v13 = vrot.slane %v17187_v14, %v17155_v60  ;;  %v5793_v1 = vcombine.low %v14649_v5, %v14748_v30  ;;  %v5213_v34 = vcombine.low %v14556_v39, %v5212_v37  ;;  %10026 = vmatmul.mubr.bf16.gmra.mrb[36].mxu0 %v9499_v58  ;;  %v17192_v58 = vld [vmem:[#allocation113_spill] sm:$0xff] }
 0x288   : > { %v5678_v48 = vcombine.low %v14340_v27, %v14739_v42  ;;  %v14772_v47 = vrot.slane %v10567_v61, %v11323_v28  ;;  %v11106_v27 = vld [vmem:[%s16509_s3 + $0x148] sm:$0xff]   ;;  %v6041_v40 = vsel %vm5983_vm5, %v6025_v0, %v14335_v35  ;;  %v2572_v17 = vrot.slane %v2564_v21, %v11323_v28  ;;  %10854 = vmatpush3.bf16.msra.mxu1 %v11105_v26  ;;  %v17198_v26 = vld [vmem:[#allocation84_spill] sm:$0xff] }
 0x289   : > { %v5460_v37 = vrot.slane %v14739_v42, %v11323_v28  ;;  %v14791_v22 = vsel %vm6000_vm8, %v6041_v40, %v14451_v2  ;;  %5830 = vrot.lane.b32.xlu1 %v5793_v1, %s11192_s29  ;;  %5228 = vrot.lane.b32.xlu0 %v5213_v34, %s11193_s8  ;;  %v2084_v43 = vcombine.high %v17149_v3, %v17149_v3  ;;  %v17193_v61 = vld [vmem:[#allocation97_spill] sm:$0xff]  ;;  %v17197_v1 = vld [vmem:[#allocation124_spill] sm:$0xff]  ;;  %v17199_v40 = vld [vmem:[#allocation114_spill] sm:$0xff] }
 0x28a   : > { %17190 = vst [vmem:[#allocation92_spill] sm:$0xff] %v14772_v47  ;;  %v14785_v5 = vrot.slane %v5678_v48, %v11323_v28  ;;  %v5692_v35 = vrot.slane %v14772_v47, %v11323_v28  ;;  %v2580_v0 = vcombine.low %v2572_v17, %v14631_v16  ;;  %v2662_v14 = vcombine.low %v17193_v61, %v17192_v58  ;;  %v17196_v16 = vld [vmem:[#allocation122_spill] sm:$0xff]  ;;  %v17212_v54 = vld [vmem:[#allocation101_spill] sm:$0xff] }
 0x28b   : > { %v5461_v56 = vcombine.low %v14587_v25, %v5460_v37  ;;  %v14805_v2 = vrot.slane %v14511_v31, %v11323_v28  ;;  %v14813_v3 = vrot.slane %v14535_v12, %v11323_v28  ;;  %v5794_v48 = vcombine.low %v2084_v43, %v17196_v16  ;;  %10855 = vmatprep.subr.bf16.mxu1 %v11106_v27  ;;  %v17200_v12 = vld [vmem:[#allocation28_spill] sm:$0xff]  ;;  %v14835_v43 = vpop.permute.xlu1 %4666 }
 0x28c   : > { %17191 = vst [vmem:[#allocation90_spill] sm:$0xff] %v14785_v5  ;;  %v5693_v21 = vcombine.low %v14785_v5, %v5692_v35  ;;  %v5918_v34 = vcombine.low %v17196_v16, %v17197_v1  ;;  %v5975_v31 = vsel %vm5966_vm3, %v2580_v0, %v14520_v45  ;;  %v2663_v17 = vcombine.low %v17199_v40, %v17198_v26  ;;  %v14837_v0 = vpop.permute.xlu0 %4976 }
 0x28d   : > { %17194 = vst [vmem:[#allocation94_spill] sm:$0xff] %v14805_v2  ;;  %17195 = vst [vmem:[#allocation93_spill] sm:$0xff] %v14813_v3  ;;  %v5336_v37 = vrot.slane %v14805_v2, %v11323_v28  ;;  %v5926_v35 = vcombine.low %v14739_v42, %v14772_v47  ;;  %v5992_v58 = vsel %vm5983_vm5, %v5975_v31, %v17200_v12  ;;  %5476 = vrot.lane.b32.xlu0 %v5461_v56, %s11194_s9 }
 0x28e   : > { %5708 = vrot.lane.b32.xlu1 %v5693_v21, %s11193_s8  ;;  %v14831_v27 = vrot.slane %v5794_v48, %v11323_v28  ;;  %v5802_v45 = vcombine.low %v14805_v2, %v14813_v3  ;;  %v5976_v42 = vsel %vm5966_vm3, %v2629_v36, %v14395_v6  ;;  %v14843_v61 = vsel %vm6000_vm8, %v5992_v58, %v14337_v8  ;;  %v11108_v8 = vld [vmem:[%s16509_s3 + $0x150] sm:$0xff]  }
 0x28f   : > { %v2670_v21 = vrot.slane %v2662_v14, %v11323_v28  ;;  %v5337_v56 = vcombine.low %v14748_v30, %v5336_v37  ;;  %10856 = vmatpush3.bf16.msra.mxu1 %v11107_v7  ;;  %v7877_v48 = vcombine.low %v14843_v61, %v14791_v22  ;;  %v14855_v6 = vrot.slane %v5918_v34, %v11323_v28  ;;  %v17205_v14 = vld [vmem:[#allocation104_spill] sm:$0xff]  ;;  %v11109_v34 = vld [vmem:[%s16509_s3 + $0x110] sm:$0xff]  }
 0x290   : > { %17201 = vst [vmem:[#allocation64_spill] sm:$0xff] %v14831_v27  ;;  %v14850_v31 = vrot.slane %v5802_v45, %v11323_v28  ;;  %v5816_v26 = vrot.slane %v14831_v27, %v11323_v28  ;;  %v14864_v36 = vrot.slane %v7735_v55, %v17155_v60  ;;  %v5993_v40 = vsel %vm5983_vm5, %v5976_v42, %v14453_v44  ;;  %v17207_v55 = vld [vmem:[#allocation56_spill] sm:$0xff]  ;;  %v17211_v7 = vld [vmem:[#allocation50_spill] sm:$0xff]  ;;  %v14899_v2 = vpop.permute.xlu0 %4040 }
 0x291   : > { %17203 = vst [vmem:[#allocation54_spill] sm:$0xff] %v14855_v6  ;;  %v2677_v37 = vrot.slane %v2663_v17, %v11323_v28  ;;  %v7887_v12 = vrot.slane %v7877_v48, %v17155_v60  ;;  %5352 = vrot.lane.b32.xlu0 %v5337_v56, %s11192_s29  ;;  %v14878_v10 = vrot.slane %v5926_v35, %v11323_v28  ;;  %v17208_v17 = vld [vmem:[#allocation45_spill] sm:$0xff] }
 0x292   : > { %17202 = vst [vmem:[#allocation35_spill] sm:$0xff] %v14850_v31  ;;  %17204 = vst [vmem:[#allocation10_spill] sm:$0xff] %v14864_v36  ;;  %v5817_v58 = vcombine.low %v14850_v31, %v5816_v26  ;;  %v5940_v49 = vrot.slane %v14855_v6, %v11323_v28  ;;  %v4469_v44 = vcombine.low %v14712_v53, %v2670_v21  ;;  %10857 = vmatprep.subr.bf16.mxu1 %v11108_v8  ;;  %v17209_v53 = vld [vmem:[#allocation15_spill] sm:$0xff]  ;;  %v17213_v8 = vld [vmem:[#allocation110_spill] sm:$0xff] }
 0x293   : > { %17206 = vst [vmem:[#allocation24_spill] sm:$0xff] %v14878_v10  ;;  %v6701_v45 = vcombine.low %v17208_v17, %v17207_v55  ;;  %v7770_v42 = vcombine.high %v14562_v11, %v14552_v59  ;;  %v7772_v48 = vcombine.high %v14565_v63, %v14864_v36  ;;  %v10608_v35 = vcombine.low %v7841_v62, %v17205_v14  ;;  %v17210_v17 = vld [vmem:[#allocation58_spill] sm:$0xff]  ;;  %v4387_v11 = vpop.permute.xlu1 %4386 }
 0x294   : > { %5832 = vrot.lane.b32.xlu1 %v5817_v58, %s11192_s29  ;;  %v8834_v56 = vrot.slane %v7887_v12, %v17155_v60  ;;  %v1152_v26 = vcombine.high %v17209_v53, %v17209_v53  ;;  %v6958_v3 = vcombine.low %v17211_v7, %v17210_v17  ;;  %v5545_v15 = vcombine.low %v17213_v8, %v17212_v54  ;;  %v17214_v53 = vld [vmem:[#allocation14_spill] sm:$0xff]  ;;  %v11110_v54 = vld [vmem:[%s16509_s3 + $0x158] sm:$0xff]  }
 0x295   : > { %v2678_v58 = vcombine.low %v2670_v21, %v2677_v37  ;;  %v10600_v27 = vcombine.low %v7770_v42, %v14565_v63  ;;  %v10602_v25 = vcombine.low %v7772_v48, %v17188_v24  ;;  %10858 = vmatpush3.bf16.msra.mxu1 %v11109_v34  ;;  %v5941_v62 = vcombine.low %v14878_v10, %v5940_v49  ;;  %v17215_v49 = vld [vmem:[#allocation115_spill] sm:$0xff]  ;;  %v17216_v48 = vld [vmem:[#allocation116_spill] sm:$0xff]  ;;  %v17219_v10 = vld [vmem:[#allocation42_spill] sm:$0xff] }
 0x296   : > { %v6026_v12 = vsel %vm5966_vm3, %v4469_v44, %v14683_v57  ;;  %6801 = vrot.lane.b32.xlu0 %v6701_v45, %s11193_s8  ;;  %v8820_v7 = vrot.slane %v10608_v35, %v17155_v60  ;;  %v6950_v30 = vcombine.low %v1152_v26, %v17214_v53  ;;  %v6965_v34 = vrot.slane %v6958_v3, %v11323_v28  ;;  %v11111_v45 = vld [vmem:[%s16509_s3 + $0x118] sm:$0xff]  }
 0x297   : > { %v8749_v21 = vrot.slane %v10600_v27, %v17155_v60  ;;  %v8763_v42 = vrot.slane %v10602_v25, %v17155_v60  ;;  %v17217_v57 = vcombine.low %v17215_v49, %v17216_v48  ;;  %v17218_v25 = vld [vmem:[#allocation36_spill] sm:$0xff]  ;;  %v6042_v31 = vsel %vm5983_vm5, %v6026_v12, %v14721_v19  ;;  %10859 = vmatprep.subr.bf16.mxu1 %v11110_v54  ;;  %v14949_v19 = vpop.permute.xlu0 %3692 }
 0x298   : > { %5956 = vrot.lane.b32.xlu1 %v5941_v62, %s11194_s9  ;;  %v8843_v35 = vcombine.high %v8820_v7, %v8834_v56  ;;  %v8842_v26 = vcombine.low %v8820_v7, %v8834_v56  ;;  %v14928_v27 = vrot.slane %v6950_v30, %v11323_v28  ;;  %v6345_v3 = vcombine.low %v17219_v10, %v17218_v25  ;;  %v11112_v49 = vld [vmem:[%s16509_s3 + $0x160] sm:$0xff]   ;;  %v4979_v7 = vpop.permute.xlu1 %4978 }
 0x299   : > { %v14921_v44 = vrot.slane %v17217_v57, %v11323_v28  ;;  %v8772_v48 = vcombine.high %v8749_v21, %v8763_v42  ;;  %v8771_v57 = vcombine.low %v8749_v21, %v8763_v42  ;;  %v14940_v56 = vsel %vm6000_vm8, %v5993_v40, %v14584_v32  ;;  %10860 = vmatpush3.bf16.msra.mxu1 %v11111_v45 }
 0x29a   : > { %v5977_v30 = vsel %vm5966_vm3, %v2678_v58, %v14639_v18  ;;  %v6972_v10 = vrot.slane %v14928_v27, %v11323_v28  ;;  %6445 = vrot.lane.b32.xlu0 %v6345_v3, %s11192_s29  ;;  %v6058_v62 = vsel %vm6000_vm8, %v6042_v31, %v14837_v0  ;;  %v17220_v18 = vld [vmem:[#allocation103_spill] sm:$0xff]  ;;  %10861 = vmatprep.subr.bf16.mxu1 %v11112_v49  ;;  %v11113_v31 = vld [vmem:[%s16509_s3 + $0x120] sm:$0xff]  }
 0x29b   : > { %v4470_v39 = vcombine.low %v2677_v37, %v14921_v44  ;;  %v9505_v37 = vpack.c.bf16 %v8843_v35, %v8772_v48  ;;  %v9504_v12 = vpack.c.bf16 %v8842_v26, %v8771_v57  ;;  %v7879_v40 = vcombine.low %v14940_v56, %v6058_v62  ;;  %v17227_v49 = vld [vmem:[#allocation88_spill] sm:$0xff]  ;;  %v17228_v48 = vld [vmem:[#allocation27_spill] sm:$0xff] }
 0x29c   : > { %v5559_v58 = vrot.slane %v17220_v18, %v11323_v28  ;;  %v5994_v54 = vsel %vm5983_vm5, %v5977_v30, %v14681_v23  ;;  %v6973_v21 = vcombine.low %v6965_v34, %v6972_v10  ;;  %v17223_v23 = vld [vmem:[#allocation65_spill] sm:$0xff]  ;;  %v14976_v3 = vrot.slane %v5545_v15, %v11323_v28  ;;  %v14983_v30 = vpop.permute.xlu0 %4388 }
 0x29d   : > { %v6027_v32 = vsel %vm5966_vm3, %v4470_v39, %v14835_v43  ;;  %9937 = vmatprep.mubr.bf16.mxu1 %v9505_v37  ;;  %v17221_v39 = vld [vmem:[#allocation48_spill] sm:$0xff]  ;;  %v17222_v43 = vld [vmem:[#allocation41_spill] sm:$0xff]  ;;  %v14966_v45 = vsel %vm6000_vm8, %v5994_v54, %v4387_v11  ;;  %v6255_v57 = vcombine.low %v17228_v48, %v17227_v49  ;;  %v7878_v15 = vcombine.high %v14843_v61, %v14791_v22 }
 0x29e   : > { %v6043_v0 = vsel %vm5983_vm5, %v6027_v32, %v14719_v20  ;;  %v6469_v42 = vcombine.low %v17222_v43, %v17221_v39  ;;  %v17224_v34 = vld [vmem:[#allocation69_spill] sm:$0xff]  ;;  %17226 = vst [vmem:[#allocation51_spill] sm:$0xff] %v14976_v3  ;;  %9938 = vmatmul.mubr.bf16.gmra.mrb[12].mxu1 %v9504_v12  ;;  %7051 = vrot.lane.b32.xlu1 %v6973_v21, %s11194_s9  ;;  %v17234_v22 = vld [vmem:[#allocation60_spill] sm:$0xff]  ;;  %v17242_v43 = vld [vmem:[#allocation87_spill] sm:$0xff] }
 0x29f   : > { %v14969_v35 = vsel %vm6000_vm8, %v6043_v0, %v4979_v7  ;;  %v17225_v26 = vcombine.high %v17224_v34, %v17224_v34  ;;  %v11114_v10 = vld [vmem:[%s16509_s3 + $0x168] sm:$0xff]   ;;  %v17229_v7 = vld [vmem:[#allocation44_spill] sm:$0xff]  ;;  %v7901_v12 = vrot.slane %v7879_v40, %v17155_v60  ;;  %v7840_v34 = vcombine.low %v17188_v24, %v14706_v41  ;;  %10862 = vmatpush3.bf16.msra.mxu1 %v11113_v31  ;;  %v17237_v24 = vld [vmem:[#allocation43_spill] sm:$0xff] }
 0x2a0   : > { %v7913_v11 = vcombine.low %v14966_v45, %v14969_v35  ;;  %6569 = vrot.lane.b32.xlu0 %v6469_v42, %s11194_s9  ;;  %v17231_v54 = vcombine.high %v17229_v7, %v17229_v7  ;;  %v17233_v0 = vld [vmem:[#allocation117_spill] sm:$0xff]  ;;  %v6825_v61 = vcombine.low %v17218_v25, %v17234_v22  ;;  %v7880_v48 = vcombine.high %v14940_v56, %v6058_v62  ;;  %v15023_v25 = vpop.permute.xlu1 %4668  ;;  %v11116_v31 = vld [vmem:[%s16509_s3 + $0x170] sm:$0xff]  }
 0x2a1   : > { %v6139_v20 = vcombine.low %v17225_v26, %v17223_v23  ;;  %v11115_v40 = vld [vmem:[%s16509_s3 + $0x128] sm:$0xff]   ;;  %v15014_v42 = vrot.slane %v17233_v0, %v11323_v28  ;;  %v17236_v26 = vcombine.low %v17205_v14, %v14756_v13  ;;  %10863 = vmatprep.subr.bf16.mxu1 %v11114_v10  ;;  %v15029_v22 = vcombine.low %v14976_v3, %v5559_v58  ;;  %v17239_v14 = vld [vmem:[#allocation67_spill] sm:$0xff]  ;;  %v17243_v3 = vld [vmem:[#allocation12_spill] sm:$0xff] }
 0x2a2   : > { %v15001_v21 = vrot.slane %v17231_v54, %v17155_v60  ;;  %v17238_v54 = vld [vmem:[#allocation61_spill] sm:$0xff]  ;;  %6925 = vrot.lane.b32.xlu1 %v6825_v61, %s11192_s29  ;;  %v15033_v13 = vrot.slane %v6255_v57, %v11323_v28  ;;  %v6247_v56 = vcombine.low %v17223_v23, %v17239_v14  ;;  %v7894_v62 = vrot.slane %v7878_v15, %v17155_v60  ;;  %v17240_v58 = vld [vmem:[#allocation86_spill] sm:$0xff]  ;;  %v15047_v57 = vpop.permute.xlu0 %5222 }
 0x2a3   : > { %v14995_v32 = vrot.slane %v6139_v20, %v11323_v28  ;;  %17235 = vst [vmem:[#allocation112_spill] sm:$0xff] %v15014_v42  ;;  %v10609_v20 = vcombine.high %v14706_v41, %v17236_v26  ;;  %v6246_v37 = vcombine.low %v17238_v54, %v17237_v24  ;;  %v7922_v41 = vrot.slane %v7913_v11, %v17155_v60  ;;  %v17241_v54 = vld [vmem:[#allocation55_spill] sm:$0xff] }
 0x2a4   : > { %17232 = vst [vmem:[#allocation95_spill] sm:$0xff] %v15001_v21  ;;  %v15040_v10 = vrot.slane %v7901_v12, %v17155_v60  ;;  %v7771_v61 = vcombine.low %v14565_v63, %v14864_v36  ;;  %v6949_v11 = vcombine.low %v17221_v39, %v17241_v54  ;;  %v6370_v18 = vcombine.low %v17243_v3, %v17242_v43  ;;  %v15061_v7 = vpop.permute.xlu1 %4824  ;;  %v11118_v3 = vld [vmem:[%s16509_s3 + $0x178] sm:$0xff]  }
 0x2a5   : > { %17230 = vst [vmem:[#allocation96_spill] sm:$0xff] %v14995_v32  ;;  %6325 = vrot.lane.b32.xlu0 %v6246_v37, %s11193_s8  ;;  %v6379_v26 = vcombine.low %v17240_v58, %v14995_v32  ;;  %v6254_v15 = vrot.slane %v6247_v56, %v11323_v28  ;;  %v10603_v12 = vcombine.high %v14864_v36, %v7840_v34  ;;  %v11117_v37 = vld [vmem:[%s16509_s3 + $0x130] sm:$0xff]   ;;  %v17247_v21 = vld [vmem:[#allocation72_spill] sm:$0xff] }
 0x2a6   : > { %10864 = vmatpush3.bf16.msra.mxu1 %v11115_v40  ;;  %v7908_v32 = vrot.slane %v7880_v48, %v17155_v60  ;;  %v10601_v63 = vcombine.high %v14552_v59, %v7771_v61  ;;  %v8827_v58 = vrot.slane %v10609_v20, %v17155_v60  ;;  %v10573_v39 = vcombine.high %v17223_v23, %v17239_v14  ;;  %v17245_v20 = vld [vmem:[#allocation118_spill] sm:$0xff]  ;;  %v17246_v59 = vld [vmem:[#allocation8_spill] sm:$0xff] }
 0x2a7   : > { %10865 = vmatprep.subr.bf16.mxu1 %v11116_v31  ;;  %7049 = vrot.lane.b32.xlu1 %v6949_v11, %s11194_s9  ;;  %v6726_v34 = vcombine.low %v17237_v24, %v15033_v13  ;;  %v15072_v40 = vrot.slane %v7922_v41, %v17155_v60  ;;  %v2717_v48 = vrot.slane %v17245_v20, %v11323_v28 }
 0x2a8   : > { %v8770_v56 = vrot.slane %v10603_v12, %v17155_v60  ;;  %v6386_v31 = vrot.slane %v6379_v26, %v11323_v28  ;;  %v8756_v61 = vrot.slane %v10601_v63, %v17155_v60  ;;  %v8845_v54 = vcombine.high %v8827_v58, %v15040_v10  ;;  %v17248_v63 = vld [vmem:[#allocation91_spill] sm:$0xff]  ;;  %v17249_v26 = vld [vmem:[#allocation13_spill] sm:$0xff]  ;;  %v15094_v47 = vpop.permute.xlu1 %5826 }
 0x2a9   : > { %17244 = vst [vmem:[#allocation80_spill] sm:$0xff] %v15072_v40  ;;  %6449 = vrot.lane.b32.xlu0 %v6370_v18, %s11192_s29  ;;  %v8844_v11 = vcombine.low %v8827_v58, %v15040_v10  ;;  %v6503_v24 = vcombine.low %v17227_v49, %v6254_v15  ;;  %v6269_v41 = vrot.slane %v6254_v15, %v11323_v28  ;;  %v11119_v18 = vld [vmem:[%s16509_s3 + $0x138] sm:$0xff]  }
 0x2aa   : > { %v15085_v36 = vrot.slane %v10573_v39, %v11323_v28  ;;  %v6727_v12 = vcombine.low %v17247_v21, %v17246_v59  ;;  %10866 = vmatpush3.bf16.msra.mxu1 %v11117_v37  ;;  %v6494_v42 = vcombine.low %v17249_v26, %v17248_v63  ;;  %v8774_v5 = vcombine.high %v8756_v61, %v8770_v56  ;;  %v15098_v39 = vpop.permute.xlu0 %5346  ;;  %v17250_v37 = vld [vmem:[#allocation75_spill] sm:$0xff] }
 0x2ab   : > { %v8773_v58 = vcombine.low %v8756_v61, %v8770_v56  ;;  %v1445_v49 = vcombine.high %v17223_v23, %v17223_v23  ;;  %10867 = vmatprep.subr.bf16.mxu1 %v11118_v3  ;;  %v8898_v6 = vrot.slane %v7908_v32, %v17155_v60  ;;  %6805 = vrot.lane.b32.xlu1 %v6726_v34, %s11193_s8 }
 0x2ac   : > { %v4479_v1 = vcombine.low %v17245_v20, %v17250_v37  ;;  %v15105_v16 = vrot.slane %v6727_v12, %v11323_v28  ;;  %v6735_v56 = vcombine.low %v6254_v15, %v15085_v36  ;;  %v6850_v61 = vcombine.low %v17242_v43, %v6386_v31  ;;  %v11120_v43 = vld [vmem:[%s16509_s3 + $0x180] sm:$0xff]   ;;  %v17252_v37 = vld [vmem:[#allocation74_spill] sm:$0xff] }
 0x2ad   : > { %6573 = vrot.lane.b32.xlu0 %v6494_v42, %s11194_s9  ;;  %v9507_v23 = vpack.c.bf16 %v8845_v54, %v8774_v5  ;;  %v9506_v26 = vpack.c.bf16 %v8844_v11, %v8773_v58  ;;  %v6371_v3 = vcombine.low %v17239_v14, %v1445_v49  ;;  %v6510_v32 = vrot.slane %v6503_v24, %v11323_v28  ;;  %v15131_v54 = vpop.permute.xlu1 %4980 }
 0x2ae   : > { %v6270_v34 = vcombine.low %v15033_v13, %v6269_v41  ;;  %v15114_v55 = vrot.slane %v6735_v56, %v11323_v28  ;;  %v6749_v20 = vrot.slane %v15105_v16, %v11323_v28  ;;  %10868 = vmatpush3.bf16.msra.mxu1 %v11119_v18  ;;  %v8891_v42 = vrot.slane %v7894_v62, %v17155_v60 }
 0x2af   : > { %10033 = vmatprep.mubr.bf16.mxu0 %v9507_v23  ;;  %v15122_v5 = vrot.slane %v6371_v3, %v11323_v28  ;;  %v15126_v14 = vcombine.high %v8898_v6, %v15072_v40  ;;  %v15129_v15 = vcombine.low %v8898_v6, %v15072_v40  ;;  %v6094_v11 = vsel %vm5966_vm3, %v15029_v22, %v14518_v33  ;;  %v15146_v33 = vpop.permute.xlu0 %5470 }
 0x2b0   : > { %6929 = vrot.lane.b32.xlu1 %v6850_v61, %s11192_s29  ;;  %v2718_v24 = vcombine.low %v14921_v44, %v2717_v48  ;;  %10034 = vmatmul.mubr.bf16.gmra.mrb[40].mxu0 %v9506_v26  ;;  %v6750_v41 = vcombine.low %v15114_v55, %v6749_v20  ;;  %v8914_v6 = vcombine.high %v8891_v42, %v15040_v10  ;;  %v17251_v48 = vld [vmem:[#allocation37_spill] sm:$0xff] }
 0x2b1   : > { %6327 = vrot.lane.b32.xlu0 %v6270_v34, %s11193_s8  ;;  %v6393_v62 = vrot.slane %v15122_v5, %v11323_v28  ;;  %v8913_v12 = vcombine.low %v8891_v42, %v15040_v10  ;;  %v1493_v18 = vcombine.high %v17247_v21, %v17247_v21  ;;  %v15149_v22 = vrot.slane %v4479_v1, %v11323_v28  ;;  %v5703_v3 = vpop.permute.xlu1 %5702 }
 0x2b2   : > { %v4493_v58 = vrot.slane %v17251_v48, %v11323_v28  ;;  %v6974_v49 = vcombine.low %v17248_v63, %v6510_v32  ;;  %v15156_v56 = vrot.slane %v17252_v37, %v11323_v28  ;;  %10966 = vmatprep.subr.bf16.mxu0 %v11120_v43  ;;  %v9512_v10 = vpack.c.bf16 %v15126_v14, %v8914_v6 }
 0x2b3   : > { %v6394_v61 = vcombine.low %v6386_v31, %v6393_v62  ;;  %v9511_v23 = vpack.c.bf16 %v15129_v15, %v8913_v12  ;;  %v6851_v26 = vcombine.low %v17246_v59, %v1493_v18  ;;  %10967 = vmatpush3.bf16.msra.mxu0 %v11120_v43  ;;  %v7914_v1 = vcombine.high %v14966_v45, %v14969_v35  ;;  %v5225_v18 = vpop.permute.xlu0 %5224 }
 0x2b4   : > { %17253 = vst [vmem:[#allocation125_spill] sm:$0xff] %v15156_v56  ;;  %v5978_v63 = vsel %vm5966_vm3, %v2718_v24, %v14949_v19  ;;  %7053 = vrot.lane.b32.xlu1 %v6974_v49, %s11194_s9  ;;  %v6859_v34 = vcombine.low %v15122_v5, %v15156_v56  ;;  %v6517_v31 = vrot.slane %v15085_v36, %v11323_v28 }
 0x2b5   : > { %6451 = vrot.lane.b32.xlu0 %v6394_v61, %s11192_s29  ;;  %9945 = vmatprep.mubr.bf16.mxu1 %v9512_v10  ;;  %v15172_v20 = vrot.slane %v6851_v26, %v11323_v28  ;;  %v10577_v45 = vcombine.high %v17247_v21, %v17246_v59  ;;  %v6983_v19 = vcombine.low %v15085_v36, %v15105_v16 }
 0x2b6   : > { %v17255_v35 = vcombine.high %v17233_v0, %v17233_v0  ;;  %v6102_v42 = vsel %vm5983_vm5, %v6094_v11, %v14582_v50  ;;  %v4494_v24 = vcombine.low %v15149_v22, %v4493_v58  ;;  %9946 = vmatmul.mubr.bf16.gmra.mrb[16].mxu1 %v9511_v23  ;;  %v6866_v62 = vrot.slane %v6859_v34, %v11323_v28  ;;  %v17257_v11 = vld [vmem:[#allocation9_spill] sm:$0xff]  ;;  %v17260_v34 = vld [vmem:[#allocation78_spill] sm:$0xff] }
 0x2b7   : > { %17254 = vst [vmem:[#allocation29_spill] sm:$0xff] %v15172_v20  ;;  %v6873_v21 = vrot.slane %v15172_v20, %v11323_v28  ;;  %v6518_v6 = vcombine.low %v6510_v32, %v6517_v31  ;;  %v6982_v36 = vrot.slane %v10577_v45, %v11323_v28  ;;  %v6990_v12 = vrot.slane %v6983_v19, %v11323_v28  ;;  %v17261_v31 = vld [vmem:[#allocation20_spill] sm:$0xff]  ;;  %v17262_v45 = vld [vmem:[#allocation126_spill] sm:$0xff] }
 0x2b8   : > { %v15182_v43 = vrot.slane %v17255_v35, %v11323_v28  ;;  %v15193_v0 = vrot.slane %v7914_v1, %v17155_v60  ;;  %v5995_v50 = vsel %vm5983_vm5, %v5978_v63, %v14899_v2  ;;  %6807 = vrot.lane.b32.xlu1 %v6750_v41, %s11193_s8  ;;  %v5065_v58 = vcombine.low %v17251_v48, %v17257_v11  ;;  %v5951_v41 = vpop.permute.xlu1 %5950  ;;  %v17259_v63 = vld [vmem:[#allocation33_spill] sm:$0xff]  ;;  %v17263_v19 = vld [vmem:[#allocation62_spill] sm:$0xff] }
 0x2b9   : > { %v7207_v49 = vcombine.low %v17184_v52, %v17183_v29  ;;  %v6028_v32 = vsel %vm5966_vm3, %v4494_v24, %v15023_v25  ;;  %v5056_v37 = vcombine.low %v14921_v44, %v15149_v22  ;;  %6575 = vrot.lane.b32.xlu0 %v6518_v6, %s11194_s9  ;;  %v6997_v61 = vrot.slane %v6982_v36, %v11323_v28  ;;  %v17304_v20 = vld [vmem:[#allocation54_spill] sm:$0xff] }
 0x2ba   : > { %17256 = vst [vmem:[#allocation77_spill] sm:$0xff] %v15182_v43  ;;  %v5079_v2 = vrot.slane %v17213_v8, %v11323_v28  ;;  %v6874_v10 = vcombine.low %v6866_v62, %v6873_v21  ;;  %v15211_v48 = vrot.slane %v5065_v58, %v11323_v28  ;;  %v7215_v23 = vcombine.low %v15105_v16, %v6982_v36  ;;  %v17265_v21 = vld [vmem:[#allocation83_spill] sm:$0xff]  ;;  %v17268_v58 = vld [vmem:[#allocation100_spill] sm:$0xff] }
 0x2bb   : > { %v7214_v29 = vrot.slane %v7207_v49, %v11323_v28  ;;  %v15217_v25 = vsel %vm6000_vm8, %v5995_v50, %v14983_v30  ;;  %v6044_v44 = vsel %vm5983_vm5, %v6028_v32, %v15061_v7  ;;  %v6998_v26 = vcombine.low %v6990_v12, %v6997_v61  ;;  %v15256_v12 = vpop.f32.mrb[0].mxu1  ;;  %v15258_v50 = vpop.f32.mrb[28].mxu0  ;;  %v17269_v49 = vld [vmem:[#allocation71_spill] sm:$0xff] }
 0x2bc   : > { %17258 = vst [vmem:[#allocation89_spill] sm:$0xff] %v15211_v48  ;;  %v7206_v8 = vcombine.low %v15033_v13, %v15114_v55  ;;  %v15225_v1 = vsel %vm5966_vm3, %v5056_v37, %v15047_v57  ;;  %6931 = vrot.lane.b32.xlu1 %v6874_v10, %s11192_s29  ;;  %v15230_v16 = vsel %vm6000_vm8, %v6044_v44, %v15131_v54  ;;  %v15241_v57 = vpop.permute.xlu0 %4392  ;;  %v15267_v37 = vpop.permute.xlu1 %4672 }
 0x2bd   : > { %v5536_v30 = vcombine.low %v15149_v22, %v15211_v48  ;;  %v6280_v7 = vcombine.low %v17260_v34, %v17259_v63  ;;  %v6077_v55 = vsel %vm5983_vm5, %v15225_v1, %v15098_v39  ;;  %v5080_v13 = vcombine.low %v15211_v48, %v5079_v2  ;;  %v17264_v39 = vld [vmem:[#allocation6_spill] sm:$0xff]  ;;  %v15284_v44 = vpop.f32.mrb[29].mxu0 }
 0x2be   : > { %7285 = vrot.lane.b32.xlu0 %v7206_v8, %s11193_s8  ;;  %v2801_v54 = vcombine.low %v14347_v46, %v17261_v31  ;;  %v2849_v35 = vcombine.low %v17263_v19, %v17262_v45  ;;  %v7222_v24 = vrot.slane %v7215_v23, %v11323_v28  ;;  %v7229_v62 = vrot.slane %v7214_v29, %v11323_v28  ;;  %v15282_v23 = vpop.f32.mrb[1].mxu1 }
 0x2bf   : > { %v6093_v22 = vsel %vm5966_vm3, %v5536_v30, %v5703_v3  ;;  %v17266_v6 = vcombine.high %v17264_v39, %v17265_v21  ;;  %v8026_v46 = vcombine.low %v15217_v25, %v15230_v16  ;;  %v6070_v11 = vsel %vm5966_vm3, %v5080_v13, %v5225_v18  ;;  %v15301_v34 = vpop.f32.mrb[2].mxu1 }
 0x2c0   : > { %v6101_v3 = vsel %vm5983_vm5, %v6093_v22, %v15094_v47  ;;  %v6271_v32 = vcombine.low %v17269_v49, %v17268_v58  ;;  %7055 = vrot.lane.b32.xlu1 %v6998_v26, %s11194_s9  ;;  %v15272_v61 = vsel %vm6000_vm8, %v6077_v55, %v15146_v33  ;;  %v15276_v10 = vrot.slane %v6280_v7, %v11323_v28  ;;  %v17271_v47 = vld [vmem:[#allocation16_spill] sm:$0xff]  ;;  %v11121_v26 = vld [vmem:[%s16509_s3 + $0x188] sm:$0xff]   ;;  %v15303_v7 = vpop.f32.mrb[30].mxu0  ;;  %v15310_v45 = vpop.f32.mrb[3].mxu1 }
 0x2c1   : > { %v15254_v36 = vrot.slane %v17266_v6, %v11323_v28  ;;  %v6109_v2 = vsel %vm6000_vm8, %v6101_v3, %v5951_v41  ;;  %v17270_v18 = vcombine.high %v17214_v53, %v17214_v53  ;;  %v15291_v33 = vsel %vm6000_vm8, %v6102_v42, %v14774_v9  ;;  %v17272_v9 = vld [vmem:[#allocation106_spill] sm:$0xff]  ;;  %10968 = vmatprep.subr.bf16.mxu0 %v11121_v26  ;;  %v3699_v39 = vpop.permute.xlu0 %3698  ;;  %v17275_v49 = vld [vmem:[#allocation128_spill] sm:$0xff] }
 0x2c2   : > { %v7952_v41 = vcombine.low %v15272_v61, %v6109_v2  ;;  %6329 = vrot.lane.b32.xlu0 %v6271_v32, %s11193_s8  ;;  %v15296_v8 = vrot.slane %v2801_v54, %v11323_v28  ;;  %v15299_v30 = vrot.slane %v2849_v35, %v11323_v28  ;;  %v7230_v55 = vcombine.low %v7222_v24, %v7229_v62  ;;  %v15312_v54 = vpop.f32.mrb[31].mxu0  ;;  %v17274_v24 = vld [vmem:[#allocation31_spill] sm:$0xff] }
 0x2c3   : > { %17267 = vst [vmem:[#allocation113_spill] sm:$0xff] %v15254_v36  ;;  %v7182_v29 = vcombine.low %v17271_v47, %v17270_v18  ;;  %v6078_v13 = vsel %vm5983_vm5, %v6070_v11, %v14641_v4  ;;  %v6404_v42 = vcombine.low %v17272_v9, %v15254_v36  ;;  %v15316_v19 = vrot.slane %v15193_v0, %v17155_v60  ;;  %v17273_v4 = vld [vmem:[#allocation11_spill] sm:$0xff]  ;;  %v15336_v18 = vpop.permute.xlu1 %4984  ;;  %v17303_v47 = vld [vmem:[#allocation124_spill] sm:$0xff] }
 0x2c4   : > { %v8027_v35 = vcombine.high %v15217_v25, %v15230_v16  ;;  %v7961_v22 = vrot.slane %v7952_v41, %v17155_v60  ;;  %v6395_v62 = vcombine.low %v17274_v24, %v17273_v4  ;;  %10969 = vmatpush3.bf16.msra.mxu0 %v11121_v26  ;;  %v8036_v6 = vrot.slane %v8026_v46, %v17155_v60  ;;  %v17276_v32 = vld [vmem:[#allocation127_spill] sm:$0xff] }
 0x2c5   : > { %v7189_v31 = vrot.slane %v7182_v29, %v11323_v28  ;;  %7287 = vrot.lane.b32.xlu1 %v7230_v55, %s11193_s8  ;;  %v6751_v11 = vcombine.low %v17268_v58, %v15276_v10  ;;  %v7190_v0 = vcombine.low %v17210_v17, %v14928_v27  ;;  %v6086_v25 = vsel %vm6000_vm8, %v6078_v13, %v14776_v38  ;;  %v17277_v29 = vld [vmem:[#allocation82_spill] sm:$0xff] }
 0x2c6   : > { %v8941_v16 = vrot.slane %v7961_v22, %v17155_v60  ;;  %6453 = vrot.lane.b32.xlu0 %v6395_v62, %s11192_s29  ;;  %v2850_v46 = vcombine.low %v17276_v32, %v17275_v49  ;;  %v17278_v58 = vcombine.high %v17265_v21, %v17265_v21  ;;  %v7953_v17 = vcombine.high %v15272_v61, %v6109_v2  ;;  %v17281_v21 = vld [vmem:[#allocation7_spill] sm:$0xff]  ;;  %v17283_v62 = vld [vmem:[#allocation105_spill] sm:$0xff]  ;;  %v15373_v32 = vpop.permute.xlu0 %4046 }
 0x2c7   : > { %v7204_v3 = vrot.slane %v7189_v31, %v11323_v28  ;;  %v4496_v27 = vcombine.low %v15296_v8, %v15299_v30  ;;  %v15346_v38 = vrot.slane %v6404_v42, %v11323_v28  ;;  %v7197_v41 = vrot.slane %v7190_v0, %v11323_v28 }
 0x2c8   : > { %v6272_v26 = vcombine.low %v17278_v58, %v17277_v29  ;;  %v15353_v13 = vcombine.high %v15316_v19, %v8941_v16  ;;  %v15356_v31 = vcombine.low %v15316_v19, %v8941_v16  ;;  %v1790_v61 = vcombine.high %v17281_v21, %v17281_v21 }
 0x2c9   : > { %v8028_v2 = vcombine.low %v6086_v25, %v15291_v33  ;;  %6809 = vrot.lane.b32.xlu1 %v6751_v11, %s11193_s8  ;;  %v7205_v42 = vcombine.low %v7197_v41, %v7204_v3  ;;  %v17282_v22 = vcombine.high %v17277_v29, %v17277_v29  ;;  %v17284_v0 = vcombine.high %v17283_v62, %v17283_v62 }
 0x2ca   : > { %v15350_v55 = vrot.slane %v6272_v26, %v11323_v28  ;;  %17279 = vst [vmem:[#allocation97_spill] sm:$0xff] %v15353_v13  ;;  %17280 = vst [vmem:[#allocation84_spill] sm:$0xff] %v15356_v31  ;;  %v15371_v16 = vrot.slane %v2850_v46, %v11323_v28  ;;  %v9514_v11 = vpack.c.bf16 %v15353_v13, %v15126_v14  ;;  %v17285_v46 = vld [vmem:[#allocation102_spill] sm:$0xff] }
 0x2cb   : > { %v6520_v24 = vcombine.low %v17281_v21, %v17282_v22  ;;  %v2719_v49 = vcombine.low %v17120_v51, %v17284_v0  ;;  %v9513_v3 = vpack.c.bf16 %v15356_v31, %v15129_v15  ;;  %v15382_v26 = vrot.slane %v8027_v35, %v17155_v60  ;;  %7283 = vrot.lane.b32.xlu0 %v7205_v42, %s11193_s8  ;;  %v4829_v0 = vpop.permute.xlu1 %4828  ;;  %v17288_v42 = vld [vmem:[#allocation131_spill] sm:$0xff]  ;;  %v17290_v31 = vld [vmem:[#allocation132_spill] sm:$0xff] }
 0x2cc   : > { %v6528_v58 = vcombine.low %v17259_v63, %v15350_v55  ;;  %v8029_v41 = vcombine.high %v6086_v25, %v15291_v33  ;;  %v6875_v51 = vcombine.low %v17273_v4, %v15346_v38  ;;  %v6752_v22 = vcombine.low %v1790_v61, %v17285_v46  ;;  %10041 = vmatprep.mubr.bf16.mxu0 %v9514_v11  ;;  %v17287_v61 = vld [vmem:[#allocation107_spill] sm:$0xff] }
 0x2cd   : > { %v15390_v63 = vrot.slane %v8036_v6, %v17155_v60  ;;  %v7968_v14 = vrot.slane %v7953_v17, %v17155_v60  ;;  %v6030_v15 = vsel %vm5966_vm3, %v4496_v27, %v15267_v37  ;;  %v15399_v33 = vrot.slane %v8028_v2, %v17155_v60  ;;  %10042 = vmatmul.mubr.bf16.gmra.mrb[44].mxu0 %v9513_v3  ;;  %v17286_v37 = vld [vmem:[#allocation34_spill] sm:$0xff]  ;;  %v15410_v27 = vpop.permute.xlu0 %4394 }
 0x2ce   : > { %v15396_v35 = vrot.slane %v6528_v58, %v11323_v28  ;;  %6933 = vrot.lane.b32.xlu1 %v6875_v51, %s11192_s29  ;;  %v15403_v4 = vrot.slane %v6520_v24, %v11323_v28  ;;  %v2729_v6 = vrot.slane %v2719_v49, %v11323_v28  ;;  %v2865_v25 = vcombine.low %v15299_v30, %v15371_v16  ;;  %v17289_v24 = vld [vmem:[#allocation53_spill] sm:$0xff] }
 0x2cf   : > { %v2800_v2 = vcombine.low %v17288_v42, %v17287_v61  ;;  %v6294_v58 = vrot.slane %v15350_v55, %v11323_v28  ;;  %v15417_v11 = vrot.slane %v8029_v41, %v17155_v60  ;;  %v6519_v49 = vcombine.low %v17289_v24, %v17286_v37  ;;  %v3697_v42 = vpop.permute.xlu1 %3696  ;;  %v17291_v41 = vld [vmem:[#allocation17_spill] sm:$0xff]  ;;  %v17292_v24 = vld [vmem:[#allocation26_spill] sm:$0xff] }
 0x2d0   : > { %v6999_v17 = vcombine.low %v17286_v37, %v15396_v35  ;;  %v15422_v3 = vrot.slane %v6752_v22, %v11323_v28  ;;  %v6396_v30 = vcombine.low %v17277_v29, %v17281_v21  ;;  %v15427_v51 = vrot.slane %v7968_v14, %v17155_v60 }
 0x2d1   : > { %v5981_v61 = vsel %vm5966_vm3, %v2865_v25, %v3699_v39  ;;  %v2752_v13 = vcombine.low %v17291_v41, %v17290_v31  ;;  %v10574_v37 = vcombine.high %v17277_v29, %v17281_v21  ;;  %v6760_v22 = vcombine.low %v15350_v55, %v15403_v4  ;;  %v17294_v39 = vld [vmem:[#allocation109_spill] sm:$0xff]  ;;  %v11122_v31 = vld [vmem:[%s16509_s3 + $0x190] sm:$0xff]   ;;  %v3695_v21 = vpop.permute.xlu0 %3694  ;;  %v17297_v41 = vld [vmem:[#allocation56_spill] sm:$0xff] }
 0x2d2   : > { %7057 = vrot.lane.b32.xlu0 %v6999_v17, %s11194_s9  ;;  %6577 = vrot.lane.b32.xlu1 %v6519_v49, %s11194_s9  ;;  %v2751_v40 = vcombine.low %v2729_v6, %v17292_v24  ;;  %v15440_v14 = vrot.slane %v6396_v30, %v11323_v28  ;;  %v6876_v25 = vcombine.low %v17285_v46, %v17294_v39  ;;  %v17296_v30 = vld [vmem:[#allocation59_spill] sm:$0xff] }
 0x2d3   : > { %v2808_v17 = vrot.slane %v2800_v2, %v11323_v28  ;;  %v6295_v29 = vcombine.low %v15276_v10, %v6294_v58  ;;  %v15450_v49 = vrot.slane %v10574_v37, %v11323_v28  ;;  %v1836_v55 = vcombine.high %v17285_v46, %v17285_v46  ;;  %10970 = vmatprep.subr.bf16.mxu0 %v11122_v31  ;;  %v11123_v58 = vld [vmem:[%s16509_s3 + $0x198] sm:$0xff]   ;;  %v15466_v46 = vpop.permute.xlu1 %4390 }
 0x2d4   : > { %17293 = vst [vmem:[#allocation114_spill] sm:$0xff] %v15440_v14  ;;  %v6046_v6 = vsel %vm5983_vm5, %v6030_v15, %v4829_v0  ;;  %v7181_v24 = vcombine.low %v17297_v41, %v17296_v30  ;;  %v6774_v36 = vrot.slane %v15422_v3, %v11323_v28  ;;  %v6418_v2 = vrot.slane %v15440_v14, %v11323_v28  ;;  %v17298_v30 = vld [vmem:[#allocation133_spill] sm:$0xff]  ;;  %v17299_v41 = vld [vmem:[#allocation130_spill] sm:$0xff] }
 0x2d5   : > { %17295 = vst [vmem:[#allocation28_spill] sm:$0xff] %v15450_v49  ;;  %v2766_v37 = vrot.slane %v2752_v13, %v11323_v28  ;;  %v6884_v15 = vcombine.low %v15440_v14, %v15450_v49  ;;  %v7000_v0 = vcombine.low %v17294_v39, %v1836_v55  ;;  %v2890_v48 = vcombine.low %v17299_v41, %v17298_v30  ;;  %v4671_v14 = vpop.permute.xlu0 %4670  ;;  %v17301_v41 = vld [vmem:[#allocation122_spill] sm:$0xff] }
 0x2d6   : > { %6331 = vrot.lane.b32.xlu0 %v6295_v29, %s11193_s8  ;;  %7281 = vrot.lane.b32.xlu1 %v7181_v24, %s11193_s8  ;;  %v15475_v9 = vrot.slane %v6760_v22, %v11323_v28  ;;  %v2759_v53 = vrot.slane %v2751_v40, %v11323_v28  ;;  %v15479_v29 = vrot.slane %v6876_v25, %v11323_v28 }
 0x2d7   : > { %v6542_v13 = vrot.slane %v15403_v4, %v11323_v28  ;;  %v2816_v49 = vcombine.low %v2808_v17, %v15296_v8  ;;  %v6419_v55 = vcombine.low %v15346_v38, %v6418_v2  ;;  %v15486_v30 = vrot.slane %v7000_v0, %v11323_v28  ;;  %10971 = vmatpush3.bf16.msra.mxu0 %v11122_v31  ;;  %v4045_v31 = vpop.permute.xlu1 %4044 }
 0x2d8   : > { %17300 = vst [vmem:[#allocation104_spill] sm:$0xff] %v15479_v29  ;;  %v7008_v22 = vcombine.low %v15403_v4, %v15422_v3  ;;  %v6775_v40 = vcombine.low %v15475_v9, %v6774_v36  ;;  %v6891_v25 = vrot.slane %v6884_v15, %v11323_v28  ;;  %v6898_v24 = vrot.slane %v15479_v29, %v11323_v28 }
 0x2d9   : > { %v17302_v8 = vcombine.high %v17301_v41, %v17301_v41  ;;  %10972 = vmatprep.subr.bf16.mxu0 %v11123_v58  ;;  %v5998_v2 = vsel %vm5983_vm5, %v5981_v61, %v15373_v32  ;;  %v15502_v4 = vsel %vm6000_vm8, %v6046_v6, %v15336_v18  ;;  %v4495_v36 = vcombine.low %v2766_v37, %v2808_v17  ;;  %v17305_v32 = vld [vmem:[#allocation92_spill] sm:$0xff] }
 0x2da   : > { %6455 = vrot.lane.b32.xlu0 %v6419_v55, %s11192_s29  ;;  %v15506_v15 = vrot.slane %v2890_v48, %v11323_v28  ;;  %v5980_v0 = vsel %vm5966_vm3, %v2816_v49, %v3697_v42  ;;  %6811 = vrot.lane.b32.xlu1 %v6775_v40, %s11193_s8  ;;  %v6543_v29 = vcombine.low %v15396_v35, %v6542_v13 }
 0x2db   : > { %v6189_v38 = vcombine.low %v17303_v47, %v17302_v8  ;;  %v2767_v8 = vcombine.low %v2759_v53, %v2766_v37  ;;  %v6305_v61 = vcombine.low %v17305_v32, %v17304_v20  ;;  %v5997_v18 = vsel %vm5983_vm5, %v5980_v0, %v4045_v31  ;;  %10973 = vmatpush3.bf16.msra.mxu0 %v11123_v58  ;;  %v4043_v37 = vpop.permute.xlu0 %4042  ;;  %v4675_v40 = vpop.permute.xlu1 %4674  ;;  %v17308_v58 = vld [vmem:[#allocation90_spill] sm:$0xff]  ;;  %v17315_v32 = vld [vmem:[#allocation19_spill] sm:$0xff] }
 0x2dc   : > { %v7015_v6 = vrot.slane %v7008_v22, %v11323_v28  ;;  %v7022_v17 = vrot.slane %v15486_v30, %v11323_v28  ;;  %v17306_v48 = vcombine.high %v17301_v41, %v17303_v47  ;;  %v15525_v53 = vsel %vm6000_vm8, %v5998_v2, %v15410_v27  ;;  %v17309_v41 = vld [vmem:[#allocation121_spill] sm:$0xff]  ;;  %v17310_v27 = vld [vmem:[#allocation35_spill] sm:$0xff] }
 0x2dd   : > { %v5979_v35 = vsel %vm5966_vm3, %v2767_v8, %v3695_v21  ;;  %v6899_v49 = vcombine.low %v6891_v25, %v6898_v24  ;;  %v15529_v13 = vrot.slane %v6189_v38, %v11323_v28  ;;  %v6029_v55 = vsel %vm5966_vm3, %v4495_v36, %v4671_v14  ;;  %v17311_v2 = vld [vmem:[#allocation23_spill] sm:$0xff]  ;;  %v17312_v14 = vld [vmem:[#allocation24_spill] sm:$0xff] }
 0x2de   : > { %v15521_v42 = vrot.slane %v17306_v48, %v11323_v28  ;;  %6579 = vrot.lane.b32.xlu0 %v6543_v29, %s11194_s9  ;;  %v4497_v22 = vcombine.low %v15371_v16, %v15506_v15  ;;  %v6296_v31 = vcombine.low %v17309_v41, %v17308_v58  ;;  %v6420_v0 = vcombine.low %v17311_v2, %v17310_v27  ;;  %v17313_v29 = vld [vmem:[#allocation66_spill] sm:$0xff]  ;;  %v17317_v41 = vld [vmem:[#allocation123_spill] sm:$0xff] }
 0x2df   : > { %17307 = vst [vmem:[#allocation45_spill] sm:$0xff] %v15529_v13  ;;  %6935 = vrot.lane.b32.xlu1 %v6899_v49, %s11192_s29  ;;  %v6014_v21 = vsel %vm6000_vm8, %v5997_v18, %v15241_v57  ;;  %v15543_v25 = vrot.slane %v6305_v61, %v11323_v28  ;;  %v6544_v24 = vcombine.low %v17313_v29, %v17312_v14  ;;  %v17314_v16 = vld [vmem:[#allocation134_spill] sm:$0xff]  ;;  %v17316_v49 = vld [vmem:[#allocation111_spill] sm:$0xff]  ;;  %v15558_v57 = vld [vmem:[%s16510_s4] ss:$0 sm:$0xff]  ;;  %v4983_v61 = vpop.permute.xlu0 %4982  ;;  %v4831_v56 = vpop.permute.xlu1 %4830 }
 0x2e0   : > { %v7023_v36 = vcombine.low %v7015_v6, %v7022_v17  ;;  %v6553_v8 = vcombine.low %v17304_v20, %v15521_v42  ;;  %v4506_v48 = vcombine.low %v17314_v16, %v17315_v32  ;;  %v6545_v2 = vcombine.low %v17317_v41, %v17316_v49  ;;  %v17318_v18 = vld [vmem:[#allocation64_spill] sm:$0xff] }
 0x2e1   : > { %v6429_v29 = vcombine.low %v17318_v18, %v15529_v13  ;;  %v10743_v6 = vadd.f32 %v15282_v23, %v15256_v12  ;;  %v10807_v20 = vadd.f32 %v15284_v44, %v15258_v50  ;;  %v1838_v17 = vcombine.high %v17294_v39, %v17294_v39 }
 0x2e2   : > { %v8097_v32 = vcombine.low %v6014_v21, %v15502_v4  ;;  %6333 = vrot.lane.b32.xlu0 %v6296_v31, %s11193_s8  ;;  %v6776_v38 = vcombine.low %v17308_v58, %v15543_v25  ;;  %v15573_v52 = vrot.slane %v6545_v2, %v11323_v28  ;;  %v10746_v12 = vadd.f32 %v15310_v45, %v15301_v34 }
 0x2e3   : > { %v8098_v23 = vcombine.high %v6014_v21, %v15502_v4  ;;  %7059 = vrot.lane.b32.xlu1 %v7023_v36, %s11194_s9  ;;  %v5996_v50 = vsel %vm5983_vm5, %v5979_v35, %v4043_v37  ;;  %v9916_v44 = vadd.f32 %v10743_v6, %v15558_v57  ;;  %v7232_v31 = vcombine.low %v1838_v17, %v17283_v62  ;;  %v4827_v4 = vpop.permute.xlu0 %4826  ;;  %v4987_v36 = vpop.permute.xlu1 %4986 }
 0x2e4   : > { %v15583_v13 = vrot.slane %v6553_v8, %v11323_v28  ;;  %v6785_v58 = vcombine.low %v15521_v42, %v15573_v52  ;;  %v9919_v2 = vadd.f32 %v10746_v12, %v15558_v57  ;;  %v10810_v34 = vadd.f32 %v15312_v54, %v15303_v7 }
 0x2e5   : > { %v15591_v45 = vrot.slane %v6429_v29, %v11323_v28  ;;  %v15594_v35 = vrot.slane %v4506_v48, %v11323_v28  ;;  %v15596_v37 = vadd.f32 %v10807_v20, %v9916_v44  ;;  %v7240_v62 = vcombine.low %v15422_v3, %v15486_v30 }
 0x2e6   : > { %6457 = vrot.lane.b32.xlu0 %v6420_v0, %s11192_s29  ;;  %v6045_v21 = vsel %vm5983_vm5, %v6029_v55, %v4827_v4  ;;  %v7239_v8 = vrot.slane %v7232_v31, %v11323_v28  ;;  %v15603_v7 = vadd.f32 %v10810_v34, %v9919_v2  ;;  %v10575_v54 = vcombine.high %v17317_v41, %v17316_v49 }
 0x2e7   : > { %17319 = vst [vmem:[#allocation15_spill] sm:$0xff] %v15596_v37  ;;  %v15608_v48 = vrot.slane %v8097_v32, %v17155_v60  ;;  %v15611_v29 = vrot.slane %v8098_v23, %v17155_v60  ;;  %v6013_v3 = vsel %vm6000_vm8, %v5996_v50, %v15466_v46  ;;  %6813 = vrot.lane.b32.xlu1 %v6776_v38, %s11193_s8  ;;  %v15622_v12 = vpop.permute.xlu0 %3700  ;;  %v17321_v23 = vld [vmem:[#allocation129_spill] sm:$0xff] }
 0x2e8   : > { %17320 = vst [vmem:[#allocation58_spill] sm:$0xff] %v15603_v7  ;;  %v6061_v30 = vsel %vm6000_vm8, %v6045_v21, %v4983_v61  ;;  %v6031_v55 = vsel %vm5966_vm3, %v4497_v22, %v4675_v40  ;;  %v6792_v20 = vrot.slane %v6785_v58, %v11323_v28  ;;  %v6900_v32 = vcombine.low %v17310_v27, %v15591_v45  ;;  %v15634_v40 = vpop.permute.xlu1 %5706  ;;  %v17322_v50 = vld [vmem:[#allocation25_spill] sm:$0xff]  ;;  %v17364_v7 = vld [vmem:[#allocation47_spill] sm:$0xff] }
 0x2e9   : > { %v8095_v0 = vcombine.low %v6013_v3, %v6061_v30  ;;  %v8096_v6 = vcombine.high %v6013_v3, %v6061_v30  ;;  %v6047_v17 = vsel %vm5983_vm5, %v6031_v55, %v4831_v56  ;;  %v6319_v46 = vrot.slane %v15521_v42, %v11323_v28 }
 0x2ea   : > { %v15627_v38 = vrot.slane %v10575_v54, %v11323_v28  ;;  %6581 = vrot.lane.b32.xlu0 %v6544_v24, %s11194_s9  ;;  %v7247_v56 = vrot.slane %v7240_v62, %v11323_v28  ;;  %v7254_v27 = vrot.slane %v7239_v8, %v11323_v28  ;;  %v15640_v42 = vsel %vm6000_vm8, %v6047_v17, %v4987_v36 }
 0x2eb   : > { %v8105_v61 = vrot.slane %v8095_v0, %v17155_v60  ;;  %v15631_v22 = vrot.slane %v8096_v6, %v17155_v60  ;;  %6937 = vrot.lane.b32.xlu1 %v6900_v32, %s11192_s29  ;;  %v5090_v44 = vcombine.low %v17322_v50, %v17321_v23  ;;  %v2132_v24 = vcombine.high %v17303_v47, %v17303_v47  ;;  %v15655_v21 = vpop.permute.xlu0 %4048  ;;  %v17341_v23 = vld [vmem:[#allocation79_spill] sm:$0xff] }
 0x2ec   : > { %v6799_v31 = vrot.slane %v15627_v38, %v11323_v28  ;;  %v7256_v4 = vcombine.low %v15543_v25, %v6792_v20  ;;  %v7024_v62 = vcombine.low %v17312_v14, %v15583_v13  ;;  %v7231_v36 = vcombine.low %v15276_v10, %v15475_v9  ;;  %v15664_v3 = vpop.permute.xlu1 %5954 }
 0x2ed   : > { %v8128_v58 = vcombine.high %v8105_v61, %v15608_v48  ;;  %v8129_v2 = vcombine.low %v15631_v22, %v15611_v29  ;;  %v10612_v34 = vcombine.low %v15382_v26, %v8105_v61  ;;  %v6320_v8 = vcombine.low %v15543_v25, %v6319_v46 }
 0x2ee   : > { %v6421_v47 = vcombine.low %v2132_v24, %v17317_v41  ;;  %v8132_v54 = vcombine.high %v15525_v53, %v15640_v42  ;;  %7293 = vrot.lane.b32.xlu0 %v7256_v4, %s11193_s8  ;;  %v7255_v26 = vcombine.low %v7247_v56, %v7254_v27  ;;  %v6800_v30 = vcombine.low %v6792_v20, %v6799_v31  ;;  %v17324_v56 = vld [vmem:[#allocation112_spill] sm:$0xff] }
 0x2ef   : > { %v10614_v14 = vcombine.low %v8128_v58, %v15631_v22  ;;  %7061 = vrot.lane.b32.xlu1 %v7024_v62, %s11194_s9  ;;  %v9054_v10 = vrot.slane %v15399_v33, %v17155_v60  ;;  %v10613_v9 = vcombine.low %v15417_v11, %v15608_v48  ;;  %v10615_v25 = vcombine.high %v15608_v48, %v8129_v2  ;;  %v15684_v32 = vpop.permute.xlu0 %4396 }
 0x2f0   : > { %v2133_v55 = vcombine.high %v17316_v49, %v17316_v49  ;;  %v15676_v0 = vrot.slane %v6421_v47, %v11323_v28  ;;  %v9104_v6 = vrot.slane %v10612_v34, %v17155_v60  ;;  %v17323_v17 = vcombine.high %v17317_v41, %v17317_v41  ;;  %v15692_v31 = vpop.permute.xlu1 %4676 }
 0x2f1   : > { %v9118_v20 = vrot.slane %v10614_v14, %v17155_v60  ;;  %v9056_v11 = vcombine.high %v15316_v19, %v15390_v63  ;;  %v9111_v46 = vrot.slane %v10613_v9, %v17155_v60  ;;  %v9125_v61 = vrot.slane %v10615_v25, %v17155_v60 }
 0x2f2   : > { %v6669_v33 = vcombine.low %v17316_v49, %v17323_v17  ;;  %v6901_v27 = vcombine.low %v2133_v55, %v17324_v56  ;;  %7289 = vrot.lane.b32.xlu0 %v7231_v36, %s11193_s8  ;;  %v9055_v49 = vcombine.low %v15316_v19, %v15390_v63  ;;  %v5081_v2 = vcombine.low %v15506_v15, %v15594_v35 }
 0x2f3   : > { %v9127_v24 = vcombine.high %v9104_v6, %v9118_v20  ;;  %v9126_v58 = vcombine.low %v9104_v6, %v9118_v20  ;;  %7291 = vrot.lane.b32.xlu1 %v7255_v26, %s11193_s8  ;;  %v9058_v34 = vcombine.high %v15427_v51, %v9054_v10  ;;  %v9129_v4 = vcombine.high %v9111_v46, %v9125_v61  ;;  %v5227_v63 = vpop.permute.xlu0 %5226 }
 0x2f4   : > { %v15695_v41 = vrot.slane %v6669_v33, %v11323_v28  ;;  %v15704_v62 = vrot.slane %v6901_v27, %v11323_v28  ;;  %v6443_v36 = vrot.slane %v15676_v0, %v11323_v28  ;;  %v9057_v25 = vcombine.low %v15427_v51, %v9054_v10  ;;  %v15715_v20 = vpop.permute.xlu1 %4832 }
 0x2f5   : > { %v9519_v47 = vpack.c.bf16 %v9127_v24, %v9056_v11  ;;  %v9518_v19 = vpack.c.bf16 %v9126_v58, %v9055_v49  ;;  %v9521_v9 = vpack.c.bf16 %v9129_v4, %v9058_v34  ;;  %v9128_v55 = vcombine.low %v9111_v46, %v9125_v61 }
 0x2f6   : > { %17325 = vst [vmem:[#allocation50_spill] sm:$0xff] %v15704_v62  ;;  %v6909_v14 = vcombine.low %v15676_v0, %v15695_v41  ;;  %v6923_v26 = vrot.slane %v15704_v62, %v11323_v28  ;;  %6815 = vrot.lane.b32.xlu0 %v6800_v30, %s11193_s8  ;;  %v6071_v6 = vsel %vm5966_vm3, %v5081_v2, %v5227_v63 }
 0x2f7   : > { %9953 = vmatprep.mubr.bf16.mxu1 %v9519_v47  ;;  %v7025_v33 = vcombine.low %v17324_v56, %v15182_v43  ;;  %v8131_v11 = vcombine.low %v15525_v53, %v15640_v42  ;;  %v15723_v27 = vrot.slane %v8132_v54, %v17155_v60  ;;  %6335 = vrot.lane.b32.xlu1 %v6320_v8, %s11193_s8  ;;  %v5351_v42 = vpop.permute.xlu0 %5350 }
 0x2f8   : > { %v6916_v17 = vrot.slane %v6909_v14, %v11323_v28  ;;  %v8133_v10 = vcombine.high %v6071_v6, %v6071_v6  ;;  %10049 = vmatprep.mubr.bf16.mxu0 %v9521_v9  ;;  %v6444_v30 = vcombine.low %v15591_v45, %v6443_v36  ;;  %9954 = vmatmul.mubr.bf16.gmra.mrb[20].mxu1 %v9518_v19  ;;  %v17327_v36 = vld [vmem:[#allocation95_spill] sm:$0xff] }
 0x2f9   : > { %v9520_v61 = vpack.c.bf16 %v9128_v55, %v9057_v25  ;;  %v7032_v24 = vrot.slane %v7025_v33, %v11323_v28  ;;  %v6567_v53 = vrot.slane %v15573_v52, %v11323_v28  ;;  %v7033_v54 = vcombine.low %v15573_v52, %v15627_v38 }
 0x2fa   : > { %v6924_v46 = vcombine.low %v6916_v17, %v6923_v26  ;;  %v15729_v49 = vrot.slane %v8133_v10, %v17155_v60  ;;  %v10579_v8 = vcombine.high %v17324_v56, %v15182_v43  ;;  %v15741_v45 = vrot.slane %v5090_v44, %v11323_v28  ;;  %v4989_v44 = vpop.permute.xlu1 %4988  ;;  %v17328_v17 = vld [vmem:[#allocation44_spill] sm:$0xff] }
 0x2fb   : > { %10050 = vmatmul.mubr.bf16.gmra.mrb[48].mxu0 %v9520_v61  ;;  %v7047_v58 = vrot.slane %v7032_v24, %v11323_v28  ;;  %v7265_v2 = vcombine.low %v15627_v38, %v7032_v24  ;;  %6459 = vrot.lane.b32.xlu1 %v6444_v30, %s11192_s29  ;;  %v15748_v52 = vrot.slane %v6071_v6, %v17155_v60  ;;  %v5475_v55 = vpop.permute.xlu0 %5474  ;;  %v17333_v24 = vld [vmem:[#allocation52_spill] sm:$0xff] }
 0x2fc   : > { %6939 = vrot.lane.b32.xlu0 %v6924_v46, %s11192_s29  ;;  %v8164_v34 = vcombine.low %v15723_v27, %v15729_v49  ;;  %v7040_v4 = vrot.slane %v7033_v54, %v11323_v28  ;;  %v8451_v47 = vrot.slane %v17327_v36, %v17155_v60  ;;  %v15758_v14 = vrot.slane %v8131_v11, %v17155_v60  ;;  %v17334_v54 = vld [vmem:[#allocation108_spill] sm:$0xff]  ;;  %s270_s29 = scalar_lea.vmem [#allocation2], %s269_s20 }
 0x2fd   : > { %17326 = vst [vmem:[#allocation101_spill] sm:$0xff] %v15748_v52  ;;  %v4520_v38 = vrot.slane %v17322_v50, %v11323_v28  ;;  %v7264_v19 = vrot.slane %v10579_v8, %v11323_v28  ;;  %v6568_v9 = vcombine.low %v15583_v13, %v6567_v53  ;;  %v7272_v25 = vrot.slane %v7265_v2, %v11323_v28  ;;  %v17331_v13 = vld [vmem:[#allocation18_spill] sm:$0xff]  ;;  %v17335_v8 = vld [vmem:[#allocation119_spill] sm:$0xff] }
 0x2fe   : > { %v15764_v63 = vcombine.high %v15748_v52, %v8164_v34  ;;  %v7048_v26 = vcombine.low %v7040_v4, %v7047_v58  ;;  %v17329_v33 = vrot.slane %v17328_v17, %v17155_v60  ;;  %v17330_v10 = vrot.slane %v17314_v16, %v11323_v28  ;;  %v17336_v2 = vld [vmem:[#allocation39_spill] sm:$0xff]  ;;  %v17337_v16 = vld [vmem:[#allocation120_spill] sm:$0xff] }
 0x2ff   : > { %v5561_v30 = vcombine.low %v15594_v35, %v15741_v45  ;;  %v7279_v46 = vrot.slane %v7264_v19, %v11323_v28  ;;  %v17332_v61 = vrot.slane %v17331_v13, %v17155_v60  ;;  %v15788_v58 = vsel %vm5966_vm3, %v17335_v8, %v17334_v54  ;;  %6583 = vrot.lane.b32.xlu1 %v6568_v9, %s11194_s9  ;;  %v5831_v9 = vpop.permute.xlu1 %5830 }
 0x300   : > { %v8437_v11 = vrot.slane %v17329_v33, %v17155_v60  ;;  %v2905_v50 = vcombine.low %v15506_v15, %v17330_v10  ;;  %v15793_v15 = vsel %vm5966_vm3, %v17337_v16, %v17336_v2  ;;  %7063 = vrot.lane.b32.xlu0 %v7048_v26, %s11194_s9  ;;  %v4521_v19 = vcombine.low %v15594_v35, %v4520_v38  ;;  %v17338_v38 = vld [vmem:[#allocation38_spill] sm:$0xff] }
 0x301   : > { %v15783_v53 = vcombine.low %v17333_v24, %v17332_v61  ;;  %v6095_v36 = vsel %vm5966_vm3, %v5561_v30, %v15634_v40  ;;  %v8130_v33 = vcombine.high %v15631_v22, %v15611_v29  ;;  %v7280_v13 = vcombine.low %v7272_v25, %v7279_v46  ;;  %v5229_v61 = vpop.permute.xlu0 %5228 }
 0x302   : > { %v15797_v34 = vcombine.low %v8437_v11, %v8451_v47  ;;  %v5982_v4 = vsel %vm5966_vm3, %v2905_v50, %v15622_v12  ;;  %v8167_v47 = vcombine.high %v15608_v48, %v15758_v14  ;;  %v6032_v12 = vsel %vm5966_vm3, %v4521_v19, %v15692_v31  ;;  %v17339_v11 = vld [vmem:[#allocation94_spill] sm:$0xff] }
 0x303   : > { %v5999_v10 = vsel %vm5983_vm5, %v5982_v4, %v15655_v21  ;;  %v6079_v26 = vsel %vm5983_vm5, %v6071_v6, %v5351_v42  ;;  %v6103_v40 = vsel %vm5983_vm5, %v6095_v36, %v5831_v9  ;;  %v8166_v35 = vcombine.low %v15608_v48, %v15758_v14  ;;  %7295 = vrot.lane.b32.xlu1 %v7280_v13, %s11193_s8  ;;  %v5709_v46 = vpop.permute.xlu1 %5708  ;;  %s10435_s8 = sshll.u32 %s270_s29, 4  ;;  %s16466_s8 = int_to_ptr.vmem [resolvable:$true] %s10435_s8 }
 0x304   : > { %v6087_v22 = vsel %vm6000_vm8, %v6079_v26, %v5475_v55  ;;  %v6111_v21 = vsel %vm6000_vm8, %v6103_v40, %v15664_v3  ;;  %v5104_v25 = vrot.slane %v17338_v38, %v11323_v28  ;;  %v5570_v31 = vcombine.low %v17338_v38, %v17339_v11  ;;  %s11127_s16 = scalar_lea.vmem %s16466_s8, 16  ;;  %p11134_p0 = scmp.lt.s32.totalorder %s16466_s8, %s11132_s17 }
 0x305   : > { %v8170_v50 = vcombine.low %v6087_v22, %v6111_v21  ;;  %v8171_v6 = vcombine.high %v6087_v22, %v6111_v21  ;;  %v8169_v42 = vcombine.high %v15611_v29, %v15723_v27  ;;  %v8168_v30 = vcombine.low %v15611_v29, %v15723_v27  ;;  %v5477_v24 = vpop.permute.xlu0 %5476  ;;  %p11128_p11 = scmp.ne.s32.totalorder %s16466_s8, %s11127_s16  ;;  %p11135_p1 = scmp.lt.s32.totalorder %s11133_s18, %s11127_s16 }
 0x306   : > { %v15830_v55 = vsel %vm6000_vm8, %v5999_v10, %v15684_v32  ;;  %v6048_v3 = vsel %vm5983_vm5, %v6032_v12, %v15715_v20  ;;  %v10620_v54 = vcombine.low %v8130_v33, %v15608_v48  ;;  %v10622_v8 = vcombine.low %v8167_v47, %v15611_v29  ;;  %v17340_v48 = vld [vmem:[#allocation93_spill] sm:$0xff] }
 0x307   : > { %v15837_v2 = vrot.slane %v8170_v50, %v17155_v60  ;;  %v15840_v16 = vrot.slane %v8171_v6, %v17155_v60  ;;  %v10621_v4 = vcombine.high %v15611_v29, %v8166_v35  ;;  %v10623_v32 = vcombine.high %v15758_v14, %v8168_v30  ;;  %v5833_v11 = vpop.permute.xlu1 %5832  ;;  %p11129_p12 = pnand %p11128_p11, %p11278_p5  ;;  %p11136_p2 = por %p11135_p1, %p11134_p0 }
 0x308   : > { %v6064_v36 = vsel %vm6000_vm8, %v6048_v3, %v4989_v44  ;;  %v5105_v20 = vcombine.low %v15741_v45, %v5104_v25  ;;  %v15847_v19 = vrot.slane %v5570_v31, %v11323_v28  ;;  %v5584_v33 = vrot.slane %v17340_v48, %v11323_v28 }
 0x309   : > { %v8206_v10 = vcombine.high %v15758_v14, %v15837_v2  ;;  %v10628_v13 = vcombine.low %v8169_v42, %v15758_v14  ;;  %v8205_v29 = vcombine.low %v15758_v14, %v15837_v2  ;;  %v8207_v9 = vcombine.low %v15723_v27, %v15840_v16  ;;  %v5353_v47 = vpop.permute.xlu0 %5352  ;;  %p11130_p13 = pneg %p11129_p12 }
 0x30a   : > { %v6072_v44 = vsel %vm5966_vm3, %v5105_v20, %v5229_v61  ;;  %v9175_v12 = vrot.slane %v10620_v54, %v17155_v60  ;;  %v9189_v26 = vrot.slane %v10622_v8, %v17155_v60  ;;  %v9489_v40 = vpack.c.bf16 %v15797_v34, %v15783_v53 }
 0x30b   : > { %v10630_v35 = vcombine.low %v8206_v10, %v15723_v27  ;;  %v9182_v22 = vrot.slane %v10621_v4, %v17155_v60  ;;  %v9196_v21 = vrot.slane %v10623_v32, %v17155_v60  ;;  %v10629_v38 = vcombine.high %v15723_v27, %v8205_v29  ;;  %p11137_p3 = pnand %p11136_p2, %p11130_p13 }
 0x30c   : > { %v8244_v25 = vcombine.low %v15830_v55, %v6064_v36  ;;  %v5585_v61 = vcombine.low %v15847_v19, %v5584_v33  ;;  %v6080_v31 = vsel %vm5983_vm5, %v6072_v44, %v5353_v47  ;;  %v10631_v50 = vcombine.high %v15837_v2, %v8207_v9 }
 0x30d   : > { %v8245_v6 = vcombine.high %v15830_v55, %v6064_v36  ;;  %v9246_v42 = vrot.slane %v10628_v13, %v17155_v60  ;;  %v9260_v30 = vrot.slane %v10630_v35, %v17155_v60  ;;  %v9253_v3 = vrot.slane %v10629_v38, %v17155_v60  ;;  %v6802_v8 = vpop.permute.xlu0 %6801  ;;  %v5957_v36 = vpop.permute.xlu1 %5956 }
 0x30e   : > { %v6096_v54 = vsel %vm5966_vm3, %v5585_v61, %v5709_v46  ;;  %v9198_v4 = vcombine.high %v9175_v12, %v9189_v26  ;;  %v9267_v32 = vrot.slane %v10631_v50, %v17155_v60  ;;  %v9197_v20 = vcombine.low %v9175_v12, %v9189_v26 }
 0x30f   : > { %v6088_v33 = vsel %vm6000_vm8, %v6080_v31, %v5477_v24  ;;  %v9269_v10 = vcombine.high %v9246_v42, %v9260_v30  ;;  %v9200_v29 = vcombine.high %v9182_v22, %v9196_v21  ;;  %v9268_v9 = vcombine.low %v9246_v42, %v9260_v30 }
 0x310   : > { %v6104_v55 = vsel %vm5983_vm5, %v6096_v54, %v5833_v11  ;;  %v9271_v13 = vcombine.high %v9253_v3, %v9267_v32  ;;  %v9199_v44 = vcombine.low %v9182_v22, %v9196_v21  ;;  %v9270_v47 = vcombine.low %v9253_v3, %v9267_v32  ;;  %v17342_v3 = vld [vmem:[#allocation30_spill] sm:$0xff] }
 0x311   : > { %v6112_v35 = vsel %vm6000_vm8, %v6104_v55, %v5957_v36  ;;  %v9526_v38 = vpack.c.bf16 %v9269_v10, %v9198_v4  ;;  %v9525_v46 = vpack.c.bf16 %v9268_v9, %v9197_v20  ;;  %v8208_v61 = vcombine.high %v15723_v27, %v15840_v16  ;;  %v6446_v31 = vpop.permute.xlu0 %6445 }
 0x312   : > { %v8246_v50 = vcombine.low %v6088_v33, %v6112_v35  ;;  %v8247_v12 = vcombine.high %v6088_v33, %v6112_v35  ;;  %v9528_v26 = vpack.c.bf16 %v9271_v13, %v9200_v29  ;;  %v9527_v24 = vpack.c.bf16 %v9270_v47, %v9199_v44  ;;  %v17344_v47 = vld [vmem:[#allocation21_spill] sm:$0xff]  ;;  %v17345_v35 = vld [vmem:[#allocation40_spill] sm:$0xff] }
 0x313   : > { %v7314_v11 = vsel %vm5983_vm5, %v15788_v58, %v17341_v23  ;;  %v8254_v42 = vrot.slane %v8244_v25, %v17155_v60  ;;  %9961 = vmatprep.mubr.bf16.mxu1 %v9526_v38  ;;  %v8261_v22 = vrot.slane %v8245_v6, %v17155_v60  ;;  %v7338_v54 = vsel %vm5983_vm5, %v15793_v15, %v17342_v3  ;;  %v7052_v23 = vpop.permute.xlu1 %7051  ;;  %v17343_v25 = vld [vmem:[#allocation99_spill] sm:$0xff] }
 0x314   : > { %v8268_v21 = vrot.slane %v8246_v50, %v17155_v60  ;;  %v8275_v30 = vrot.slane %v8247_v12, %v17155_v60  ;;  %10057 = vmatprep.mubr.bf16.mxu0 %v9528_v26  ;;  %9962 = vmatmul.mubr.bf16.gmra.mrb[24].mxu1 %v9525_v46  ;;  %v7322_v33 = vsel %vm6000_vm8, %v7314_v11, %v17343_v25  ;;  %v17346_v26 = vld [vmem:[#allocation85_spill] sm:$0xff] }
 0x315   : > { %10058 = vmatmul.mubr.bf16.gmra.mrb[52].mxu0 %v9527_v24  ;;  %v10636_v58 = vcombine.low %v8208_v61, %v8254_v42  ;;  %v7346_v6 = vsel %vm6000_vm8, %v7338_v54, %v7052_v23  ;;  %v6570_v10 = vpop.permute.xlu0 %6569  ;;  %v6593_v38 = vcombine.low %v17345_v35, %v17344_v47  ;;  %v7697_v24 = vcombine.high %v17346_v26, %v17346_v26  ;;  %v17351_v35 = vld [vmem:[#allocation5_spill] sm:$0xff] }
 0x316   : > { %v8276_v4 = vcombine.low %v8254_v42, %v8268_v21  ;;  %v8277_v32 = vcombine.high %v8254_v42, %v8268_v21  ;;  %v8278_v20 = vcombine.low %v8261_v22, %v8275_v30  ;;  %v7626_v29 = vcombine.high %v7322_v33, %v7346_v6 }
 0x317   : > { %v6926_v13 = vpop.permute.xlu1 %6925  ;;  %v9317_v15 = vrot.slane %v10636_v58, %v17155_v60  ;;  %v15907_v11 = vrot.slane %v17346_v26, %v17155_v60  ;;  %v7313_v54 = vsel %vm5983_vm5, %v17328_v17, %v6446_v31  ;;  %v17347_v58 = vld [vmem:[#allocation70_spill] sm:$0xff]  ;;  %v15924_v26 = vrot.slane %v7697_v24, %v17155_v60 }
 0x318   : > { %v10638_v9 = vcombine.low %v8277_v32, %v8261_v22  ;;  %v10637_v55 = vcombine.high %v15840_v16, %v8276_v4  ;;  %v10639_v36 = vcombine.high %v8268_v21, %v8278_v20  ;;  %v7641_v46 = vrot.slane %v7626_v29, %v17155_v60 }
 0x319   : > { %v6326_v61 = vpop.permute.xlu0 %6325  ;;  %v7329_v22 = vsel %vm5966_vm3, %v6593_v38, %v6802_v8  ;;  %v7625_v21 = vcombine.low %v7322_v33, %v7346_v6  ;;  %v7321_v29 = vsel %vm6000_vm8, %v7313_v54, %v6570_v10  ;;  %v7936_v37 = vrot.slane %v15225_v1, %v17155_v60 }
 0x31a   : > { %v9331_v44 = vrot.slane %v10638_v9, %v17155_v60  ;;  %v9324_v50 = vrot.slane %v10637_v55, %v17155_v60  ;;  %v9338_v12 = vrot.slane %v10639_v36, %v17155_v60  ;;  %v7337_v4 = vsel %vm5983_vm5, %v7329_v22, %v6926_v13  ;;  %v17348_v55 = vld [vmem:[#allocation86_spill] sm:$0xff]  ;;  %v17349_v36 = vld [vmem:[#allocation32_spill] sm:$0xff]  ;;  %v17350_v13 = vld [vmem:[#allocation63_spill] sm:$0xff] }
 0x31b   : > { %v7050_v32 = vpop.permute.xlu1 %7049  ;;  %v10582_v25 = vcombine.low %v7641_v46, %v17347_v58  ;;  %v6147_v8 = vcombine.low %v17349_v36, %v17348_v55  ;;  %v7634_v31 = vrot.slane %v7625_v21, %v17155_v60  ;;  %v6138_v38 = vcombine.low %v17351_v35, %v17350_v13  ;;  %v17352_v46 = vld [vmem:[#allocation98_spill] sm:$0xff] }
 0x31c   : > { %v9340_v42 = vcombine.high %v9317_v15, %v9331_v44  ;;  %v9342_v30 = vcombine.high %v9324_v50, %v9338_v12  ;;  %v9339_v3 = vcombine.low %v9317_v15, %v9331_v44  ;;  %v9341_v23 = vcombine.low %v9324_v50, %v9338_v12  ;;  %v17353_v12 = vld [vmem:[#allocation22_spill] sm:$0xff] }
 0x31d   : > { %v7345_v9 = vsel %vm6000_vm8, %v7337_v4, %v7050_v32  ;;  %v6450_v33 = vpop.permute.xlu0 %6449  ;;  %v9488_v10 = vpack.c.bf16 %v17353_v12, %v17352_v46  ;;  %v7307_v21 = vsel %vm5966_vm3, %v6138_v38, %v6326_v61  ;;  %v8586_v32 = vrot.slane %v10582_v25, %v17155_v60  ;;  %v17354_v25 = vld [vmem:[#allocation73_spill] sm:$0xff]  ;;  %v17357_v12 = vld [vmem:[#allocation96_spill] sm:$0xff] }
 0x31e   : > { %v9533_v20 = vpack.c.bf16 %v9340_v42, %v9340_v42  ;;  %v7555_v6 = vcombine.low %v7321_v29, %v7345_v9  ;;  %v7556_v15 = vcombine.high %v7321_v29, %v7345_v9  ;;  %v9535_v44 = vpack.c.bf16 %v9342_v30, %v9342_v30  ;;  %v10747_v30 = vpop.f32.mrb[4].mxu1  ;;  %v17356_v38 = vld [vmem:[#allocation57_spill] sm:$0xff] }
 0x31f   : > { %v9532_v17 = vpack.c.bf16 %v9339_v3, %v9339_v3  ;;  %v9534_v50 = vpack.c.bf16 %v9341_v23, %v9341_v23  ;;  %v6806_v54 = vpop.permute.xlu1 %6805  ;;  %v15930_v3 = vrot.slane %v6147_v8, %v11323_v28  ;;  %v10748_v24 = vpop.f32.mrb[5].mxu1  ;;  %v8572_v61 = vrot.slane %v7634_v31, %v17155_v60 }
 0x320   : > { %9969 = vmatprep.mubr.bf16.mxu1 %v9533_v20  ;;  %v7564_v42 = vrot.slane %v7555_v6, %v17155_v60  ;;  %v7571_v22 = vrot.slane %v7556_v15, %v17155_v60  ;;  %10065 = vmatprep.mubr.bf16.mxu0 %v9535_v44  ;;  %v10750_v29 = vpop.f32.mrb[6].mxu1  ;;  %v15940_v9 = vadd.f32 %v10748_v24, %v10747_v30 }
 0x321   : > { %9970 = vmatmul.mubr.bf16.gmra.mrb[28].mxu1 %v9532_v17  ;;  %10066 = vmatmul.mubr.bf16.gmra.mrb[56].mxu0 %v9534_v50  ;;  %v6574_v4 = vpop.permute.xlu0 %6573  ;;  %v10751_v55 = vpop.f32.mrb[7].mxu1  ;;  %v7727_v36 = vcombine.high %v17347_v58, %v15907_v11  ;;  %v7729_v8 = vcombine.high %v17354_v25, %v15924_v26  ;;  %v7736_v6 = vcombine.high %v7307_v21, %v7307_v21  ;;  %v17355_v58 = vld [vmem:[#allocation81_spill] sm:$0xff] }
 0x322   : > { %10105 = vmatprep.mubr.bf16.mxu1 %v9488_v10  ;;  %v8501_v20 = vrot.slane %v7564_v42, %v17155_v60  ;;  %v8515_v23 = vrot.slane %v7571_v22, %v17155_v60  ;;  %10974 = vmatprep.mubr.msk.bf16.mxu0 %vm5983_vm5, %v9489_v40  ;;  %v15947_v15 = vrot.slane %v7307_v21, %v17155_v60 }
 0x323   : > { %v6930_v44 = vpop.permute.xlu1 %6929  ;;  %v15949_v34 = vadd.f32 %v10751_v55, %v10750_v29  ;;  %v6618_v40 = vcombine.low %v17350_v13, %v15930_v3  ;;  %v8595_v17 = vcombine.high %v8572_v61, %v8586_v32  ;;  %v1495_v35 = vcombine.high %v17246_v59, %v17246_v59  ;;  %v17358_v13 = vld [vmem:[#allocation68_spill] sm:$0xff] }
 0x324   : > { %v8524_v53 = vcombine.high %v8501_v20, %v8515_v23  ;;  %v9487_v50 = vpack.c.bf16 %v17356_v38, %v17355_v58  ;;  %v8163_v46 = vcombine.high %v15758_v14, %v15748_v52  ;;  %v6627_v10 = vcombine.low %v17357_v12, %v15122_v5 }
 0x325   : > { %v6328_v31 = vpop.permute.xlu0 %6327  ;;  %v7331_v42 = vsel %vm5966_vm3, %v6618_v40, %v6806_v54  ;;  %v10588_v30 = vcombine.low %v7727_v36, %v17354_v25  ;;  %v10590_v24 = vcombine.low %v7729_v8, %v17358_v13  ;;  %v15965_v29 = vrot.slane %v7736_v6, %v17155_v60  ;;  %v17359_v6 = vld [vmem:[#allocation76_spill] sm:$0xff] }
 0x326   : > { %v9495_v22 = vpack.c.bf16 %v8595_v17, %v8524_v53  ;;  %v7766_v59 = vcombine.high %v17358_v13, %v15947_v15  ;;  %v7315_v55 = vsel %vm5983_vm5, %v7307_v21, %v6450_v33  ;;  %v7339_v58 = vsel %vm5983_vm5, %v7331_v42, %v6930_v44  ;;  %v17360_v33 = vld [vmem:[#allocation125_spill] sm:$0xff] }
 0x327   : > { %v7054_v38 = vpop.permute.xlu1 %7053  ;;  %v7915_v5 = vcombine.high %v15225_v1, %v15225_v1  ;;  %v7323_v54 = vsel %vm6000_vm8, %v7315_v55, %v6574_v4  ;;  %v7099_v53 = vcombine.low %v1495_v35, %v17359_v6  ;;  %v6161_v17 = vrot.slane %v17357_v12, %v11323_v28  ;;  %v17366_v1 = vld [vmem:[#allocation14_spill] sm:$0xff] }
 0x328   : > { %v7347_v36 = vsel %vm6000_vm8, %v7339_v58, %v7054_v38  ;;  %v6641_v21 = vrot.slane %v17360_v33, %v11323_v28  ;;  %v8523_v44 = vcombine.low %v8501_v20, %v8515_v23  ;;  %v8643_v42 = vrot.slane %v10588_v30, %v17155_v60 }
 0x329   : > { %10106 = vmatmul.mubr.bf16.vlgmr.msra.gmra.mrb[32].mxu1 %v9487_v50  ;;  %v6452_v8 = vpop.permute.xlu0 %6451  ;;  %v7773_v40 = vcombine.low %v7323_v54, %v7347_v36  ;;  %v6634_v50 = vrot.slane %v6627_v10, %v11323_v28  ;;  %v8657_v4 = vrot.slane %v10590_v24, %v17155_v60  ;;  %v15984_v55 = vcombine.low %v8163_v46, %v15723_v27  ;;  %v17362_v10 = vld [vmem:[#allocation29_spill] sm:$0xff] }
 0x32a   : > { %10113 = vmatprep.mubr.bf16.mxu1 %v9495_v22  ;;  %v17361_v22 = vld [vmem:[#allocation10_spill] sm:$0xff]  ;;  %v8594_v38 = vcombine.low %v8572_v61, %v8586_v32  ;;  %v7106_v23 = vrot.slane %v7099_v53, %v11323_v28  ;;  %v7107_v30 = vcombine.low %v17360_v33, %v17362_v10  ;;  %v17363_v24 = vld [vmem:[#allocation49_spill] sm:$0xff]  ;;  %v16001_v62 = vrot.slane %v7915_v5, %v17155_v60 }
 0x32b   : > { %v7768_v35 = vcombine.high %v17361_v22, %v15965_v29  ;;  %v15989_v58 = vrot.slane %v7773_v40, %v17155_v60  ;;  %v6808_v12 = vpop.permute.xlu1 %6807  ;;  %v10596_v6 = vcombine.low %v7766_v59, %v17361_v22  ;;  %v7082_v46 = vcombine.low %v17364_v7, %v17363_v24  ;;  %v17365_v24 = vld [vmem:[#allocation16_spill] sm:$0xff] }
 0x32c   : > { %v9494_v40 = vpack.c.bf16 %v8594_v38, %v8523_v44  ;;  %v6162_v32 = vcombine.low %v15930_v3, %v6161_v17  ;;  %v6642_v61 = vcombine.low %v6634_v50, %v6641_v21  ;;  %v7098_v59 = vcombine.low %v15930_v3, %v6634_v50 }
 0x32d   : > { %v6576_v20 = vpop.permute.xlu0 %6575  ;;  %v10598_v52 = vcombine.low %v7768_v35, %v15989_v58  ;;  %v8666_v33 = vcombine.high %v8643_v42, %v8657_v4  ;;  %v8714_v10 = vrot.slane %v10596_v6, %v17155_v60  ;;  %v7074_v43 = vcombine.low %v17366_v1, %v17365_v24 }
 0x32e   : > { %v7774_v35 = vcombine.high %v7323_v54, %v7347_v36  ;;  %v7114_v5 = vrot.slane %v7107_v30, %v11323_v28  ;;  %v7121_v38 = vrot.slane %v7106_v23, %v11323_v28  ;;  %v8665_v17 = vcombine.low %v8643_v42, %v8657_v4 }
 0x32f   : > { %v6932_v53 = vpop.permute.xlu1 %6931  ;;  %v8728_v7 = vrot.slane %v10598_v52, %v17155_v60  ;;  %v7767_v3 = vcombine.low %v17361_v22, %v15965_v29  ;;  %v7308_v6 = vsel %vm5966_vm3, %v6162_v32, %v6328_v31  ;;  %v7332_v52 = vsel %vm5966_vm3, %v6642_v61, %v6808_v12 }
 0x330   : > { %v7316_v36 = vsel %vm5983_vm5, %v7308_v6, %v6452_v8  ;;  %v7340_v23 = vsel %vm5983_vm5, %v7332_v52, %v6932_v53  ;;  %v7081_v22 = vrot.slane %v7074_v43, %v11323_v28  ;;  %v16023_v30 = vrot.slane %v7774_v35, %v17155_v60  ;;  %v17370_v6 = vld [vmem:[#allocation89_spill] sm:$0xff] }
 0x331   : > { %10114 = vmatmul.mubr.bf16.gmra.mrb[36].mxu1 %v9494_v40  ;;  %v7286_v44 = vpop.permute.xlu0 %7285  ;;  %v8737_v21 = vcombine.high %v8714_v10, %v8728_v7  ;;  %v8736_v40 = vcombine.low %v8714_v10, %v8728_v7  ;;  %v7765_v8 = vcombine.low %v17358_v13, %v15947_v15  ;;  %v17368_v10 = vld [vmem:[#allocation103_spill] sm:$0xff]  ;;  %v16035_v7 = vcombine.high %v15947_v15, %v7767_v3 }
 0x332   : > { %v7355_v50 = vsel %vm5966_vm3, %v7098_v59, %v7286_v44  ;;  %v7324_v59 = vsel %vm6000_vm8, %v7316_v36, %v6576_v20  ;;  %v7122_v24 = vcombine.low %v7114_v5, %v7121_v38  ;;  %v16042_v1 = vrot.slane %v7936_v37, %v17155_v60  ;;  %v17375_v37 = vld [vmem:[#allocation80_spill] sm:$0xff] }
 0x333   : > { %v7775_v56 = vcombine.high %v7355_v50, %v7355_v50  ;;  %v16017_v54 = vrot.slane %v7355_v50, %v17155_v60  ;;  %v7056_v42 = vpop.permute.xlu1 %7055  ;;  %v9502_v4 = vpack.c.bf16 %v8737_v21, %v8666_v33  ;;  %v9501_v53 = vpack.c.bf16 %v8736_v40, %v8665_v17  ;;  %v17367_v33 = vld [vmem:[#allocation106_spill] sm:$0xff]  ;;  %v17369_v40 = vld [vmem:[#allocation51_spill] sm:$0xff] }
 0x334   : > { %v7348_v31 = vsel %vm6000_vm8, %v7340_v23, %v7056_v42  ;;  %v6172_v43 = vcombine.low %v17368_v10, %v17367_v33  ;;  %v7089_v21 = vrot.slane %v7082_v46, %v11323_v28  ;;  %v7096_v50 = vrot.slane %v7081_v22, %v11323_v28 }
 0x335   : > { %v16028_v12 = vrot.slane %v7775_v56, %v17155_v60  ;;  %v6330_v32 = vpop.permute.xlu0 %6329  ;;  %v7843_v61 = vcombine.low %v7324_v59, %v7348_v31  ;;  %10121 = vmatprep.mubr.bf16.mxu1 %v9502_v4  ;;  %v7805_v20 = vcombine.high %v15989_v58, %v16017_v54  ;;  %v7844_v35 = vcombine.high %v7324_v59, %v7348_v31  ;;  %v17371_v31 = vld [vmem:[#allocation113_spill] sm:$0xff] }
 0x336   : > { %v16055_v5 = vcombine.high %v15924_v26, %v7765_v8  ;;  %v6163_v52 = vcombine.low %v17370_v6, %v17369_v40  ;;  %v8721_v36 = vrot.slane %v16035_v7, %v17155_v60  ;;  %v16066_v46 = vrot.slane %v6172_v43, %v11323_v28  ;;  %v17373_v6 = vld [vmem:[#allocation46_spill] sm:$0xff] }
 0x337   : > { %v7807_v56 = vcombine.high %v16023_v30, %v16028_v12  ;;  %v7288_v44 = vpop.permute.xlu1 %7287  ;;  %v16047_v17 = vrot.slane %v7843_v61, %v17155_v60  ;;  %v10604_v23 = vcombine.low %v7805_v20, %v16023_v30  ;;  %v16070_v4 = vrot.slane %v7844_v35, %v17155_v60  ;;  %v17372_v61 = vld [vmem:[#allocation114_spill] sm:$0xff] }
 0x338   : > { %v7356_v15 = vsel %vm5966_vm3, %v7122_v24, %v7288_v44  ;;  %v6186_v8 = vrot.slane %v17371_v31, %v11323_v28  ;;  %v16080_v33 = vadd.f32 %v15940_v9, %v15558_v57  ;;  %v7097_v10 = vcombine.low %v7089_v21, %v7096_v50 }
 0x339   : > { %10122 = vmatmul.mubr.bf16.gmra.mrb[40].mxu1 %v9501_v53  ;;  %v6454_v3 = vpop.permute.xlu0 %6453  ;;  %v16058_v38 = vrot.slane %v7356_v15, %v17155_v60  ;;  %v10606_v42 = vcombine.low %v7807_v56, %v16047_v17  ;;  %v6652_v53 = vcombine.low %v17371_v31, %v17372_v61  ;;  %v7728_v20 = vcombine.low %v17354_v25, %v15924_v26 }
 0x33a   : > { %v16087_v56 = vadd.f32 %v15949_v34, %v15558_v57  ;;  %v6643_v35 = vcombine.low %v17369_v40, %v16066_v46  ;;  %v7073_v9 = vcombine.low %v17344_v47, %v17373_v6  ;;  %v8785_v50 = vrot.slane %v10604_v23, %v17155_v60 }
 0x33b   : > { %v7875_v22 = vcombine.high %v16047_v17, %v16058_v38  ;;  %v6810_v59 = vpop.permute.xlu1 %6809  ;;  %v8799_v43 = vrot.slane %v10606_v42, %v17155_v60  ;;  %v17374_v42 = vld [vmem:[#allocation28_spill] sm:$0xff]  ;;  %v8664_v57 = vrot.slane %v16055_v5, %v17155_v60  ;;  %v7845_v25 = vcombine.high %v7356_v15, %v7356_v15 }
 0x33c   : > { %v6666_v26 = vrot.slane %v17374_v42, %v11323_v28  ;;  %v16101_v31 = vcombine.low %v16066_v46, %v6186_v8  ;;  %v16104_v40 = vrot.slane %v6652_v53, %v11323_v28  ;;  %v10589_v23 = vcombine.high %v15907_v11, %v7728_v20 }
 0x33d   : > { %v10610_v24 = vcombine.low %v7875_v22, %v16070_v4  ;;  %v7284_v44 = vpop.permute.xlu0 %7283  ;;  %v8808_v47 = vcombine.high %v8785_v50, %v8799_v43  ;;  %v7333_v5 = vsel %vm5966_vm3, %v6643_v35, %v6810_v59  ;;  %v16114_v8 = vsel %vm5966_vm3, %v6163_v52, %v6330_v32 }
 0x33e   : > { %v7354_v21 = vsel %vm5966_vm3, %v7097_v10, %v7284_v44  ;;  %v8807_v10 = vcombine.low %v8785_v50, %v8799_v43  ;;  %v7804_v44 = vcombine.low %v15989_v58, %v16017_v54  ;;  %v7873_v20 = vrot.slane %v7845_v25, %v17155_v60 }
 0x33f   : > { %v7627_v22 = vcombine.high %v7354_v21, %v7354_v21  ;;  %v8856_v61 = vrot.slane %v10610_v24, %v17155_v60  ;;  %v7648_v15 = vrot.slane %v7354_v21, %v17155_v60  ;;  %v7317_v58 = vsel %vm5983_vm5, %v16114_v8, %v6454_v3 }
 0x340   : > { %v6934_v34 = vpop.permute.xlu1 %6933 }
 0x341   : > { %v7655_v6 = vrot.slane %v7627_v22, %v17155_v60  ;;  %v7341_v53 = vsel %vm5983_vm5, %v7333_v5, %v6934_v34  ;;  %v8879_v13 = vcombine.high %v8856_v61, %v17375_v37  ;;  %v8878_v43 = vcombine.low %v8856_v61, %v17375_v37  ;;  %v17376_v34 = vld [vmem:[#allocation102_spill] sm:$0xff] }
 0x342   : > { %v10578_v22 = vcombine.high %v17376_v34, %v17294_v39  ;;  %v8579_v37 = vrot.slane %v7648_v15, %v17155_v60  ;;  %v10599_v61 = vcombine.high %v15965_v29, %v7804_v44  ;;  %v17377_v39 = vld [vmem:[#allocation45_spill] sm:$0xff]  ;;  %v7876_v15 = vcombine.low %v16070_v4, %v7873_v20 }
 0x343   : > { %v10583_v59 = vcombine.low %v7655_v6, %v15907_v11  ;;  %v9509_v52 = vpack.c.bf16 %v8879_v13, %v8808_v47  ;;  %v9508_v50 = vpack.c.bf16 %v8878_v43, %v8807_v10  ;;  %v6188_v11 = vcombine.low %v15741_v45, %v15847_v19 }
 0x344   : > { %v7058_v24 = vpop.permute.xlu0 %7057  ;;  %v6578_v35 = vpop.permute.xlu1 %6577  ;;  %v6667_v13 = vcombine.low %v16104_v40, %v6666_v26  ;;  %v6197_v47 = vcombine.low %v17340_v48, %v17318_v18  ;;  %v6677_v10 = vcombine.low %v17377_v39, %v15676_v0  ;;  %v8650_v43 = vrot.slane %v10589_v23, %v17155_v60  ;;  %v17378_v18 = vld [vmem:[#allocation104_spill] sm:$0xff] }
 0x345   : > { %v16124_v21 = vsel %vm6000_vm8, %v7341_v53, %v7058_v24  ;;  %v16127_v32 = vsel %vm6000_vm8, %v7317_v58, %v6578_v35  ;;  %v8593_v25 = vrot.slane %v10583_v59, %v17155_v60  ;;  %10129 = vmatprep.mubr.bf16.mxu1 %v9509_v52  ;;  %v7806_v29 = vcombine.low %v16023_v30, %v16028_v12 }
 0x346   : > { %v7991_v3 = vcombine.low %v16127_v32, %v16124_v21  ;;  %10130 = vmatmul.mubr.bf16.gmra.mrb[44].mxu1 %v9508_v50  ;;  %v7131_v44 = vrot.slane %v10578_v22, %v11323_v28  ;;  %v7132_v48 = vcombine.low %v17374_v42, %v17378_v18  ;;  %v7874_v0 = vcombine.low %v16047_v17, %v16058_v38 }
 0x347   : > { %v8596_v6 = vcombine.low %v8579_v37, %v8593_v25  ;;  %v8735_v23 = vrot.slane %v10599_v61, %v17155_v60  ;;  %v16158_v30 = vrot.slane %v6197_v47, %v11323_v28  ;;  %v16165_v42 = vrot.slane %v6677_v10, %v11323_v28  ;;  %v17379_v47 = vld [vmem:[#allocation97_spill] sm:$0xff] }
 0x348   : > { %v6332_v5 = vpop.permute.xlu0 %6331  ;;  %v8000_v53 = vrot.slane %v7991_v3, %v17155_v60  ;;  %v7282_v24 = vpop.permute.xlu1 %7281  ;;  %v10611_v17 = vcombine.high %v16058_v38, %v7876_v15  ;;  %v8667_v34 = vcombine.low %v8650_v43, %v8664_v57  ;;  %v10605_v22 = vcombine.high %v16017_v54, %v7806_v29 }
 0x349   : > { %v7353_v26 = vsel %vm5966_vm3, %v7073_v9, %v7282_v24  ;;  %v16162_v9 = vrot.slane %v15984_v55, %v17155_v60  ;;  %v7139_v25 = vrot.slane %v7132_v48, %v11323_v28  ;;  %v7146_v55 = vrot.slane %v7131_v44, %v11323_v28 }
 0x34a   : > { %v9012_v4 = vrot.slane %v8000_v53, %v17155_v60  ;;  %v7557_v20 = vcombine.high %v7353_v26, %v7353_v26  ;;  %v7578_v58 = vrot.slane %v7353_v26, %v17155_v60  ;;  %v10607_v3 = vcombine.high %v16028_v12, %v7874_v0  ;;  %v17380_v53 = vld [vmem:[#allocation84_spill] sm:$0xff] }
 0x34b   : > { %v8738_v54 = vcombine.low %v8721_v36, %v8735_v23  ;;  %v7123_v57 = vcombine.low %v16066_v46, %v16104_v40  ;;  %v8863_v12 = vrot.slane %v10611_v17, %v17155_v60  ;;  %v7148_v26 = vcombine.low %v16158_v30, %v16165_v42 }
 0x34c   : > { %v6456_v59 = vpop.permute.xlu0 %6455  ;;  %v7585_v35 = vrot.slane %v7557_v20, %v17155_v60  ;;  %v6812_v52 = vpop.permute.xlu1 %6811  ;;  %v9021_v50 = vcombine.high %v15427_v51, %v9012_v4  ;;  %v9020_v37 = vcombine.low %v15427_v51, %v9012_v4  ;;  %v8508_v61 = vrot.slane %v7578_v58, %v17155_v60 }
 0x34d   : > { %v6668_v51 = vcombine.low %v15847_v19, %v16158_v30  ;;  %v6211_v44 = vrot.slane %v17377_v39, %v11323_v28  ;;  %v8792_v7 = vrot.slane %v10605_v22, %v17155_v60  ;;  %v16192_v36 = vcombine.low %v7139_v25, %v7146_v55 }
 0x34e   : > { %v8522_v38 = vrot.slane %v7585_v35, %v17155_v60  ;;  %v9516_v10 = vpack.c.bf16 %v9021_v50, %v17379_v47  ;;  %v9515_v24 = vpack.c.bf16 %v9020_v37, %v17380_v53  ;;  %v6691_v18 = vrot.slane %v15695_v41, %v11323_v28 }
 0x34f   : > { %v17381_v48 = vcombine.high %v15723_v27, %v15729_v49  ;;  %v8806_v4 = vrot.slane %v10607_v3, %v17155_v60  ;;  %v7992_v20 = vcombine.high %v16127_v32, %v16124_v21  ;;  %v7310_v23 = vsel %vm5966_vm3, %v16101_v31, %v6332_v5  ;;  %v10811_v27 = vpop.f32.mrb[32].mxu0 }
 0x350   : > { %v6580_v15 = vpop.permute.xlu0 %6579  ;;  %v8525_v43 = vcombine.low %v8508_v61, %v8522_v38  ;;  %10137 = vmatprep.mubr.bf16.mxu1 %v9516_v10  ;;  %v7954_v17 = vcombine.high %v16114_v8, %v16114_v8  ;;  %v7334_v35 = vsel %vm5966_vm3, %v6667_v13, %v6812_v52  ;;  %v7318_v50 = vsel %vm5983_vm5, %v7310_v23, %v6456_v59  ;;  %v10812_v32 = vpop.f32.mrb[33].mxu0 }
 0x351   : > { %v6936_v29 = vpop.permute.xlu1 %6935  ;;  %10138 = vmatmul.mubr.bf16.gmra.mrb[48].mxu1 %v9515_v24  ;;  %v10624_v0 = vcombine.low %v17381_v48, %v15837_v2  ;;  %v9503_v22 = vpack.c.bf16 %v8738_v54, %v8667_v34  ;;  %v7326_v55 = vsel %vm6000_vm8, %v7318_v50, %v6580_v15  ;;  %v8880_v21 = vcombine.low %v8863_v12, %v16042_v1  ;;  %v10814_v52 = vpop.f32.mrb[34].mxu0 }
 0x352   : > { %v9496_v58 = vpack.c.bf16 %v8596_v6, %v8525_v43  ;;  %v7342_v25 = vsel %vm5983_vm5, %v7334_v35, %v6936_v29  ;;  %v10813_v59 = vadd.f32 %v10812_v32, %v10811_v27  ;;  %v8007_v34 = vrot.slane %v7992_v20, %v17155_v60  ;;  %v10815_v45 = vpop.f32.mrb[35].mxu0 }
 0x353   : > { %v8809_v47 = vcombine.low %v8792_v7, %v8806_v4  ;;  %v7975_v24 = vrot.slane %v16114_v8, %v17155_v60  ;;  %v10816_v29 = vadd.f32 %v10815_v45, %v10814_v52  ;;  %v16246_v23 = vrot.slane %v7954_v17, %v17155_v60 }
 0x354   : > { %v6334_v37 = vpop.permute.xlu0 %6333  ;;  %10975 = vmatmul.mubr.msk.bf16.vlgmr.msra.gmra.mrb[60].mxu0 %vm5983_vm5, %v9496_v58  ;;  %v16227_v53 = vadd.f32 %v10813_v59, %v16080_v33  ;;  %v9069_v35 = vrot.slane %v8007_v34, %v17155_v60  ;;  %v17387_v39 = vrot.slane %v15764_v63, %v17155_v60 }
 0x355   : > { %v7060_v3 = vpop.permute.xlu1 %7059  ;;  %v7311_v31 = vsel %vm5966_vm3, %v6188_v11, %v6334_v37  ;;  %10978 = vmatprep.mubr.msk.bf16.mxu0 %vm5983_vm5, %v9503_v22  ;;  %v9510_v4 = vpack.c.bf16 %v8880_v21, %v8809_v47  ;;  %v16242_v8 = vadd.f32 %v10816_v29, %v16087_v56  ;;  %v17382_v22 = vld [vmem:[#allocation112_spill] sm:$0xff]  ;;  %v16252_v37 = vrot.slane %v7975_v24, %v17155_v60 }
 0x356   : > { %v7350_v5 = vsel %vm6000_vm8, %v7342_v25, %v7060_v3  ;;  %v8172_v13 = vcombine.high %v7311_v31, %v7311_v31  ;;  %v8193_v6 = vrot.slane %v7311_v31, %v17155_v60 }
 0x357   : > { %v8061_v61 = vcombine.low %v7326_v55, %v7350_v5  ;;  %v8062_v38 = vcombine.high %v7326_v55, %v7350_v5  ;;  %v10753_v17 = vpop.f32.mrb[8].mxu1 }
 0x358   : > { %v16222_v11 = vrot.slane %v8172_v13, %v17155_v60  ;;  %v8201_v1 = vcombine.low %v15837_v2, %v8193_v6  ;;  %v8202_v10 = vcombine.high %v15837_v2, %v8193_v6  ;;  %v6458_v15 = vpop.permute.xlu0 %6457  ;;  %v16237_v2 = vrot.slane %v10624_v0, %v17155_v60  ;;  %v10754_v21 = vpop.f32.mrb[9].mxu1 }
 0x359   : > { %v8070_v54 = vrot.slane %v8061_v61, %v17155_v60  ;;  %v8077_v12 = vrot.slane %v8062_v38, %v17155_v60  ;;  %v6814_v43 = vpop.permute.xlu1 %6813  ;;  %v2156_v0 = vcombine.high %v17382_v22, %v17382_v22  ;;  %v7319_v56 = vsel %vm5983_vm5, %v7311_v31, %v6458_v15 }
 0x35a   : > { %v8203_v7 = vcombine.low %v15840_v16, %v16222_v11  ;;  %v10625_v48 = vcombine.high %v15729_v49, %v8201_v1  ;;  %v10626_v58 = vcombine.low %v8202_v10, %v15840_v16  ;;  %v10817_v24 = vpop.f32.mrb[36].mxu0 }
 0x35b   : > { %v9083_v33 = vrot.slane %v8070_v54, %v17155_v60  ;;  %v10616_v20 = vcombine.low %v8077_v12, %v15758_v14  ;;  %v7335_v14 = vsel %vm5966_vm3, %v6668_v51, %v6814_v43  ;;  %v10755_v51 = vadd.f32 %v10754_v21, %v10753_v17  ;;  %v16284_v43 = vld [vmem:[%s16510_s4] ss:$0 sm:$0xff] }
 0x35c   : > { %v10627_v50 = vcombine.high %v8193_v6, %v8203_v7  ;;  %v6582_v49 = vpop.permute.xlu0 %6581  ;;  %10979 = vmatmul.mubr.msk.bf16.gmra.mrb[64].mxu0 %vm5983_vm5, %v9510_v4  ;;  %v16263_v32 = vrot.slane %v10626_v58, %v17155_v60  ;;  %v9218_v5 = vrot.slane %v10625_v48, %v17155_v60  ;;  %v10756_v6 = vpop.f32.mrb[10].mxu1 }
 0x35d   : > { %v6938_v27 = vpop.permute.xlu1 %6937  ;;  %v9140_v25 = vrot.slane %v10616_v20, %v17155_v60  ;;  %v9092_v3 = vcombine.high %v9069_v35, %v9083_v33  ;;  %v9091_v13 = vcombine.low %v9069_v35, %v9083_v33  ;;  %v7327_v59 = vsel %vm6000_vm8, %v7319_v56, %v6582_v49  ;;  %v10757_v34 = vpop.f32.mrb[11].mxu1  ;;  %v17383_v56 = vld [vmem:[#allocation77_spill] sm:$0xff] }
 0x35e   : > { %v9232_v55 = vrot.slane %v10627_v50, %v17155_v60  ;;  %v9234_v61 = vcombine.high %v16237_v2, %v16263_v32  ;;  %v9233_v38 = vcombine.low %v16237_v2, %v16263_v32  ;;  %v7343_v45 = vsel %vm5983_vm5, %v7335_v14, %v6938_v27  ;;  %v10818_v48 = vpop.f32.mrb[37].mxu0 }
 0x35f   : > { %v9163_v19 = vcombine.high %v9140_v25, %v16162_v9  ;;  %v9162_v31 = vcombine.low %v9140_v25, %v16162_v9  ;;  %v9932_v29 = vadd.f32 %v16284_v43, %v10755_v51  ;;  %v10758_v7 = vadd.f32 %v10757_v34, %v10756_v6  ;;  %v10820_v58 = vpop.f32.mrb[38].mxu0 }
 0x360   : > { %v7294_v52 = vpop.permute.xlu0 %7293  ;;  %v16273_v47 = vcombine.low %v9218_v5, %v9232_v55  ;;  %v9005_v35 = vrot.slane %v16246_v23, %v17155_v60  ;;  %v8204_v50 = vcombine.high %v15840_v16, %v16222_v11  ;;  %v10821_v14 = vpop.f32.mrb[39].mxu0  ;;  %v7149_v27 = vcombine.low %v17383_v56, %v2156_v0 }
 0x361   : > { %v7062_v1 = vpop.permute.xlu1 %7061  ;;  %v9523_v10 = vpack.c.bf16 %v9163_v19, %v9092_v3  ;;  %v7359_v9 = vsel %vm5966_vm3, %v7148_v26, %v7294_v52  ;;  %v9522_v15 = vpack.c.bf16 %v9162_v31, %v9091_v13  ;;  %v10819_v26 = vadd.f32 %v10818_v48, %v10817_v24  ;;  %v17385_v48 = vld [vmem:[#allocation50_spill] sm:$0xff] }
 0x362   : > { %v7351_v54 = vsel %vm6000_vm8, %v7343_v45, %v7062_v1  ;;  %v8211_v12 = vcombine.high %v7359_v9, %v7359_v9  ;;  %v8232_v20 = vrot.slane %v7359_v9, %v17155_v60  ;;  %v10822_v0 = vadd.f32 %v10821_v14, %v10820_v58 }
 0x363   : > { %v8209_v4 = vcombine.low %v7327_v59, %v7351_v54  ;;  %v8210_v33 = vcombine.high %v7327_v59, %v7351_v54  ;;  %10145 = vmatprep.mubr.bf16.mxu1 %v9523_v10  ;;  %v16304_v16 = vadd.f32 %v10819_v26, %v9932_v29  ;;  %v17384_v10 = vrot.slane %v16001_v62, %v17155_v60 }
 0x364   : > { %v16293_v49 = vrot.slane %v8211_v12, %v17155_v60  ;;  %10146 = vmatmul.mubr.bf16.gmra.mrb[52].mxu1 %v9522_v15  ;;  %v7290_v22 = vpop.permute.xlu0 %7289  ;;  %v9935_v24 = vadd.f32 %v16284_v43, %v10758_v7  ;;  %v7156_v58 = vrot.slane %v7149_v27, %v11323_v28  ;;  %v6692_v27 = vcombine.low %v16165_v42, %v6691_v18 }
 0x365   : > { %v8218_v17 = vrot.slane %v8209_v4, %v17155_v60  ;;  %v16298_v25 = vrot.slane %v8210_v33, %v17155_v60  ;;  %v7292_v55 = vpop.permute.xlu1 %7291  ;;  %v7357_v23 = vsel %vm5966_vm3, %v7123_v57, %v7290_v22  ;;  %v8951_v9 = vcombine.low %v17384_v10, %v16252_v37 }
 0x366   : > { %v7358_v3 = vsel %vm5966_vm3, %v16192_v36, %v7292_v55  ;;  %v7993_v21 = vcombine.high %v7357_v23, %v7357_v23  ;;  %v8014_v5 = vrot.slane %v7357_v23, %v17155_v60  ;;  %v7157_v4 = vcombine.low %v15695_v41, %v17385_v48 }
 0x367   : > { %v10632_v19 = vcombine.low %v8204_v50, %v8218_v17  ;;  %v8240_v51 = vcombine.low %v8218_v17, %v8232_v20  ;;  %v8241_v13 = vcombine.high %v8218_v17, %v8232_v20  ;;  %v8242_v31 = vcombine.low %v16298_v25, %v16293_v49 }
 0x368   : > { %v8243_v46 = vcombine.high %v16298_v25, %v16293_v49  ;;  %v8063_v40 = vcombine.high %v7358_v3, %v7358_v3  ;;  %v8084_v57 = vrot.slane %v7358_v3, %v17155_v60  ;;  %v8021_v6 = vrot.slane %v7993_v21, %v17155_v60  ;;  %v6816_v59 = vpop.permute.xlu0 %6815 }
 0x369   : > { %v10633_v36 = vcombine.high %v16222_v11, %v8240_v51  ;;  %v10634_v52 = vcombine.low %v8241_v13, %v16298_v25  ;;  %v10635_v34 = vcombine.high %v8232_v20, %v8242_v31  ;;  %v9019_v45 = vrot.slane %v8014_v5, %v17155_v60  ;;  %v6336_v1 = vpop.permute.xlu1 %6335  ;;  %v17386_v20 = vld [vmem:[#allocation101_spill] sm:$0xff] }
 0x36a   : > { %v8091_v15 = vrot.slane %v8063_v40, %v17155_v60  ;;  %v9076_v54 = vrot.slane %v8021_v6, %v17155_v60  ;;  %v9090_v33 = vrot.slane %v8084_v57, %v17155_v60  ;;  %v16331_v62 = vadd.f32 %v10822_v0, %v9935_v24 }
 0x36b   : > { %v9289_v12 = vrot.slane %v10633_v36, %v17155_v60  ;;  %v9303_v11 = vrot.slane %v10635_v34, %v17155_v60  ;;  %v9022_v29 = vcombine.low %v9005_v35, %v9019_v45  ;;  %v9282_v50 = vrot.slane %v10632_v19, %v17155_v60 }
 0x36c   : > { %v10617_v26 = vcombine.low %v8091_v15, %v17386_v20  ;;  %v9296_v22 = vrot.slane %v10634_v52, %v17155_v60  ;;  %v9093_v17 = vcombine.low %v9076_v54, %v9090_v33  ;;  %v6212_v55 = vcombine.low %v16158_v30, %v6211_v44 }
 0x36d   : > { %v6460_v7 = vpop.permute.xlu1 %6459  ;;  %v9517_v14 = vpack.c.bf16 %v9022_v29, %v8951_v9  ;;  %v9306_v56 = vcombine.low %v9289_v12, %v9303_v11  ;;  %v7164_v5 = vrot.slane %v7157_v4, %v11323_v28  ;;  %v7336_v19 = vsel %vm5966_vm3, %v6692_v27, %v6816_v59 }
 0x36e   : > { %v6940_v37 = vpop.permute.xlu0 %6939  ;;  %v9147_v35 = vrot.slane %v10617_v26, %v17155_v60  ;;  %v9305_v23 = vcombine.high %v9282_v50, %v9296_v22  ;;  %v9304_v3 = vcombine.low %v9282_v50, %v9296_v22  ;;  %v7312_v0 = vsel %vm5966_vm3, %v6212_v55, %v6336_v1 }
 0x36f   : > { %10982 = vmatprep.mubr.msk.bf16.mxu0 %vm5983_vm5, %v9517_v14  ;;  %v9531_v21 = vpack.c.bf16 %v9306_v56, %v16273_v47  ;;  %v7171_v41 = vrot.slane %v7156_v58, %v11323_v28  ;;  %v7320_v42 = vsel %vm5983_vm5, %v7312_v0, %v6460_v7  ;;  %v7344_v44 = vsel %vm5983_vm5, %v7336_v19, %v6940_v37 }
 0x370   : > { %v9164_v30 = vcombine.low %v9147_v35, %v17387_v39  ;;  %v9530_v47 = vpack.c.bf16 %v9305_v23, %v9234_v61  ;;  %v9529_v51 = vpack.c.bf16 %v9304_v3, %v9233_v38 }
 0x371   : > { %v6584_v18 = vpop.permute.xlu1 %6583  ;;  %v7172_v57 = vcombine.low %v7164_v5, %v7171_v41  ;;  %v10759_v32 = vpop.f32.mrb[12].mxu1 }
 0x372   : > { %v7064_v13 = vpop.permute.xlu0 %7063  ;;  %v7328_v31 = vsel %vm6000_vm8, %v7320_v42, %v6584_v18  ;;  %v9524_v63 = vpack.c.bf16 %v9164_v30, %v9093_v17  ;;  %10153 = vmatprep.mubr.bf16.mxu1 %v9530_v47  ;;  %v10760_v52 = vpop.f32.mrb[13].mxu1 }
 0x373   : > { %v7352_v40 = vsel %vm6000_vm8, %v7344_v44, %v7064_v13  ;;  %10154 = vmatmul.mubr.bf16.gmra.mrb[56].mxu1 %v9529_v51  ;;  %v10761_v45 = vadd.f32 %v10760_v52, %v10759_v32  ;;  %v10762_v1 = vpop.f32.mrb[14].mxu1 }
 0x374   : > { %v8279_v28 = vcombine.low %v7328_v31, %v7352_v40  ;;  %10983 = vmatmul.mubr.msk.bf16.gmra.mrb[68].mxu0 %vm5983_vm5, %v9524_v63  ;;  %v8280_v6 = vcombine.high %v7328_v31, %v7352_v40  ;;  %v10763_v54 = vpop.f32.mrb[15].mxu1 }
 0x375   : > { %10986 = vmatprep.mubr.msk.bf16.mxu0 %vm5983_vm5, %v9531_v21  ;;  %v7296_v61 = vpop.permute.xlu1 %7295  ;;  %v10764_v12 = vadd.f32 %v10763_v54, %v10762_v1  ;;  %v9940_v56 = vadd.f32 %v16284_v43, %v10761_v45  ;;  %v279_v54 = vld [vmem:[%s16511_s5 + $0x8] sm:$0xff] }
 0x376   : > { %v8288_v59 = vrot.slane %v8279_v28, %v17155_v60  ;;  %v7360_v2 = vsel %vm5966_vm3, %v7172_v57, %v7296_v61  ;;  %v8295_v10 = vrot.slane %v8280_v6, %v17155_v60 }
 0x377   : > { %v8281_v38 = vcombine.high %v7360_v2, %v7360_v2  ;;  %v8302_v36 = vrot.slane %v7360_v2, %v17155_v60  ;;  %v9943_v27 = vadd.f32 %v16284_v43, %v10764_v12  ;;  %v11196_v12 = vmov 0.0|0.0  }
 0x378   : > { %v10640_v34 = vcombine.low %v8243_v46, %v8288_v59  ;;  %11001 = vmatprep.subr.bf16.mxu0 %v11196_v12 }
 0x379   : > { %v8309_v9 = vrot.slane %v8281_v38, %v17155_v60  ;;  %v8310_v15 = vcombine.low %v8288_v59, %v8302_v36  ;;  %v8311_v24 = vcombine.high %v8288_v59, %v8302_v36 }
 0x37a   : > { %v9353_v33 = vrot.slane %v10640_v34, %v17155_v60 }
 0x37b   : > { %v8312_v11 = vcombine.low %v8295_v10, %v8309_v9  ;;  %v10641_v29 = vcombine.high %v16293_v49, %v8310_v15  ;;  %v10642_v48 = vcombine.low %v8311_v24, %v8295_v10  ;;  %v278_v24 = vld [vmem:[%s16511_s5] sm:$0xff] }
 0x37d   : > { %v10643_v4 = vcombine.high %v8302_v36, %v8312_v11  ;;  %v9367_v25 = vrot.slane %v10642_v48, %v17155_v60  ;;  %v9360_v37 = vrot.slane %v10641_v29, %v17155_v60  ;;  %v11002_v11 = vpack.c.bf16 %v279_v54, %v278_v24 }
 0x37f   : > { %v9374_v46 = vrot.slane %v10643_v4, %v17155_v60  ;;  %v9376_v20 = vcombine.high %v9353_v33, %v9367_v25  ;;  %v9375_v26 = vcombine.low %v9353_v33, %v9367_v25  ;;  %11003 = vmatpush3.bf16.msra.mxu0 %v11002_v11 }
 0x380   : > { %11004 = vmatprep.subr.bf16.mxu0 %v11196_v12 }
 0x381   : > { %v9537_v58 = vpack.c.bf16 %v9376_v20, %v9376_v20  ;;  %v9536_v7 = vpack.c.bf16 %v9375_v26, %v9375_v26  ;;  %v9377_v50 = vcombine.low %v9360_v37, %v9374_v46 }
 0x383   : > { %10161 = vmatprep.mubr.bf16.mxu1 %v9537_v58  ;;  %v9538_v22 = vpack.c.bf16 %v9377_v50, %v9377_v50  ;;  %v10823_v49 = vpop.f32.mrb[40].mxu0 }
 0x384   : > { %10162 = vmatmul.mubr.bf16.gmra.mrb[60].mxu1 %v9536_v7  ;;  %v10824_v14 = vpop.f32.mrb[41].mxu0 }
 0x385   : > { %10987 = vmatmul.mubr.msk.bf16.gmra.mrb[72].mxu0 %vm5983_vm5, %v9538_v22  ;;  %v10825_v35 = vadd.f32 %v10824_v14, %v10823_v49  ;;  %v10826_v17 = vpop.f32.mrb[42].mxu0 }
 0x386   : > { %v10827_v55 = vpop.f32.mrb[43].mxu0 }
 0x387   : > { %v16382_v23 = vadd.f32 %v10825_v35, %v9940_v56  ;;  %v10828_v60 = vadd.f32 %v10827_v55, %v10826_v17  ;;  %v280_v35 = vld [vmem:[%s16511_s5 + $0x10] sm:$0xff]  ;;  %v281_v17 = vld [vmem:[%s16511_s5 + $0x18] sm:$0xff] }
 0x388   : > { %v11005_v55 = vpack.c.bf16 %v281_v17, %v280_v35 }
 0x389   : > { %v16384_v3 = vadd.f32 %v10828_v60, %v9943_v27  ;;  %v10765_v21 = vpop.f32.mrb[16].mxu1  ;;  %v11198_v27 = vmov 0.0  }
 0x38a   : > { %v10766_v5 = vpop.f32.mrb[17].mxu1  ;;  %10998 = vmatprep.mubr.msk.f32.mxu0 %vm11197_vm1, %v11198_v27  ;;  %11006 = vmatpush3.bf16.msra.mxu0 %v11005_v55 }
 0x38b   : > { %v10767_v0 = vadd.f32 %v10766_v5, %v10765_v21  ;;  %v10768_v19 = vpop.f32.mrb[18].mxu1 }
 0x38c   : > { %v10769_v39 = vpop.f32.mrb[19].mxu1 }
 0x38d   : > { %v10770_v30 = vadd.f32 %v10769_v39, %v10768_v19  ;;  %v9948_v44 = vadd.f32 %v16284_v43, %v10767_v0 }
 0x38f   : > { %v9951_v13 = vadd.f32 %v16284_v43, %v10770_v30 }
 0x3a0   : > { %v10829_v41 = vpop.f32.mrb[44].mxu0 }
 0x3a1   : > { %v10830_v42 = vpop.f32.mrb[45].mxu0 }
 0x3a2   : > { %v10831_v18 = vadd.f32 %v10830_v42, %v10829_v41  ;;  %v10832_v47 = vpop.f32.mrb[46].mxu0 }
 0x3a3   : > { %v10833_v51 = vpop.f32.mrb[47].mxu0 }
 0x3a4   : > { %v16388_v31 = vadd.f32 %v10831_v18, %v9948_v44  ;;  %v10834_v63 = vadd.f32 %v10833_v51, %v10832_v47 }
 0x3a6   : > { %v16390_v40 = vadd.f32 %v10834_v63, %v9951_v13 }
 0x3cb   : > { %v10771_v28 = vpop.f32.mrb[20].mxu1 }
 0x3cc   : > { %v10772_v57 = vpop.f32.mrb[21].mxu1 }
 0x3cd   : > { %v10773_v59 = vadd.f32 %v10772_v57, %v10771_v28  ;;  %v10774_v61 = vpop.f32.mrb[22].mxu1 }
 0x3ce   : > { %v10835_v6 = vpop.f32.mrb[48].mxu0  ;;  %v10775_v32 = vpop.f32.mrb[23].mxu1 }
 0x3cf   : > { %v10836_v2 = vpop.f32.mrb[49].mxu0  ;;  %v9956_v38 = vadd.f32 %v16284_v43, %v10773_v59  ;;  %v10776_v34 = vadd.f32 %v10775_v32, %v10774_v61  ;;  %v17388_v59 = vld [vmem:[#allocation15_spill] sm:$0xff] }
 0x3d0   : > { %v10837_v36 = vadd.f32 %v10836_v2, %v10835_v6  ;;  %v10838_v52 = vpop.f32.mrb[50].mxu0  ;;  %v17389_v2 = vld [vmem:[#allocation58_spill] sm:$0xff] }
 0x3d1   : > { %v10839_v45 = vpop.f32.mrb[51].mxu0  ;;  %v9959_v10 = vadd.f32 %v16284_v43, %v10776_v34 }
 0x3d2   : > { %v16393_v1 = vadd.f32 %v10837_v36, %v9956_v38  ;;  %v10840_v9 = vadd.f32 %v10839_v45, %v10838_v52 }
 0x3d4   : > { %v16396_v15 = vadd.f32 %v10840_v9, %v9959_v10 }
 0x3e7   : > { %v10777_v29 = vpop.f32.mrb[24].mxu1 }
 0x3e8   : > { %v10841_v48 = vpop.f32.mrb[52].mxu0  ;;  %v10778_v4 = vpop.f32.mrb[25].mxu1 }
 0x3e9   : > { %v10779_v33 = vadd.f32 %v10778_v4, %v10777_v29  ;;  %v10842_v25 = vpop.f32.mrb[53].mxu0  ;;  %v10780_v46 = vpop.f32.mrb[26].mxu1 }
 0x3ea   : > { %v10843_v20 = vadd.f32 %v10842_v25, %v10841_v48  ;;  %v10844_v26 = vpop.f32.mrb[54].mxu0  ;;  %v10781_v37 = vpop.f32.mrb[27].mxu1 }
 0x3eb   : > { %v9964_v58 = vadd.f32 %v16284_v43, %v10779_v33  ;;  %v10782_v7 = vadd.f32 %v10781_v37, %v10780_v46  ;;  %v10845_v50 = vpop.f32.mrb[55].mxu0 }
 0x3ec   : > { %v10846_v22 = vadd.f32 %v10845_v50, %v10844_v26 }
 0x3ed   : > { %v16405_v49 = vadd.f32 %v10843_v20, %v9964_v58  ;;  %v9967_v14 = vadd.f32 %v16284_v43, %v10782_v7 }
 0x3ef   : > { %v16408_v56 = vadd.f32 %v10846_v22, %v9967_v14 }
 0x3f4   : > { %v10783_v60 = vpop.f32.mrb[28].mxu1  ;;  %v10847_v21 = vpop.f32.mrb[56].mxu0 }
 0x3f5   : > { %v10784_v5 = vpop.f32.mrb[29].mxu1  ;;  %v10848_v19 = vpop.f32.mrb[57].mxu0 }
 0x3f6   : > { %v10785_v0 = vadd.f32 %v10784_v5, %v10783_v60  ;;  %v10786_v39 = vpop.f32.mrb[30].mxu1  ;;  %v10849_v30 = vadd.f32 %v10848_v19, %v10847_v21  ;;  %v10850_v41 = vpop.f32.mrb[58].mxu0 }
 0x3f7   : > { %v10787_v42 = vpop.f32.mrb[31].mxu1  ;;  %v10851_v18 = vpop.f32.mrb[59].mxu0 }
 0x3f8   : > { %v9972_v44 = vadd.f32 %v16284_v43, %v10785_v0 }
 0x3fa   : > { %v16417_v47 = vadd.f32 %v10849_v30, %v9972_v44 }
 0x3fc   : > { %v10869_v51 = vpop.f32.mrb[32].mxu1 }
 0x3fd   : > { %v10870_v13 = vpop.f32.mrb[33].mxu1 }
 0x3fe   : > { %v10871_v63 = vadd.f32 %v10870_v13, %v10869_v51  ;;  %v10872_v28 = vpop.f32.mrb[34].mxu1 }
 0x3ff   : > { %v10873_v57 = vpop.f32.mrb[35].mxu1 }
 0x400   : > { %v10874_v6 = vadd.f32 %v10873_v57, %v10872_v28  ;;  %v10108_v61 = vadd.f32 %v10871_v63, %v17388_v59 }
 0x402   : > { %v10111_v32 = vadd.f32 %v10874_v6, %v17389_v2 }
 0x404   : > { %v10875_v38 = vpop.f32.mrb[36].mxu1 }
 0x405   : > { %v10876_v36 = vpop.f32.mrb[37].mxu1 }
 0x406   : > { %v10877_v52 = vadd.f32 %v10876_v36, %v10875_v38  ;;  %v10878_v34 = vpop.f32.mrb[38].mxu1 }
 0x407   : > { %v10879_v45 = vpop.f32.mrb[39].mxu1 }
 0x408   : > { %v10880_v10 = vadd.f32 %v10879_v45, %v10878_v34  ;;  %v10116_v43 = vadd.f32 %v10877_v52, %v16227_v53 }
 0x40a   : > { %v10119_v9 = vadd.f32 %v10880_v10, %v16242_v8 }
 0x40c   : > { %v10881_v24 = vpop.f32.mrb[40].mxu1 }
 0x40d   : > { %v10882_v54 = vpop.f32.mrb[41].mxu1 }
 0x40e   : > { %v10883_v12 = vadd.f32 %v10882_v54, %v10881_v24  ;;  %v10884_v11 = vpop.f32.mrb[42].mxu1 }
 0x40f   : > { %v10885_v29 = vpop.f32.mrb[43].mxu1 }
 0x410   : > { %v10886_v48 = vadd.f32 %v10885_v29, %v10884_v11  ;;  %v10124_v4 = vadd.f32 %v10883_v12, %v16304_v16 }
 0x412   : > { %v10127_v33 = vadd.f32 %v10886_v48, %v16331_v62 }
 0x419   : > { %v10887_v25 = vpop.f32.mrb[44].mxu1 }
 0x41a   : > { %v10888_v46 = vpop.f32.mrb[45].mxu1 }
 0x41b   : > { %v10889_v20 = vadd.f32 %v10888_v46, %v10887_v25  ;;  %v10890_v26 = vpop.f32.mrb[46].mxu1 }
 0x41c   : > { %v10891_v37 = vpop.f32.mrb[47].mxu1 }
 0x41d   : > { %v10892_v58 = vadd.f32 %v10891_v37, %v10890_v26  ;;  %v10132_v53 = vadd.f32 %v10889_v20, %v16382_v23 }
 0x41f   : > { %v10135_v8 = vadd.f32 %v10892_v58, %v16384_v3 }
 0x424   : > { %v10893_v7 = vpop.f32.mrb[48].mxu1 }
 0x425   : > { %v10894_v50 = vpop.f32.mrb[49].mxu1 }
 0x426   : > { %v10895_v22 = vadd.f32 %v10894_v50, %v10893_v7  ;;  %v10896_v14 = vpop.f32.mrb[50].mxu1 }
 0x427   : > { %v10976_v35 = vpop.f32.mrb[60].mxu0  ;;  %v10897_v17 = vpop.f32.mrb[51].mxu1 }
 0x428   : > { %v10212_v55 = vadd.f32 %v10976_v35, %v10116_v43  ;;  %v10203_v16 = vpop.f32.mrb[61].mxu0  ;;  %v10898_v27 = vadd.f32 %v10897_v17, %v10896_v14  ;;  %v16428_v62 = vadd.f32 %v10895_v22, %v16388_v31 }
 0x429   : > { %v10204_v60 = vadd.f32 %v10203_v16, %v10108_v61  ;;  %v10977_v21 = vpop.f32.mrb[62].mxu0 }
 0x42a   : > { %v10215_v5 = vadd.f32 %v10977_v21, %v10119_v9  ;;  %v10206_v0 = vpop.f32.mrb[63].mxu0  ;;  %v16431_v23 = vadd.f32 %v10898_v27, %v16390_v40  ;;  %v10282_v3 = vmul.f32 0.1, %v10212_v55  ;;  %vm10267_vm4 = vcmp.ge.f32.partialorder %v10212_v55, 0.0 }
 0x42b   : > { %vm10265_vm2 = vcmp.ge.f32.partialorder %v10204_v60, 0.0  ;;  %v10280_v19 = vmul.f32 0.1, %v10204_v60  ;;  %v10207_v39 = vadd.f32 %v10206_v0, %v10111_v32 }
 0x42c   : > { %v10283_v41 = vmul.f32 0.1, %v10215_v5  ;;  %vm10268_vm6 = vcmp.ge.f32.partialorder %v10215_v5, 0.0  ;;  %v10297_v44 = vsel %vm10267_vm4, %v10212_v55, %v10282_v3 }
 0x42d   : > { %v10295_v30 = vsel %vm10265_vm2, %v10204_v60, %v10280_v19  ;;  %vm10266_vm5 = vcmp.ge.f32.partialorder %v10207_v39, 0.0  ;;  %v10281_v42 = vmul.f32 0.1, %v10207_v39  ;;  %v10313_v61 = vsel %vm5966_vm3, %v10297_v44, 0.0 }
 0x42e   : > { %v10310_v51 = vsel %vm5966_vm3, %v10295_v30, 0.0  ;;  %v10298_v28 = vsel %vm10268_vm6, %v10215_v5, %v10283_v41  ;;  %vm10420_vm2 = vcmask 57344  }
 0x42f   : > { %v10296_v31 = vsel %vm10266_vm5, %v10207_v39, %v10281_v42  ;;  %v10980_v18 = vpop.f32.mrb[64].mxu0  ;;  %v10315_v34 = vsel %vm5966_vm3, %v10298_v28, 0.0 }
 0x430   : > { %v10311_v13 = vsel %vm5966_vm3, %v10296_v31, 0.0  ;;  %v10228_v63 = vadd.f32 %v10980_v18, %v10132_v53  ;;  %v10219_v40 = vpop.f32.mrb[65].mxu0 }
 0x431   : > { %v10312_v57 = vadd.f32 %v10311_v13, %v10310_v51  ;;  %v10220_v6 = vadd.f32 %v10219_v40, %v10124_v4  ;;  %v10981_v59 = vpop.f32.mrb[66].mxu0 }
 0x432   : > { %v10231_v2 = vadd.f32 %v10981_v59, %v10135_v8  ;;  %v10222_v32 = vpop.f32.mrb[67].mxu0  ;;  %v10286_v45 = vmul.f32 0.1, %v10228_v63  ;;  %vm10271_vm8 = vcmp.ge.f32.partialorder %v10228_v63, 0.0 }
 0x433   : > { %v10314_v38 = vadd.f32 %v10313_v61, %v10312_v57  ;;  %vm10269_vm7 = vcmp.ge.f32.partialorder %v10220_v6, 0.0  ;;  %v10284_v36 = vmul.f32 0.1, %v10220_v6  ;;  %v10223_v52 = vadd.f32 %v10222_v32, %v10127_v33 }
 0x434   : > { %v10287_v24 = vmul.f32 0.1, %v10231_v2  ;;  %vm10272_vm10 = vcmp.ge.f32.partialorder %v10231_v2, 0.0  ;;  %v10301_v48 = vsel %vm10271_vm8, %v10228_v63, %v10286_v45 }
 0x435   : > { %v10299_v10 = vsel %vm10269_vm7, %v10220_v6, %v10284_v36  ;;  %v10316_v43 = vadd.f32 %v10315_v34, %v10314_v38  ;;  %vm10270_vm9 = vcmp.ge.f32.partialorder %v10223_v52, 0.0  ;;  %v10285_v54 = vmul.f32 0.1, %v10223_v52 }
 0x436   : > { %v10317_v9 = vsel %vm5966_vm3, %v10299_v10, 0.0  ;;  %v10302_v26 = vsel %vm10272_vm10, %v10231_v2, %v10287_v24  ;;  %v10321_v8 = vsel %vm5966_vm3, %v10301_v48, 0.0 }
 0x437   : > { %v10899_v12 = vpop.f32.mrb[52].mxu1  ;;  %v10318_v11 = vadd.f32 %v10317_v9, %v10316_v43  ;;  %v10300_v4 = vsel %vm10270_vm9, %v10223_v52, %v10285_v54  ;;  %v10323_v22 = vsel %vm5966_vm3, %v10302_v26, 0.0 }
 0x438   : > { %v10900_v29 = vpop.f32.mrb[53].mxu1  ;;  %v10319_v33 = vsel %vm5966_vm3, %v10300_v4, 0.0 }
 0x439   : > { %v10901_v25 = vadd.f32 %v10900_v29, %v10899_v12  ;;  %v10902_v46 = vpop.f32.mrb[54].mxu1  ;;  %v10320_v37 = vadd.f32 %v10319_v33, %v10318_v11 }
 0x43a   : > { %v10903_v20 = vpop.f32.mrb[55].mxu1 }
 0x43b   : > { %v10904_v58 = vadd.f32 %v10903_v20, %v10902_v46  ;;  %v10148_v53 = vadd.f32 %v10901_v25, %v16393_v1  ;;  %v10322_v7 = vadd.f32 %v10321_v8, %v10320_v37 }
 0x43d   : > { %v10151_v50 = vadd.f32 %v10904_v58, %v16396_v15  ;;  %v10324_v14 = vadd.f32 %v10323_v22, %v10322_v7 }
 0x446   : > { %v10905_v35 = vpop.f32.mrb[56].mxu1 }
 0x447   : > { %v10984_v17 = vpop.f32.mrb[68].mxu0  ;;  %v10906_v55 = vpop.f32.mrb[57].mxu1 }
 0x448   : > { %v10244_v16 = vadd.f32 %v10984_v17, %v10148_v53  ;;  %v10235_v27 = vpop.f32.mrb[69].mxu0  ;;  %v10907_v60 = vadd.f32 %v10906_v55, %v10905_v35  ;;  %v10908_v21 = vpop.f32.mrb[58].mxu1  ;;  %v277_v35 = vld [vmem:[%s16512_s6] sm:$0x1] }
 0x449   : > { %v10236_v5 = vadd.f32 %v10235_v27, %v16428_v62  ;;  %v10985_v0 = vpop.f32.mrb[70].mxu0  ;;  %v10909_v1 = vpop.f32.mrb[59].mxu1 }
 0x44a   : > { %v10290_v3 = vmul.f32 0.1, %v10244_v16  ;;  %v10247_v19 = vadd.f32 %v10985_v0, %v10151_v50  ;;  %v10238_v39 = vpop.f32.mrb[71].mxu0  ;;  %v10910_v15 = vadd.f32 %v10909_v1, %v10908_v21  ;;  %vm10275_vm12 = vcmp.ge.f32.partialorder %v10244_v16, 0.0 }
 0x44b   : > { %vm10273_vm11 = vcmp.ge.f32.partialorder %v10236_v5, 0.0  ;;  %v10288_v30 = vmul.f32 0.1, %v10236_v5  ;;  %v10239_v41 = vadd.f32 %v10238_v39, %v16431_v23  ;;  %v10156_v42 = vadd.f32 %v10907_v60, %v16405_v49 }
 0x44c   : > { %v10291_v31 = vmul.f32 0.1, %v10247_v19  ;;  %vm10276_vm14 = vcmp.ge.f32.partialorder %v10247_v19, 0.0  ;;  %v10159_v62 = vadd.f32 %v10910_v15, %v16408_v56  ;;  %v10305_v13 = vsel %vm10275_vm12, %v10244_v16, %v10290_v3 }
 0x44d   : > { %v10303_v44 = vsel %vm10273_vm11, %v10236_v5, %v10288_v30  ;;  %vm10274_vm13 = vcmp.ge.f32.partialorder %v10239_v41, 0.0  ;;  %v10289_v18 = vmul.f32 0.1, %v10239_v41  ;;  %v10329_v23 = vsel %vm5966_vm3, %v10305_v13, 0.0 }
 0x44e   : > { %v10325_v51 = vsel %vm5966_vm3, %v10303_v44, 0.0  ;;  %v10306_v57 = vsel %vm10276_vm14, %v10247_v19, %v10291_v31 }
 0x44f   : > { %v10326_v63 = vadd.f32 %v10325_v51, %v10324_v14  ;;  %v10304_v40 = vsel %vm10274_vm13, %v10239_v41, %v10289_v18  ;;  %v10331_v49 = vsel %vm5966_vm3, %v10306_v57, 0.0 }
 0x450   : > { %v10327_v28 = vsel %vm5966_vm3, %v10304_v40, 0.0 }
 0x451   : > { %v10328_v6 = vadd.f32 %v10327_v28, %v10326_v63 }
 0x453   : > { %v10330_v59 = vadd.f32 %v10329_v23, %v10328_v6 }
 0x455   : > { %v10332_v61 = vadd.f32 %v10331_v49, %v10330_v59 }
 0x457   : > { %v10911_v2 = vpop.f32.mrb[60].mxu1 }
 0x458   : > { %v10912_v32 = vpop.f32.mrb[61].mxu1  ;;  %v10988_v38 = vpop.f32.mrb[72].mxu0 }
 0x459   : > { %v10913_v36 = vadd.f32 %v10912_v32, %v10911_v2  ;;  %v10914_v52 = vpop.f32.mrb[62].mxu1  ;;  %v10251_v34 = vpop.f32.mrb[73].mxu0 }
 0x45a   : > { %v10252_v56 = vadd.f32 %v10251_v34, %v10156_v42  ;;  %v10915_v45 = vpop.f32.mrb[63].mxu1  ;;  %v10989_v10 = vpop.f32.mrb[74].mxu0 }
 0x45b   : > { %v10164_v43 = vadd.f32 %v10913_v36, %v16417_v47  ;;  %v10254_v9 = vpop.f32.mrb[75].mxu0 }
 0x45c   : > { %vm10277_vm15 = vcmp.ge.f32.partialorder %v10252_v56, 0.0  ;;  %v10292_v24 = vmul.f32 0.1, %v10252_v56  ;;  %v10255_v54 = vadd.f32 %v10254_v9, %v10159_v62 }
 0x45d   : > { %v10260_v12 = vadd.f32 %v10988_v38, %v10164_v43 }
 0x45e   : > { %v10307_v11 = vsel %vm10277_vm15, %v10252_v56, %v10292_v24  ;;  %vm10278_vm0 = vcmp.ge.f32.partialorder %v10255_v54, 0.0  ;;  %v10293_v29 = vmul.f32 0.1, %v10255_v54 }
 0x45f   : > { %vm10279_vm1 = vcmp.ge.f32.partialorder %v10260_v12, 0.0  ;;  %v10294_v48 = vmul.f32 0.1, %v10260_v12  ;;  %v10333_v4 = vsel %vm5966_vm3, %v10307_v11, 0.0 }
 0x460   : > { %v10334_v25 = vadd.f32 %v10333_v4, %v10332_v61  ;;  %v10308_v46 = vsel %vm10278_vm0, %v10255_v54, %v10293_v29 }
 0x461   : > { %v10309_v33 = vsel %vm10279_vm1, %v10260_v12, %v10294_v48  ;;  %v10335_v20 = vsel %vm5966_vm3, %v10308_v46, 0.0 }
 0x462   : > { %v10337_v47 = vsel %vm5966_vm3, %v10309_v33, 0.0  ;;  %v10336_v26 = vadd.f32 %v10335_v20, %v10334_v25 }
 0x464   : > { %v10338_v37 = vadd.f32 %v10337_v47, %v10336_v26 }
 0x466   : > { %v10339_v58 = vrot.slane %v10338_v37, 4 }
 0x468   : > { %v10340_v53 = vadd.f32 %v10339_v58, %v10338_v37 }
 0x46a   : > { %v10341_v8 = vrot.slane %v10340_v53, 2 }
 0x46c   : > { %v10342_v7 = vadd.f32 %v10341_v8, %v10340_v53 }
 0x46e   : > { %v10343_v50 = vrot.slane %v10342_v7, 1 }
 0x470   : > { %v10344_v22 = vadd.f32 %v10343_v50, %v10342_v7 }
 0x472   : > { %v10346_v14 = vmul.f32 0.008333334, %v10344_v22 }
 0x474   : > { %10999 = vmatmul.mubr.msk.f32.vlgmr.msra.gmra.mrb[76].mxu0 %vm5966_vm3, %v10346_v14 }
 0x547   : > { %v10416_v17 = vpop.f32.mrb[76].mxu0 }
 0x548   : > { %v10417_v55 = vadd.f32 %v10416_v17, %v277_v35  ;;  %v11000_v16 = vpop.f32.mrb[77].mxu0 }
 0x54a   : > { %10421 = vst.msk [vmem:[%s270_s29] sm:$0x1] %vm10420_vm2, %v10417_v55 }
 0x54b   : > { %11140 = shalt.err (!%p11137_p3)
}
 0x54c   : > { %s11141_s19 = scalar_lea.hbm %s16464_s14, 16  ;;  %s11145_s22 = scalar_lea.hbm %s16513_s7, 32 }
 0x54d   : > { %p11142_p4 = scmp.ne.s32.totalorder %s16464_s14, %s11141_s19  ;;  %p11146_p9 = scmp.lt.u32.totalorder %s16464_s14, %s16513_s7 }
 0x54e   : > { %p11147_p10 = scmp.lt.u32.totalorder %s11145_s22, %s11141_s19  ;;  %p11149_p12 = scmp.lt.u32.totalorder %s11141_s19, %s16464_s14 }
 0x54f   : > { %p11143_p7 = pnand %p11142_p4, %p11278_p5 }
 0x550   : > { %p11148_p11 = por %p11147_p10, %p11146_p9 }
 0x551   : > { %p11144_p8 = pneg %p11143_p7 }
 0x552   : > { %p11150_p13 = por %p11149_p12, %p11148_p11 }
 0x554   : > { %p11151_p0 = pnand %p11150_p13, %p11144_p8 }
 0x556   : > { %11154 = shalt.err (!%p11151_p0)
}
 0x557   : > { %11009 = dma.vmem_to_hbm [thread:$0]  (%p11278_p5), %s16466_s8, 16, %s16464_s14, %s10423_s15  }
 0x558 PF: > { %p11015_p1 = scmp.ge.s32.totalorder %s11189_s27, 2  ;;  %s10447_s9 = sand.u32 1, %s11177_s24  }
 0x559   : > { %s10448_s13 = scalar_lea.sflag [#allocation3], %s10447_s9 }
 0x55a   : > { %p11012_p2 = pnand %p11015_p1, %p11282_p6 }
 0x55c   : > { %11172 = dma.done.wait (!%p11012_p2), %s10448_s13, 16  }
 0x55d   : > { %11174 = vsyncadd (!%p11012_p2), %s10448_s13, 4294967280  ;;  %p17_p3 = scmp.ge.s32.totalorder %s11265_s30, 4   ;;  %s17390_s24 = smov %s11181_s25 }
 0x55e   : > { %s17391_s25 = smov %s11185_s26  ;;  %s17392_s26 = smov %s11276_s10 }
 0x55f   : > { %s17393_s27 = smov %s11265_s30  ;;  %19 = sbr.rel (!%p17_p3) target bundleno = 3 (0x3), region = 83 }
 0x566   :  { %10452 = vsyncpa [#allocation3], 1 }
 0x567   :  { %10454 = vsyncpa [#allocation3 + $0x1], 1 }

</bundles_post_ra>
